<compile_context>
chip_gen: v7x
topology: tpu7x:2x2x1
jax: 0.10.0
libtpu: 0.0.40
codegen_flags: <defaults>
</compile_context>

<pallas_src>
import functools

import jax
import jax.numpy as jnp
from jax.experimental import pallas as pl
from jax.experimental.pallas import tpu as pltpu

NEG_SLOPE = 0.01  # nn.LeakyReLU default


def _leaky(x):
    return jnp.where(x > 0, x, NEG_SLOPE * x)


def _geom(kernel_size, h_in=8):
    """Spatial sizes produced by the module for a (h_in x h_in) input."""
    k = kernel_size
    hp1 = h_in + 2 * (k - 1)          # conv1 padded input
    ho1 = hp1 - k + 1                 # conv1 output
    po1 = ho1 // 2                    # pool1 output
    hp2 = po1 + 2 * (k - 1)           # conv2 padded input
    ho2 = hp2 - k + 1                 # conv2 output
    po2 = ho2 // 2                    # pool2 output
    return hp1, ho1, po1, hp2, ho2, po2


# --------------------------------- forward ---------------------------------

@functools.partial(jax.jit, static_argnames=("kernel_size",))
def parameterized_cnn_forward(x, params, kernel_size):
    k = kernel_size
    pad = k - 1
    B, cin, H, W = x.shape
    assert H == W
    c1 = params["conv1_w"].shape[0]
    c2 = params["conv2_w"].shape[0]
    n_cls = params["fc2_w"].shape[0]

    hp1, ho1, po1, hp2, ho2, po2 = _geom(k, H)
    n1 = B * hp1 * hp1                 # flattened padded grid 1  (row = b*Hp*Wp + h*Wp + w)
    n2 = B * hp2 * hp2                 # flattened padded grid 2
    ext1 = pad * hp1 + pad             # trailing zero rows so every shifted slice is in-bounds
    ext2 = pad * hp2 + pad
    k1p = n1 - hp1 - 1                 # rows of the 2x2-max candidate map (stage 1)
    k2p = n2 - hp2 - 1
    offs1 = [dy * hp1 + dx for dy in range(k) for dx in range(k)]
    offs2 = [dy * hp2 + dx for dy in range(k) for dx in range(k)]

    # ---------------- host-side layout prep (weights + the raw input only) ----------------
    # input: NCHW -> padded NHWC -> (B*Hp1*Wp1, Cin), plus ext1 trailing zero rows
    xp = jnp.pad(jnp.transpose(x, (0, 2, 3, 1)),
                 ((0, 0), (pad, pad), (pad, pad), (0, 0)))
    xp = xp.reshape(n1, cin)
    xp = jnp.pad(xp, ((0, ext1), (0, 0)))

    # conv weights: (Cout, Cin, kh, kw) -> (kh*kw, Cin, Cout); biases -> (1, Cout)
    w1 = jnp.transpose(params["conv1_w"], (2, 3, 1, 0)).reshape(k * k, cin, c1)
    b1 = params["conv1_b"].reshape(1, c1)
    w2 = jnp.transpose(params["conv2_w"], (2, 3, 1, 0)).reshape(k * k, c1, c2)
    b2 = params["conv2_b"].reshape(1, c2)

    # fc1: torch flatten order is (c, i, j); the kernel flattens as (i, j, c),
    # so permute the weight rows once on the host instead of transposing activations.
    wf1 = params["fc1_w"].reshape(64, c2, po2, po2).transpose(2, 3, 1, 0)
    wf1 = wf1.reshape(po2 * po2 * c2, 64)
    bf1 = params["fc1_b"].reshape(1, 64)
    wf2 = params["fc2_w"].T                       # (64, num_classes)
    bf2 = params["fc2_b"].reshape(1, n_cls)

    # ---------------------------------- fused kernel ----------------------------------
    def kernel(xp_ref, w1_ref, b1_ref, w2_ref, b2_ref,
               wf1_ref, bf1_ref, wf2_ref, bf2_ref, out_ref,
               a1_ref, p1_ref, xp2_ref, a2_ref, p2_ref, xf_ref):
        # ---- conv1 + LeakyReLU: k*k shifted VMEM slices, one MXU matmul each ----
        acc = None
        for kk, off in enumerate(offs1):
            t = jnp.dot(xp_ref[pl.ds(off, n1), :], w1_ref[kk],
                        preferred_element_type=jnp.float32)
            acc = t if acc is None else acc + t
        a1_ref[...] = _leaky(acc + b1_ref[...])

        # ---- pool1: VPU max over the 4 window offsets (0, 1, Wp, Wp+1) ----
        p1_ref[...] = jnp.maximum(
            jnp.maximum(a1_ref[pl.ds(0, k1p), :], a1_ref[pl.ds(1, k1p), :]),
            jnp.maximum(a1_ref[pl.ds(hp1, k1p), :], a1_ref[pl.ds(hp1 + 1, k1p), :]))

        # ---- build conv2's zero-padded flat input from pool1 (anchors on every 2nd row/col) ----
        xp2_ref[...] = jnp.zeros((n2 + ext2, c1), jnp.float32)
        for b in range(B):
            for i in range(po1):
                dst = b * hp2 * hp2 + (pad + i) * hp2 + pad
                src = b * hp1 * hp1 + (2 * i) * hp1
                xp2_ref[pl.ds(dst, po1), :] = p1_ref[pl.ds(src, po1, 2), :]

        # ---- conv2 + LeakyReLU ----
        acc = None
        for kk, off in enumerate(offs2):
            t = jnp.dot(xp2_ref[pl.ds(off, n2), :], w2_ref[kk],
                        preferred_element_type=jnp.float32)
            acc = t if acc is None else acc + t
        a2_ref[...] = _leaky(acc + b2_ref[...])

        # ---- pool2 ----
        p2_ref[...] = jnp.maximum(
            jnp.maximum(a2_ref[pl.ds(0, k2p), :], a2_ref[pl.ds(1, k2p), :]),
            jnp.maximum(a2_ref[pl.ds(hp2, k2p), :], a2_ref[pl.ds(hp2 + 1, k2p), :]))

        # ---- flatten to (B, po2*po2*c2) in (i, j, c) order (fc1 weights were permuted to match) ----
        for b in range(B):
            for i in range(po2):
                for j in range(po2):
                    s = i * po2 + j
                    row = b * hp2 * hp2 + 2 * i * hp2 + 2 * j
                    xf_ref[pl.ds(b, 1), pl.ds(s * c2, c2)] = p2_ref[pl.ds(row, 1), :]

        # ---- fc1 + LeakyReLU + fc2 ----
        h = jnp.dot(xf_ref[...], wf1_ref[...], preferred_element_type=jnp.float32)
        h = _leaky(h + bf1_ref[...])
        out_ref[...] = jnp.dot(h, wf2_ref[...],
                               preferred_element_type=jnp.float32) + bf2_ref[...]

    vmem = pl.BlockSpec(memory_space=pltpu.MemorySpace.VMEM)
    return pl.pallas_call(
        kernel,
        out_shape=jax.ShapeDtypeStruct((B, n_cls), jnp.float32),
        in_specs=[vmem] * 9,
        out_specs=vmem,
        scratch_shapes=[
            pltpu.VMEM((n1, c1), jnp.float32),          # conv1 activation (padded grid)
            pltpu.VMEM((k1p, c1), jnp.float32),         # 2x2-max candidate map 1
            pltpu.VMEM((n2 + ext2, c1), jnp.float32),   # conv2 padded flat input
            pltpu.VMEM((n2, c2), jnp.float32),          # conv2 activation
            pltpu.VMEM((k2p, c2), jnp.float32),         # 2x2-max candidate map 2
            pltpu.VMEM((B, po2 * po2 * c2), jnp.float32),  # flattened fc features
        ],
    )(xp, w1, b1, w2, b2, wf1, bf1, wf2, bf2)


# ----------------------------- pure-JAX reference -----------------------------

def _reference_forward(x, params, kernel_size):
    pad = kernel_size - 1

    def conv(y, w, b):
        y = jax.lax.conv_general_dilated(
            y, w, window_strides=(1, 1), padding=[(pad, pad), (pad, pad)],
            dimension_numbers=("NCHW", "OIHW", "NCHW"))
        return _leaky(y + b[None, :, None, None])

    def pool(y):
        return jax.lax.reduce_window(y, -jnp.inf, jax.lax.max,
                                     (1, 1, 2, 2), (1, 1, 2, 2), "VALID")

    y = pool(conv(x, params["conv1_w"], params["conv1_b"]))
    y = pool(conv(y, params["conv2_w"], params["conv2_b"]))
    y = y.reshape(y.shape[0], -1)
    y = _leaky(y @ params["fc1_w"].T + params["fc1_b"])
    return y @ params["fc2_w"].T + params["fc2_b"]


# --------------------------- parameter construction ---------------------------

def init_params(key, num_classes, hidden_size, kernel_size):
    """PyTorch-layout parameters with the default uniform(+-1/sqrt(fan_in)) init."""
    k = kernel_size
    ks = jax.random.split(key, 8)

    def u(kk, shape, fan_in):
        bound = 1.0 / jnp.sqrt(jnp.float32(fan_in))
        return jax.random.uniform(kk, shape, jnp.float32, -bound, bound)

    *_, po2 = _geom(k, 8)
    fc1_in = hidden_size * 2 * po2 * po2
    return {
        "conv1_w": u(ks[0], (hidden_size, 97, k, k), 97 * k * k),
        "conv1_b": u(ks[1], (hidden_size,), 97 * k * k),
        "conv2_w": u(ks[2], (hidden_size * 2, hidden_size, k, k), hidden_size * k * k),
        "conv2_b": u(ks[3], (hidden_size * 2,), hidden_size * k * k),
        "fc1_w": u(ks[4], (64, fc1_in), fc1_in),
        "fc1_b": u(ks[5], (64,), fc1_in),
        "fc2_w": u(ks[6], (num_classes, 64), 64),
        "fc2_b": u(ks[7], (num_classes,), 64),
    }


if __name__ == "__main__":
    num_classes, hidden_size, kernel_size = 10, 8, 3
    key = jax.random.PRNGKey(0)
    k_x, k_p = jax.random.split(key)

    # fc1 size is derived from an 8x8 spatial probe, so the input must be 8x8
    x = jax.random.normal(k_x, (2, 97, 8, 8), jnp.float32)
    params = init_params(k_p, num_classes, hidden_size, kernel_size)

    out = parameterized_cnn_forward(x, params, kernel_size)
    out = jax.block_until_ready(out)
    assert out.shape == (2, num_classes) and out.dtype == jnp.float32

    ref = _reference_forward(x, params, kernel_size)
    assert jnp.allclose(out, ref, atol=1e-3, rtol=1e-3), float(jnp.max(jnp.abs(out - ref)))

    print("KERNEL_OK")
</pallas_src>

<mosaic_0001>
module attributes {stable_mosaic.version = 11 : i64} {
  func.func @kernel(%arg0: memref<314x97xf32, #tpu.memory_space<vmem>>, %arg1: memref<9x97x8xf32, #tpu.memory_space<vmem>>, %arg2: memref<1x8xf32, #tpu.memory_space<vmem>>, %arg3: memref<9x8x16xf32, #tpu.memory_space<vmem>>, %arg4: memref<1x16xf32, #tpu.memory_space<vmem>>, %arg5: memref<144x64xf32, #tpu.memory_space<vmem>>, %arg6: memref<1x64xf32, #tpu.memory_space<vmem>>, %arg7: memref<64x10xf32, #tpu.memory_space<vmem>>, %arg8: memref<1x10xf32, #tpu.memory_space<vmem>>, %arg9: memref<2x10xf32, #tpu.memory_space<vmem>>, %arg10: memref<288x8xf32, #tpu.memory_space<vmem>>, %arg11: memref<275x8xf32, #tpu.memory_space<vmem>>, %arg12: memref<182x8xf32, #tpu.memory_space<vmem>>, %arg13: memref<162x16xf32, #tpu.memory_space<vmem>>, %arg14: memref<152x16xf32, #tpu.memory_space<vmem>>, %arg15: memref<2x144xf32, #tpu.memory_space<vmem>>) attributes {dimension_semantics = [], scalar_prefetch = 0 : i64, scratch_operands = 6 : i64, tpu.core_type = #tpu.core_type<tc>} {
    %c0 = arith.constant 0 : index
    %c0_0 = arith.constant 0 : index
    %0 = vector.load %arg0[%c0, %c0_0] : memref<314x97xf32, #tpu.memory_space<vmem>>, vector<288x97xf32>
    %c0_1 = arith.constant 0 : index
    %c0_2 = arith.constant 0 : index
    %c0_3 = arith.constant 0 : index
    %1 = vector.load %arg1[%c0_1, %c0_2, %c0_3] : memref<9x97x8xf32, #tpu.memory_space<vmem>>, vector<1x97x8xf32>
    %2 = vector.shape_cast %1 : vector<1x97x8xf32> to vector<97x8xf32>
    %cst = arith.constant dense<0.000000e+00> : vector<288x8xf32>
    %3 = tpu.matmul %0, %2, %cst {dimension_numbers = #tpu.dot_dimension_numbers<[1], [0], [0], [1], [0, 0, 1, 1], [], []>} : vector<288x97xf32>, vector<97x8xf32>, vector<288x8xf32> -> vector<288x8xf32>
    %c1 = arith.constant 1 : index
    %c0_4 = arith.constant 0 : index
    %4 = vector.load %arg0[%c1, %c0_4] : memref<314x97xf32, #tpu.memory_space<vmem>>, vector<288x97xf32>
    %c1_5 = arith.constant 1 : index
    %c0_6 = arith.constant 0 : index
    %c0_7 = arith.constant 0 : index
    %5 = vector.load %arg1[%c1_5, %c0_6, %c0_7] : memref<9x97x8xf32, #tpu.memory_space<vmem>>, vector<1x97x8xf32>
    %6 = vector.shape_cast %5 : vector<1x97x8xf32> to vector<97x8xf32>
    %cst_8 = arith.constant dense<0.000000e+00> : vector<288x8xf32>
    %7 = tpu.matmul %4, %6, %cst_8 {dimension_numbers = #tpu.dot_dimension_numbers<[1], [0], [0], [1], [0, 0, 1, 1], [], []>} : vector<288x97xf32>, vector<97x8xf32>, vector<288x8xf32> -> vector<288x8xf32>
    %8 = arith.addf %3, %7 : vector<288x8xf32>
    %c2 = arith.constant 2 : index
    %c0_9 = arith.constant 0 : index
    %9 = vector.load %arg0[%c2, %c0_9] : memref<314x97xf32, #tpu.memory_space<vmem>>, vector<288x97xf32>
    %c2_10 = arith.constant 2 : index
    %c0_11 = arith.constant 0 : index
    %c0_12 = arith.constant 0 : index
    %10 = vector.load %arg1[%c2_10, %c0_11, %c0_12] : memref<9x97x8xf32, #tpu.memory_space<vmem>>, vector<1x97x8xf32>
    %11 = vector.shape_cast %10 : vector<1x97x8xf32> to vector<97x8xf32>
    %cst_13 = arith.constant dense<0.000000e+00> : vector<288x8xf32>
    %12 = tpu.matmul %9, %11, %cst_13 {dimension_numbers = #tpu.dot_dimension_numbers<[1], [0], [0], [1], [0, 0, 1, 1], [], []>} : vector<288x97xf32>, vector<97x8xf32>, vector<288x8xf32> -> vector<288x8xf32>
    %13 = arith.addf %8, %12 : vector<288x8xf32>
    %c12 = arith.constant 12 : index
    %c0_14 = arith.constant 0 : index
    %14 = vector.load %arg0[%c12, %c0_14] : memref<314x97xf32, #tpu.memory_space<vmem>>, vector<288x97xf32>
    %c3 = arith.constant 3 : index
    %c0_15 = arith.constant 0 : index
    %c0_16 = arith.constant 0 : index
    %15 = vector.load %arg1[%c3, %c0_15, %c0_16] : memref<9x97x8xf32, #tpu.memory_space<vmem>>, vector<1x97x8xf32>
    %16 = vector.shape_cast %15 : vector<1x97x8xf32> to vector<97x8xf32>
    %cst_17 = arith.constant dense<0.000000e+00> : vector<288x8xf32>
    %17 = tpu.matmul %14, %16, %cst_17 {dimension_numbers = #tpu.dot_dimension_numbers<[1], [0], [0], [1], [0, 0, 1, 1], [], []>} : vector<288x97xf32>, vector<97x8xf32>, vector<288x8xf32> -> vector<288x8xf32>
    %18 = arith.addf %13, %17 : vector<288x8xf32>
    %c13 = arith.constant 13 : index
    %c0_18 = arith.constant 0 : index
    %19 = vector.load %arg0[%c13, %c0_18] : memref<314x97xf32, #tpu.memory_space<vmem>>, vector<288x97xf32>
    %c4 = arith.constant 4 : index
    %c0_19 = arith.constant 0 : index
    %c0_20 = arith.constant 0 : index
    %20 = vector.load %arg1[%c4, %c0_19, %c0_20] : memref<9x97x8xf32, #tpu.memory_space<vmem>>, vector<1x97x8xf32>
    %21 = vector.shape_cast %20 : vector<1x97x8xf32> to vector<97x8xf32>
    %cst_21 = arith.constant dense<0.000000e+00> : vector<288x8xf32>
    %22 = tpu.matmul %19, %21, %cst_21 {dimension_numbers = #tpu.dot_dimension_numbers<[1], [0], [0], [1], [0, 0, 1, 1], [], []>} : vector<288x97xf32>, vector<97x8xf32>, vector<288x8xf32> -> vector<288x8xf32>
    %23 = arith.addf %18, %22 : vector<288x8xf32>
    %c14 = arith.constant 14 : index
    %c0_22 = arith.constant 0 : index
    %24 = vector.load %arg0[%c14, %c0_22] : memref<314x97xf32, #tpu.memory_space<vmem>>, vector<288x97xf32>
    %c5 = arith.constant 5 : index
    %c0_23 = arith.constant 0 : index
    %c0_24 = arith.constant 0 : index
    %25 = vector.load %arg1[%c5, %c0_23, %c0_24] : memref<9x97x8xf32, #tpu.memory_space<vmem>>, vector<1x97x8xf32>
    %26 = vector.shape_cast %25 : vector<1x97x8xf32> to vector<97x8xf32>
    %cst_25 = arith.constant dense<0.000000e+00> : vector<288x8xf32>
    %27 = tpu.matmul %24, %26, %cst_25 {dimension_numbers = #tpu.dot_dimension_numbers<[1], [0], [0], [1], [0, 0, 1, 1], [], []>} : vector<288x97xf32>, vector<97x8xf32>, vector<288x8xf32> -> vector<288x8xf32>
    %28 = arith.addf %23, %27 : vector<288x8xf32>
    %c24 = arith.constant 24 : index
    %c0_26 = arith.constant 0 : index
    %29 = vector.load %arg0[%c24, %c0_26] : memref<314x97xf32, #tpu.memory_space<vmem>>, vector<288x97xf32>
    %c6 = arith.constant 6 : index
    %c0_27 = arith.constant 0 : index
    %c0_28 = arith.constant 0 : index
    %30 = vector.load %arg1[%c6, %c0_27, %c0_28] : memref<9x97x8xf32, #tpu.memory_space<vmem>>, vector<1x97x8xf32>
    %31 = vector.shape_cast %30 : vector<1x97x8xf32> to vector<97x8xf32>
    %cst_29 = arith.constant dense<0.000000e+00> : vector<288x8xf32>
    %32 = tpu.matmul %29, %31, %cst_29 {dimension_numbers = #tpu.dot_dimension_numbers<[1], [0], [0], [1], [0, 0, 1, 1], [], []>} : vector<288x97xf32>, vector<97x8xf32>, vector<288x8xf32> -> vector<288x8xf32>
    %33 = arith.addf %28, %32 : vector<288x8xf32>
    %c25 = arith.constant 25 : index
    %c0_30 = arith.constant 0 : index
    %34 = vector.load %arg0[%c25, %c0_30] : memref<314x97xf32, #tpu.memory_space<vmem>>, vector<288x97xf32>
    %c7 = arith.constant 7 : index
    %c0_31 = arith.constant 0 : index
    %c0_32 = arith.constant 0 : index
    %35 = vector.load %arg1[%c7, %c0_31, %c0_32] : memref<9x97x8xf32, #tpu.memory_space<vmem>>, vector<1x97x8xf32>
    %36 = vector.shape_cast %35 : vector<1x97x8xf32> to vector<97x8xf32>
    %cst_33 = arith.constant dense<0.000000e+00> : vector<288x8xf32>
    %37 = tpu.matmul %34, %36, %cst_33 {dimension_numbers = #tpu.dot_dimension_numbers<[1], [0], [0], [1], [0, 0, 1, 1], [], []>} : vector<288x97xf32>, vector<97x8xf32>, vector<288x8xf32> -> vector<288x8xf32>
    %38 = arith.addf %33, %37 : vector<288x8xf32>
    %c26 = arith.constant 26 : index
    %c0_34 = arith.constant 0 : index
    %39 = vector.load %arg0[%c26, %c0_34] : memref<314x97xf32, #tpu.memory_space<vmem>>, vector<288x97xf32>
    %c8 = arith.constant 8 : index
    %c0_35 = arith.constant 0 : index
    %c0_36 = arith.constant 0 : index
    %40 = vector.load %arg1[%c8, %c0_35, %c0_36] : memref<9x97x8xf32, #tpu.memory_space<vmem>>, vector<1x97x8xf32>
    %41 = vector.shape_cast %40 : vector<1x97x8xf32> to vector<97x8xf32>
    %cst_37 = arith.constant dense<0.000000e+00> : vector<288x8xf32>
    %42 = tpu.matmul %39, %41, %cst_37 {dimension_numbers = #tpu.dot_dimension_numbers<[1], [0], [0], [1], [0, 0, 1, 1], [], []>} : vector<288x97xf32>, vector<97x8xf32>, vector<288x8xf32> -> vector<288x8xf32>
    %43 = arith.addf %38, %42 : vector<288x8xf32>
    %c0_38 = arith.constant 0 : index
    %c0_39 = arith.constant 0 : index
    %44 = vector.load %arg2[%c0_38, %c0_39] : memref<1x8xf32, #tpu.memory_space<vmem>>, vector<1x8xf32>
    %45 = vector.broadcast %44 : vector<1x8xf32> to vector<288x8xf32>
    %46 = arith.addf %43, %45 : vector<288x8xf32>
    %cst_40 = arith.constant 0.000000e+00 : f32
    %47 = vector.broadcast %cst_40 : f32 to vector<288x8xf32>
    %48 = arith.cmpf ogt, %46, %47 : vector<288x8xf32>
    %cst_41 = arith.constant 0.00999999977 : f32
    %49 = vector.broadcast %cst_41 : f32 to vector<288x8xf32>
    %50 = arith.mulf %49, %46 : vector<288x8xf32>
    %51 = arith.select %48, %46, %50 : vector<288x8xi1>, vector<288x8xf32>
    %c0_42 = arith.constant 0 : index
    %c0_43 = arith.constant 0 : index
    %52 = vector.load %arg10[%c0_42, %c0_43] : memref<288x8xf32, #tpu.memory_space<vmem>>, vector<288x8xf32>
    tpu.vector_store %arg10[%c0_42, %c0_43], %51 {strides = array<i32>} : memref<288x8xf32, #tpu.memory_space<vmem>>, vector<288x8xf32>,
    %c0_44 = arith.constant 0 : index
    %c0_45 = arith.constant 0 : index
    %53 = vector.load %arg10[%c0_44, %c0_45] : memref<288x8xf32, #tpu.memory_space<vmem>>, vector<275x8xf32>
    %c1_46 = arith.constant 1 : index
    %c0_47 = arith.constant 0 : index
    %54 = vector.load %arg10[%c1_46, %c0_47] : memref<288x8xf32, #tpu.memory_space<vmem>>, vector<275x8xf32>
    %55 = arith.maximumf %53, %54 : vector<275x8xf32>
    %c12_48 = arith.constant 12 : index
    %c0_49 = arith.constant 0 : index
    %56 = vector.load %arg10[%c12_48, %c0_49] : memref<288x8xf32, #tpu.memory_space<vmem>>, vector<275x8xf32>
    %c13_50 = arith.constant 13 : index
    %c0_51 = arith.constant 0 : index
    %57 = vector.load %arg10[%c13_50, %c0_51] : memref<288x8xf32, #tpu.memory_space<vmem>>, vector<275x8xf32>
    %58 = arith.maximumf %56, %57 : vector<275x8xf32>
    %59 = arith.maximumf %55, %58 : vector<275x8xf32>
    %c0_52 = arith.constant 0 : index
    %c0_53 = arith.constant 0 : index
    %60 = vector.load %arg11[%c0_52, %c0_53] : memref<275x8xf32, #tpu.memory_space<vmem>>, vector<275x8xf32>
    tpu.vector_store %arg11[%c0_52, %c0_53], %59 {strides = array<i32>} : memref<275x8xf32, #tpu.memory_space<vmem>>, vector<275x8xf32>,
    %cst_54 = arith.constant 0.000000e+00 : f32
    %61 = vector.broadcast %cst_54 : f32 to vector<182x8xf32>
    %c0_55 = arith.constant 0 : index
    %c0_56 = arith.constant 0 : index
    %62 = vector.load %arg12[%c0_55, %c0_56] : memref<182x8xf32, #tpu.memory_space<vmem>>, vector<182x8xf32>
    tpu.vector_store %arg12[%c0_55, %c0_56], %61 {strides = array<i32>} : memref<182x8xf32, #tpu.memory_space<vmem>>, vector<182x8xf32>,
    %c0_57 = arith.constant 0 : index
    %c0_58 = arith.constant 0 : index
    %63 = tpu.strided_load %arg11[%c0_57, %c0_58] {strides = array<i32: 2, 1>} : memref<275x8xf32, #tpu.memory_space<vmem>>, vector<5x8xf32>
    %c20 = arith.constant 20 : index
    %c0_59 = arith.constant 0 : index
    %64 = vector.load %arg12[%c20, %c0_59] : memref<182x8xf32, #tpu.memory_space<vmem>>, vector<5x8xf32>
    tpu.vector_store %arg12[%c20, %c0_59], %63 {strides = array<i32>} : memref<182x8xf32, #tpu.memory_space<vmem>>, vector<5x8xf32>,
    %c24_60 = arith.constant 24 : index
    %c0_61 = arith.constant 0 : index
    %65 = tpu.strided_load %arg11[%c24_60, %c0_61] {strides = array<i32: 2, 1>} : memref<275x8xf32, #tpu.memory_space<vmem>>, vector<5x8xf32>
    %c29 = arith.constant 29 : index
    %c0_62 = arith.constant 0 : index
    %66 = vector.load %arg12[%c29, %c0_62] : memref<182x8xf32, #tpu.memory_space<vmem>>, vector<5x8xf32>
    tpu.vector_store %arg12[%c29, %c0_62], %65 {strides = array<i32>} : memref<182x8xf32, #tpu.memory_space<vmem>>, vector<5x8xf32>,
    %c48 = arith.constant 48 : index
    %c0_63 = arith.constant 0 : index
    %67 = tpu.strided_load %arg11[%c48, %c0_63] {strides = array<i32: 2, 1>} : memref<275x8xf32, #tpu.memory_space<vmem>>, vector<5x8xf32>
    %c38 = arith.constant 38 : index
    %c0_64 = arith.constant 0 : index
    %68 = vector.load %arg12[%c38, %c0_64] : memref<182x8xf32, #tpu.memory_space<vmem>>, vector<5x8xf32>
    tpu.vector_store %arg12[%c38, %c0_64], %67 {strides = array<i32>} : memref<182x8xf32, #tpu.memory_space<vmem>>, vector<5x8xf32>,
    %c72 = arith.constant 72 : index
    %c0_65 = arith.constant 0 : index
    %69 = tpu.strided_load %arg11[%c72, %c0_65] {strides = array<i32: 2, 1>} : memref<275x8xf32, #tpu.memory_space<vmem>>, vector<5x8xf32>
    %c47 = arith.constant 47 : index
    %c0_66 = arith.constant 0 : index
    %70 = vector.load %arg12[%c47, %c0_66] : memref<182x8xf32, #tpu.memory_space<vmem>>, vector<5x8xf32>
    tpu.vector_store %arg12[%c47, %c0_66], %69 {strides = array<i32>} : memref<182x8xf32, #tpu.memory_space<vmem>>, vector<5x8xf32>,
    %c96 = arith.constant 96 : index
    %c0_67 = arith.constant 0 : index
    %71 = tpu.strided_load %arg11[%c96, %c0_67] {strides = array<i32: 2, 1>} : memref<275x8xf32, #tpu.memory_space<vmem>>, vector<5x8xf32>
    %c56 = arith.constant 56 : index
    %c0_68 = arith.constant 0 : index
    %72 = vector.load %arg12[%c56, %c0_68] : memref<182x8xf32, #tpu.memory_space<vmem>>, vector<5x8xf32>
    tpu.vector_store %arg12[%c56, %c0_68], %71 {strides = array<i32>} : memref<182x8xf32, #tpu.memory_space<vmem>>, vector<5x8xf32>,
    %c144 = arith.constant 144 : index
    %c0_69 = arith.constant 0 : index
    %73 = tpu.strided_load %arg11[%c144, %c0_69] {strides = array<i32: 2, 1>} : memref<275x8xf32, #tpu.memory_space<vmem>>, vector<5x8xf32>
    %c101 = arith.constant 101 : index
    %c0_70 = arith.constant 0 : index
    %74 = vector.load %arg12[%c101, %c0_70] : memref<182x8xf32, #tpu.memory_space<vmem>>, vector<5x8xf32>
    tpu.vector_store %arg12[%c101, %c0_70], %73 {strides = array<i32>} : memref<182x8xf32, #tpu.memory_space<vmem>>, vector<5x8xf32>,
    %c168 = arith.constant 168 : index
    %c0_71 = arith.constant 0 : index
    %75 = tpu.strided_load %arg11[%c168, %c0_71] {strides = array<i32: 2, 1>} : memref<275x8xf32, #tpu.memory_space<vmem>>, vector<5x8xf32>
    %c110 = arith.constant 110 : index
    %c0_72 = arith.constant 0 : index
    %76 = vector.load %arg12[%c110, %c0_72] : memref<182x8xf32, #tpu.memory_space<vmem>>, vector<5x8xf32>
    tpu.vector_store %arg12[%c110, %c0_72], %75 {strides = array<i32>} : memref<182x8xf32, #tpu.memory_space<vmem>>, vector<5x8xf32>,
    %c192 = arith.constant 192 : index
    %c0_73 = arith.constant 0 : index
    %77 = tpu.strided_load %arg11[%c192, %c0_73] {strides = array<i32: 2, 1>} : memref<275x8xf32, #tpu.memory_space<vmem>>, vector<5x8xf32>
    %c119 = arith.constant 119 : index
    %c0_74 = arith.constant 0 : index
    %78 = vector.load %arg12[%c119, %c0_74] : memref<182x8xf32, #tpu.memory_space<vmem>>, vector<5x8xf32>
    tpu.vector_store %arg12[%c119, %c0_74], %77 {strides = array<i32>} : memref<182x8xf32, #tpu.memory_space<vmem>>, vector<5x8xf32>,
    %c216 = arith.constant 216 : index
    %c0_75 = arith.constant 0 : index
    %79 = tpu.strided_load %arg11[%c216, %c0_75] {strides = array<i32: 2, 1>} : memref<275x8xf32, #tpu.memory_space<vmem>>, vector<5x8xf32>
    %c128 = arith.constant 128 : index
    %c0_76 = arith.constant 0 : index
    %80 = vector.load %arg12[%c128, %c0_76] : memref<182x8xf32, #tpu.memory_space<vmem>>, vector<5x8xf32>
    tpu.vector_store %arg12[%c128, %c0_76], %79 {strides = array<i32>} : memref<182x8xf32, #tpu.memory_space<vmem>>, vector<5x8xf32>,
    %c240 = arith.constant 240 : index
    %c0_77 = arith.constant 0 : index
    %81 = tpu.strided_load %arg11[%c240, %c0_77] {strides = array<i32: 2, 1>} : memref<275x8xf32, #tpu.memory_space<vmem>>, vector<5x8xf32>
    %c137 = arith.constant 137 : index
    %c0_78 = arith.constant 0 : index
    %82 = vector.load %arg12[%c137, %c0_78] : memref<182x8xf32, #tpu.memory_space<vmem>>, vector<5x8xf32>
    tpu.vector_store %arg12[%c137, %c0_78], %81 {strides = array<i32>} : memref<182x8xf32, #tpu.memory_space<vmem>>, vector<5x8xf32>,
    %c0_79 = arith.constant 0 : index
    %c0_80 = arith.constant 0 : index
    %83 = vector.load %arg12[%c0_79, %c0_80] : memref<182x8xf32, #tpu.memory_space<vmem>>, vector<162x8xf32>
    %c0_81 = arith.constant 0 : index
    %c0_82 = arith.constant 0 : index
    %c0_83 = arith.constant 0 : index
    %84 = vector.load %arg3[%c0_81, %c0_82, %c0_83] : memref<9x8x16xf32, #tpu.memory_space<vmem>>, vector<1x8x16xf32>
    %85 = vector.shape_cast %84 : vector<1x8x16xf32> to vector<8x16xf32>
    %cst_84 = arith.constant dense<0.000000e+00> : vector<162x16xf32>
    %86 = tpu.matmul %83, %85, %cst_84 {dimension_numbers = #tpu.dot_dimension_numbers<[1], [0], [0], [1], [0, 0, 1, 1], [], []>} : vector<162x8xf32>, vector<8x16xf32>, vector<162x16xf32> -> vector<162x16xf32>
    %c1_85 = arith.constant 1 : index
    %c0_86 = arith.constant 0 : index
    %87 = vector.load %arg12[%c1_85, %c0_86] : memref<182x8xf32, #tpu.memory_space<vmem>>, vector<162x8xf32>
    %c1_87 = arith.constant 1 : index
    %c0_88 = arith.constant 0 : index
    %c0_89 = arith.constant 0 : index
    %88 = vector.load %arg3[%c1_87, %c0_88, %c0_89] : memref<9x8x16xf32, #tpu.memory_space<vmem>>, vector<1x8x16xf32>
    %89 = vector.shape_cast %88 : vector<1x8x16xf32> to vector<8x16xf32>
    %cst_90 = arith.constant dense<0.000000e+00> : vector<162x16xf32>
    %90 = tpu.matmul %87, %89, %cst_90 {dimension_numbers = #tpu.dot_dimension_numbers<[1], [0], [0], [1], [0, 0, 1, 1], [], []>} : vector<162x8xf32>, vector<8x16xf32>, vector<162x16xf32> -> vector<162x16xf32>
    %91 = arith.addf %86, %90 : vector<162x16xf32>
    %c2_91 = arith.constant 2 : index
    %c0_92 = arith.constant 0 : index
    %92 = vector.load %arg12[%c2_91, %c0_92] : memref<182x8xf32, #tpu.memory_space<vmem>>, vector<162x8xf32>
    %c2_93 = arith.constant 2 : index
    %c0_94 = arith.constant 0 : index
    %c0_95 = arith.constant 0 : index
    %93 = vector.load %arg3[%c2_93, %c0_94, %c0_95] : memref<9x8x16xf32, #tpu.memory_space<vmem>>, vector<1x8x16xf32>
    %94 = vector.shape_cast %93 : vector<1x8x16xf32> to vector<8x16xf32>
    %cst_96 = arith.constant dense<0.000000e+00> : vector<162x16xf32>
    %95 = tpu.matmul %92, %94, %cst_96 {dimension_numbers = #tpu.dot_dimension_numbers<[1], [0], [0], [1], [0, 0, 1, 1], [], []>} : vector<162x8xf32>, vector<8x16xf32>, vector<162x16xf32> -> vector<162x16xf32>
    %96 = arith.addf %91, %95 : vector<162x16xf32>
    %c9 = arith.constant 9 : index
    %c0_97 = arith.constant 0 : index
    %97 = vector.load %arg12[%c9, %c0_97] : memref<182x8xf32, #tpu.memory_space<vmem>>, vector<162x8xf32>
    %c3_98 = arith.constant 3 : index
    %c0_99 = arith.constant 0 : index
    %c0_100 = arith.constant 0 : index
    %98 = vector.load %arg3[%c3_98, %c0_99, %c0_100] : memref<9x8x16xf32, #tpu.memory_space<vmem>>, vector<1x8x16xf32>
    %99 = vector.shape_cast %98 : vector<1x8x16xf32> to vector<8x16xf32>
    %cst_101 = arith.constant dense<0.000000e+00> : vector<162x16xf32>
    %100 = tpu.matmul %97, %99, %cst_101 {dimension_numbers = #tpu.dot_dimension_numbers<[1], [0], [0], [1], [0, 0, 1, 1], [], []>} : vector<162x8xf32>, vector<8x16xf32>, vector<162x16xf32> -> vector<162x16xf32>
    %101 = arith.addf %96, %100 : vector<162x16xf32>
    %c10 = arith.constant 10 : index
    %c0_102 = arith.constant 0 : index
    %102 = vector.load %arg12[%c10, %c0_102] : memref<182x8xf32, #tpu.memory_space<vmem>>, vector<162x8xf32>
    %c4_103 = arith.constant 4 : index
    %c0_104 = arith.constant 0 : index
    %c0_105 = arith.constant 0 : index
    %103 = vector.load %arg3[%c4_103, %c0_104, %c0_105] : memref<9x8x16xf32, #tpu.memory_space<vmem>>, vector<1x8x16xf32>
    %104 = vector.shape_cast %103 : vector<1x8x16xf32> to vector<8x16xf32>
    %cst_106 = arith.constant dense<0.000000e+00> : vector<162x16xf32>
    %105 = tpu.matmul %102, %104, %cst_106 {dimension_numbers = #tpu.dot_dimension_numbers<[1], [0], [0], [1], [0, 0, 1, 1], [], []>} : vector<162x8xf32>, vector<8x16xf32>, vector<162x16xf32> -> vector<162x16xf32>
    %106 = arith.addf %101, %105 : vector<162x16xf32>
    %c11 = arith.constant 11 : index
    %c0_107 = arith.constant 0 : index
    %107 = vector.load %arg12[%c11, %c0_107] : memref<182x8xf32, #tpu.memory_space<vmem>>, vector<162x8xf32>
    %c5_108 = arith.constant 5 : index
    %c0_109 = arith.constant 0 : index
    %c0_110 = arith.constant 0 : index
    %108 = vector.load %arg3[%c5_108, %c0_109, %c0_110] : memref<9x8x16xf32, #tpu.memory_space<vmem>>, vector<1x8x16xf32>
    %109 = vector.shape_cast %108 : vector<1x8x16xf32> to vector<8x16xf32>
    %cst_111 = arith.constant dense<0.000000e+00> : vector<162x16xf32>
    %110 = tpu.matmul %107, %109, %cst_111 {dimension_numbers = #tpu.dot_dimension_numbers<[1], [0], [0], [1], [0, 0, 1, 1], [], []>} : vector<162x8xf32>, vector<8x16xf32>, vector<162x16xf32> -> vector<162x16xf32>
    %111 = arith.addf %106, %110 : vector<162x16xf32>
    %c18 = arith.constant 18 : index
    %c0_112 = arith.constant 0 : index
    %112 = vector.load %arg12[%c18, %c0_112] : memref<182x8xf32, #tpu.memory_space<vmem>>, vector<162x8xf32>
    %c6_113 = arith.constant 6 : index
    %c0_114 = arith.constant 0 : index
    %c0_115 = arith.constant 0 : index
    %113 = vector.load %arg3[%c6_113, %c0_114, %c0_115] : memref<9x8x16xf32, #tpu.memory_space<vmem>>, vector<1x8x16xf32>
    %114 = vector.shape_cast %113 : vector<1x8x16xf32> to vector<8x16xf32>
    %cst_116 = arith.constant dense<0.000000e+00> : vector<162x16xf32>
    %115 = tpu.matmul %112, %114, %cst_116 {dimension_numbers = #tpu.dot_dimension_numbers<[1], [0], [0], [1], [0, 0, 1, 1], [], []>} : vector<162x8xf32>, vector<8x16xf32>, vector<162x16xf32> -> vector<162x16xf32>
    %116 = arith.addf %111, %115 : vector<162x16xf32>
    %c19 = arith.constant 19 : index
    %c0_117 = arith.constant 0 : index
    %117 = vector.load %arg12[%c19, %c0_117] : memref<182x8xf32, #tpu.memory_space<vmem>>, vector<162x8xf32>
    %c7_118 = arith.constant 7 : index
    %c0_119 = arith.constant 0 : index
    %c0_120 = arith.constant 0 : index
    %118 = vector.load %arg3[%c7_118, %c0_119, %c0_120] : memref<9x8x16xf32, #tpu.memory_space<vmem>>, vector<1x8x16xf32>
    %119 = vector.shape_cast %118 : vector<1x8x16xf32> to vector<8x16xf32>
    %cst_121 = arith.constant dense<0.000000e+00> : vector<162x16xf32>
    %120 = tpu.matmul %117, %119, %cst_121 {dimension_numbers = #tpu.dot_dimension_numbers<[1], [0], [0], [1], [0, 0, 1, 1], [], []>} : vector<162x8xf32>, vector<8x16xf32>, vector<162x16xf32> -> vector<162x16xf32>
    %121 = arith.addf %116, %120 : vector<162x16xf32>
    %c20_122 = arith.constant 20 : index
    %c0_123 = arith.constant 0 : index
    %122 = vector.load %arg12[%c20_122, %c0_123] : memref<182x8xf32, #tpu.memory_space<vmem>>, vector<162x8xf32>
    %c8_124 = arith.constant 8 : index
    %c0_125 = arith.constant 0 : index
    %c0_126 = arith.constant 0 : index
    %123 = vector.load %arg3[%c8_124, %c0_125, %c0_126] : memref<9x8x16xf32, #tpu.memory_space<vmem>>, vector<1x8x16xf32>
    %124 = vector.shape_cast %123 : vector<1x8x16xf32> to vector<8x16xf32>
    %cst_127 = arith.constant dense<0.000000e+00> : vector<162x16xf32>
    %125 = tpu.matmul %122, %124, %cst_127 {dimension_numbers = #tpu.dot_dimension_numbers<[1], [0], [0], [1], [0, 0, 1, 1], [], []>} : vector<162x8xf32>, vector<8x16xf32>, vector<162x16xf32> -> vector<162x16xf32>
    %126 = arith.addf %121, %125 : vector<162x16xf32>
    %c0_128 = arith.constant 0 : index
    %c0_129 = arith.constant 0 : index
    %127 = vector.load %arg4[%c0_128, %c0_129] : memref<1x16xf32, #tpu.memory_space<vmem>>, vector<1x16xf32>
    %128 = vector.broadcast %127 : vector<1x16xf32> to vector<162x16xf32>
    %129 = arith.addf %126, %128 : vector<162x16xf32>
    %cst_130 = arith.constant 0.000000e+00 : f32
    %130 = vector.broadcast %cst_130 : f32 to vector<162x16xf32>
    %131 = arith.cmpf ogt, %129, %130 : vector<162x16xf32>
    %cst_131 = arith.constant 0.00999999977 : f32
    %132 = vector.broadcast %cst_131 : f32 to vector<162x16xf32>
    %133 = arith.mulf %132, %129 : vector<162x16xf32>
    %134 = arith.select %131, %129, %133 : vector<162x16xi1>, vector<162x16xf32>
    %c0_132 = arith.constant 0 : index
    %c0_133 = arith.constant 0 : index
    %135 = vector.load %arg13[%c0_132, %c0_133] : memref<162x16xf32, #tpu.memory_space<vmem>>, vector<162x16xf32>
    tpu.vector_store %arg13[%c0_132, %c0_133], %134 {strides = array<i32>} : memref<162x16xf32, #tpu.memory_space<vmem>>, vector<162x16xf32>,
    %c0_134 = arith.constant 0 : index
    %c0_135 = arith.constant 0 : index
    %136 = vector.load %arg13[%c0_134, %c0_135] : memref<162x16xf32, #tpu.memory_space<vmem>>, vector<152x16xf32>
    %c1_136 = arith.constant 1 : index
    %c0_137 = arith.constant 0 : index
    %137 = vector.load %arg13[%c1_136, %c0_137] : memref<162x16xf32, #tpu.memory_space<vmem>>, vector<152x16xf32>
    %138 = arith.maximumf %136, %137 : vector<152x16xf32>
    %c9_138 = arith.constant 9 : index
    %c0_139 = arith.constant 0 : index
    %139 = vector.load %arg13[%c9_138, %c0_139] : memref<162x16xf32, #tpu.memory_space<vmem>>, vector<152x16xf32>
    %c10_140 = arith.constant 10 : index
    %c0_141 = arith.constant 0 : index
    %140 = vector.load %arg13[%c10_140, %c0_141] : memref<162x16xf32, #tpu.memory_space<vmem>>, vector<152x16xf32>
    %141 = arith.maximumf %139, %140 : vector<152x16xf32>
    %142 = arith.maximumf %138, %141 : vector<152x16xf32>
    %c0_142 = arith.constant 0 : index
    %c0_143 = arith.constant 0 : index
    %143 = vector.load %arg14[%c0_142, %c0_143] : memref<152x16xf32, #tpu.memory_space<vmem>>, vector<152x16xf32>
    tpu.vector_store %arg14[%c0_142, %c0_143], %142 {strides = array<i32>} : memref<152x16xf32, #tpu.memory_space<vmem>>, vector<152x16xf32>,
    %c0_144 = arith.constant 0 : index
    %c0_145 = arith.constant 0 : index
    %144 = vector.load %arg14[%c0_144, %c0_145] : memref<152x16xf32, #tpu.memory_space<vmem>>, vector<1x16xf32>
    %c0_146 = arith.constant 0 : index
    %c0_147 = arith.constant 0 : index
    %145 = vector.load %arg15[%c0_146, %c0_147] : memref<2x144xf32, #tpu.memory_space<vmem>>, vector<1x16xf32>
    tpu.vector_store %arg15[%c0_146, %c0_147], %144 {strides = array<i32>} : memref<2x144xf32, #tpu.memory_space<vmem>>, vector<1x16xf32>,
    %c2_148 = arith.constant 2 : index
    %c0_149 = arith.constant 0 : index
    %146 = vector.load %arg14[%c2_148, %c0_149] : memref<152x16xf32, #tpu.memory_space<vmem>>, vector<1x16xf32>
    %c0_150 = arith.constant 0 : index
    %c16 = arith.constant 16 : index
    %147 = vector.load %arg15[%c0_150, %c16] : memref<2x144xf32, #tpu.memory_space<vmem>>, vector<1x16xf32>
    tpu.vector_store %arg15[%c0_150, %c16], %146 {strides = array<i32>} : memref<2x144xf32, #tpu.memory_space<vmem>>, vector<1x16xf32>,
    %c4_151 = arith.constant 4 : index
    %c0_152 = arith.constant 0 : index
    %148 = vector.load %arg14[%c4_151, %c0_152] : memref<152x16xf32, #tpu.memory_space<vmem>>, vector<1x16xf32>
    %c0_153 = arith.constant 0 : index
    %c32 = arith.constant 32 : index
    %149 = vector.load %arg15[%c0_153, %c32] : memref<2x144xf32, #tpu.memory_space<vmem>>, vector<1x16xf32>
    tpu.vector_store %arg15[%c0_153, %c32], %148 {strides = array<i32>} : memref<2x144xf32, #tpu.memory_space<vmem>>, vector<1x16xf32>,
    %c18_154 = arith.constant 18 : index
    %c0_155 = arith.constant 0 : index
    %150 = vector.load %arg14[%c18_154, %c0_155] : memref<152x16xf32, #tpu.memory_space<vmem>>, vector<1x16xf32>
    %c0_156 = arith.constant 0 : index
    %c48_157 = arith.constant 48 : index
    %151 = vector.load %arg15[%c0_156, %c48_157] : memref<2x144xf32, #tpu.memory_space<vmem>>, vector<1x16xf32>
    tpu.vector_store %arg15[%c0_156, %c48_157], %150 {strides = array<i32>} : memref<2x144xf32, #tpu.memory_space<vmem>>, vector<1x16xf32>,
    %c20_158 = arith.constant 20 : index
    %c0_159 = arith.constant 0 : index
    %152 = vector.load %arg14[%c20_158, %c0_159] : memref<152x16xf32, #tpu.memory_space<vmem>>, vector<1x16xf32>
    %c0_160 = arith.constant 0 : index
    %c64 = arith.constant 64 : index
    %153 = vector.load %arg15[%c0_160, %c64] : memref<2x144xf32, #tpu.memory_space<vmem>>, vector<1x16xf32>
    tpu.vector_store %arg15[%c0_160, %c64], %152 {strides = array<i32>} : memref<2x144xf32, #tpu.memory_space<vmem>>, vector<1x16xf32>,
    %c22 = arith.constant 22 : index
    %c0_161 = arith.constant 0 : index
    %154 = vector.load %arg14[%c22, %c0_161] : memref<152x16xf32, #tpu.memory_space<vmem>>, vector<1x16xf32>
    %c0_162 = arith.constant 0 : index
    %c80 = arith.constant 80 : index
    %155 = vector.load %arg15[%c0_162, %c80] : memref<2x144xf32, #tpu.memory_space<vmem>>, vector<1x16xf32>
    tpu.vector_store %arg15[%c0_162, %c80], %154 {strides = array<i32>} : memref<2x144xf32, #tpu.memory_space<vmem>>, vector<1x16xf32>,
    %c36 = arith.constant 36 : index
    %c0_163 = arith.constant 0 : index
    %156 = vector.load %arg14[%c36, %c0_163] : memref<152x16xf32, #tpu.memory_space<vmem>>, vector<1x16xf32>
    %c0_164 = arith.constant 0 : index
    %c96_165 = arith.constant 96 : index
    %157 = vector.load %arg15[%c0_164, %c96_165] : memref<2x144xf32, #tpu.memory_space<vmem>>, vector<1x16xf32>
    tpu.vector_store %arg15[%c0_164, %c96_165], %156 {strides = array<i32>} : memref<2x144xf32, #tpu.memory_space<vmem>>, vector<1x16xf32>,
    %c38_166 = arith.constant 38 : index
    %c0_167 = arith.constant 0 : index
    %158 = vector.load %arg14[%c38_166, %c0_167] : memref<152x16xf32, #tpu.memory_space<vmem>>, vector<1x16xf32>
    %c0_168 = arith.constant 0 : index
    %c112 = arith.constant 112 : index
    %159 = vector.load %arg15[%c0_168, %c112] : memref<2x144xf32, #tpu.memory_space<vmem>>, vector<1x16xf32>
    tpu.vector_store %arg15[%c0_168, %c112], %158 {strides = array<i32>} : memref<2x144xf32, #tpu.memory_space<vmem>>, vector<1x16xf32>,
    %c40 = arith.constant 40 : index
    %c0_169 = arith.constant 0 : index
    %160 = vector.load %arg14[%c40, %c0_169] : memref<152x16xf32, #tpu.memory_space<vmem>>, vector<1x16xf32>
    %c0_170 = arith.constant 0 : index
    %c128_171 = arith.constant 128 : index
    %161 = vector.load %arg15[%c0_170, %c128_171] : memref<2x144xf32, #tpu.memory_space<vmem>>, vector<1x16xf32>
    tpu.vector_store %arg15[%c0_170, %c128_171], %160 {strides = array<i32>} : memref<2x144xf32, #tpu.memory_space<vmem>>, vector<1x16xf32>,
    %c81 = arith.constant 81 : index
    %c0_172 = arith.constant 0 : index
    %162 = vector.load %arg14[%c81, %c0_172] : memref<152x16xf32, #tpu.memory_space<vmem>>, vector<1x16xf32>
    %c1_173 = arith.constant 1 : index
    %c0_174 = arith.constant 0 : index
    %163 = vector.load %arg15[%c1_173, %c0_174] : memref<2x144xf32, #tpu.memory_space<vmem>>, vector<1x16xf32>
    tpu.vector_store %arg15[%c1_173, %c0_174], %162 {strides = array<i32>} : memref<2x144xf32, #tpu.memory_space<vmem>>, vector<1x16xf32>,
    %c83 = arith.constant 83 : index
    %c0_175 = arith.constant 0 : index
    %164 = vector.load %arg14[%c83, %c0_175] : memref<152x16xf32, #tpu.memory_space<vmem>>, vector<1x16xf32>
    %c1_176 = arith.constant 1 : index
    %c16_177 = arith.constant 16 : index
    %165 = vector.load %arg15[%c1_176, %c16_177] : memref<2x144xf32, #tpu.memory_space<vmem>>, vector<1x16xf32>
    tpu.vector_store %arg15[%c1_176, %c16_177], %164 {strides = array<i32>} : memref<2x144xf32, #tpu.memory_space<vmem>>, vector<1x16xf32>,
    %c85 = arith.constant 85 : index
    %c0_178 = arith.constant 0 : index
    %166 = vector.load %arg14[%c85, %c0_178] : memref<152x16xf32, #tpu.memory_space<vmem>>, vector<1x16xf32>
    %c1_179 = arith.constant 1 : index
    %c32_180 = arith.constant 32 : index
    %167 = vector.load %arg15[%c1_179, %c32_180] : memref<2x144xf32, #tpu.memory_space<vmem>>, vector<1x16xf32>
    tpu.vector_store %arg15[%c1_179, %c32_180], %166 {strides = array<i32>} : memref<2x144xf32, #tpu.memory_space<vmem>>, vector<1x16xf32>,
    %c99 = arith.constant 99 : index
    %c0_181 = arith.constant 0 : index
    %168 = vector.load %arg14[%c99, %c0_181] : memref<152x16xf32, #tpu.memory_space<vmem>>, vector<1x16xf32>
    %c1_182 = arith.constant 1 : index
    %c48_183 = arith.constant 48 : index
    %169 = vector.load %arg15[%c1_182, %c48_183] : memref<2x144xf32, #tpu.memory_space<vmem>>, vector<1x16xf32>
    tpu.vector_store %arg15[%c1_182, %c48_183], %168 {strides = array<i32>} : memref<2x144xf32, #tpu.memory_space<vmem>>, vector<1x16xf32>,
    %c101_184 = arith.constant 101 : index
    %c0_185 = arith.constant 0 : index
    %170 = vector.load %arg14[%c101_184, %c0_185] : memref<152x16xf32, #tpu.memory_space<vmem>>, vector<1x16xf32>
    %c1_186 = arith.constant 1 : index
    %c64_187 = arith.constant 64 : index
    %171 = vector.load %arg15[%c1_186, %c64_187] : memref<2x144xf32, #tpu.memory_space<vmem>>, vector<1x16xf32>
    tpu.vector_store %arg15[%c1_186, %c64_187], %170 {strides = array<i32>} : memref<2x144xf32, #tpu.memory_space<vmem>>, vector<1x16xf32>,
    %c103 = arith.constant 103 : index
    %c0_188 = arith.constant 0 : index
    %172 = vector.load %arg14[%c103, %c0_188] : memref<152x16xf32, #tpu.memory_space<vmem>>, vector<1x16xf32>
    %c1_189 = arith.constant 1 : index
    %c80_190 = arith.constant 80 : index
    %173 = vector.load %arg15[%c1_189, %c80_190] : memref<2x144xf32, #tpu.memory_space<vmem>>, vector<1x16xf32>
    tpu.vector_store %arg15[%c1_189, %c80_190], %172 {strides = array<i32>} : memref<2x144xf32, #tpu.memory_space<vmem>>, vector<1x16xf32>,
    %c117 = arith.constant 117 : index
    %c0_191 = arith.constant 0 : index
    %174 = vector.load %arg14[%c117, %c0_191] : memref<152x16xf32, #tpu.memory_space<vmem>>, vector<1x16xf32>
    %c1_192 = arith.constant 1 : index
    %c96_193 = arith.constant 96 : index
    %175 = vector.load %arg15[%c1_192, %c96_193] : memref<2x144xf32, #tpu.memory_space<vmem>>, vector<1x16xf32>
    tpu.vector_store %arg15[%c1_192, %c96_193], %174 {strides = array<i32>} : memref<2x144xf32, #tpu.memory_space<vmem>>, vector<1x16xf32>,
    %c119_194 = arith.constant 119 : index
    %c0_195 = arith.constant 0 : index
    %176 = vector.load %arg14[%c119_194, %c0_195] : memref<152x16xf32, #tpu.memory_space<vmem>>, vector<1x16xf32>
    %c1_196 = arith.constant 1 : index
    %c112_197 = arith.constant 112 : index
    %177 = vector.load %arg15[%c1_196, %c112_197] : memref<2x144xf32, #tpu.memory_space<vmem>>, vector<1x16xf32>
    tpu.vector_store %arg15[%c1_196, %c112_197], %176 {strides = array<i32>} : memref<2x144xf32, #tpu.memory_space<vmem>>, vector<1x16xf32>,
    %c121 = arith.constant 121 : index
    %c0_198 = arith.constant 0 : index
    %178 = vector.load %arg14[%c121, %c0_198] : memref<152x16xf32, #tpu.memory_space<vmem>>, vector<1x16xf32>
    %c1_199 = arith.constant 1 : index
    %c128_200 = arith.constant 128 : index
    %179 = vector.load %arg15[%c1_199, %c128_200] : memref<2x144xf32, #tpu.memory_space<vmem>>, vector<1x16xf32>
    tpu.vector_store %arg15[%c1_199, %c128_200], %178 {strides = array<i32>} : memref<2x144xf32, #tpu.memory_space<vmem>>, vector<1x16xf32>,
    %c0_201 = arith.constant 0 : index
    %c0_202 = arith.constant 0 : index
    %180 = vector.load %arg15[%c0_201, %c0_202] : memref<2x144xf32, #tpu.memory_space<vmem>>, vector<2x144xf32>
    %c0_203 = arith.constant 0 : index
    %c0_204 = arith.constant 0 : index
    %181 = vector.load %arg5[%c0_203, %c0_204] : memref<144x64xf32, #tpu.memory_space<vmem>>, vector<144x64xf32>
    %cst_205 = arith.constant dense<0.000000e+00> : vector<2x64xf32>
    %182 = tpu.matmul %180, %181, %cst_205 {dimension_numbers = #tpu.dot_dimension_numbers<[1], [0], [0], [1], [0, 0, 1, 1], [], []>} : vector<2x144xf32>, vector<144x64xf32>, vector<2x64xf32> -> vector<2x64xf32>
    %c0_206 = arith.constant 0 : index
    %c0_207 = arith.constant 0 : index
    %183 = vector.load %arg6[%c0_206, %c0_207] : memref<1x64xf32, #tpu.memory_space<vmem>>, vector<1x64xf32>
    %184 = vector.broadcast %183 : vector<1x64xf32> to vector<2x64xf32>
    %185 = arith.addf %182, %184 : vector<2x64xf32>
    %cst_208 = arith.constant 0.000000e+00 : f32
    %186 = vector.broadcast %cst_208 : f32 to vector<2x64xf32>
    %187 = arith.cmpf ogt, %185, %186 : vector<2x64xf32>
    %cst_209 = arith.constant 0.00999999977 : f32
    %188 = vector.broadcast %cst_209 : f32 to vector<2x64xf32>
    %189 = arith.mulf %188, %185 : vector<2x64xf32>
    %190 = arith.select %187, %185, %189 : vector<2x64xi1>, vector<2x64xf32>
    %c0_210 = arith.constant 0 : index
    %c0_211 = arith.constant 0 : index
    %191 = vector.load %arg7[%c0_210, %c0_211] : memref<64x10xf32, #tpu.memory_space<vmem>>, vector<64x10xf32>
    %cst_212 = arith.constant dense<0.000000e+00> : vector<2x10xf32>
    %192 = tpu.matmul %190, %191, %cst_212 {dimension_numbers = #tpu.dot_dimension_numbers<[1], [0], [0], [1], [0, 0, 1, 1], [], []>} : vector<2x64xf32>, vector<64x10xf32>, vector<2x10xf32> -> vector<2x10xf32>
    %c0_213 = arith.constant 0 : index
    %c0_214 = arith.constant 0 : index
    %193 = vector.load %arg8[%c0_213, %c0_214] : memref<1x10xf32, #tpu.memory_space<vmem>>, vector<1x10xf32>
    %194 = vector.broadcast %193 : vector<1x10xf32> to vector<2x10xf32>
    %195 = arith.addf %192, %194 : vector<2x10xf32>
    %c0_215 = arith.constant 0 : index
    %c0_216 = arith.constant 0 : index
    %196 = vector.load %arg9[%c0_215, %c0_216] : memref<2x10xf32, #tpu.memory_space<vmem>>, vector<2x10xf32>
    tpu.vector_store %arg9[%c0_215, %c0_216], %195 {strides = array<i32>} : memref<2x10xf32, #tpu.memory_space<vmem>>, vector<2x10xf32>,
    return
  }
}

</mosaic_0001>

<bundles_post_ra>
// kernel: parameterized_cnn_forward.1
= control target key start
LH: loop header
LB: loop body
LE: loop exit
PB: predicated region body
PF: predicated region fallthrough
CT: control target
= control target key end

     0   :  { %vm132_vm0 = vcmask 793600   ;;  %vm241_vm1 = vcmask 1040384   ;;  %s14254_s0 = inlined_call_operand.vmem [shape: f32[314,97], index: 0, kind: input, shape index: {}]   ;;  %s14255_s1 = inlined_call_operand.vmem [shape: f32[9,97,8], index: 1, kind: input, shape index: {}]   ;;  %s14256_s2 = inlined_call_operand.vmem [shape: f32[1,8], index: 2, kind: input, shape index: {}]   ;;  %s14257_s3 = inlined_call_operand.vmem [shape: f32[9,8,16], index: 3, kind: input, shape index: {}]   ;;  %s14258_s4 = inlined_call_operand.vmem [shape: f32[1,16], index: 4, kind: input, shape index: {}]   ;;  %s14259_s5 = inlined_call_operand.vmem [shape: f32[144,64], index: 5, kind: input, shape index: {}]   ;;  %s14260_s6 = inlined_call_operand.vmem [shape: f32[1,64], index: 6, kind: input, shape index: {}]   ;;  %s14261_s7 = inlined_call_operand.vmem [shape: f32[64,10], index: 7, kind: input, shape index: {}]   ;;  %s14262_s8 = inlined_call_operand.vmem [shape: f32[1,10], index: 8, kind: input, shape index: {}]   ;;  %s14263_s9 = inlined_call_operand.hbm [shape: f32[2,10], index: 9, kind: output, shape index: {}]  }
   0x1   :  { %v7575_v0 = vld [vmem:[%s14255_s1 + $0x68] sm:$0xff]  ;;  %v7576_v1 = vld [vmem:[%s14255_s1 + $0x70] sm:$0xff]  ;;  %v7577_v2 = vld [vmem:[%s14255_s1 + $0x78] sm:$0xff] }
   0x2   :  { %v10202_v3 = vpack.c.bf16 %v7576_v1, %v7575_v0  ;;  %v7578_v4 = vld [vmem:[%s14255_s1 + $0x80] sm:$0xff]  ;;  %v7579_v6 = vld [vmem:[%s14255_s1 + $0x88] sm:$0xff]  ;;  %v7580_v7 = vld [vmem:[%s14255_s1 + $0x90] sm:$0xff] }
   0x3   :  { %v10206_v5 = vpack.c.bf16 %v7578_v4, %v7577_v2  ;;  %v82_v8 = vld [vmem:[%s14254_s0 + $0x1] sm:$0xff]  ;;  %v10210_v9 = vpack.c.bf16 %v7580_v7, %v7579_v6  ;;  %v7581_v10 = vld [vmem:[%s14255_s1 + $0x98] sm:$0xff]  ;;  %v7584_v14 = vld [vmem:[%s14255_s1 + $0xb0] sm:$0xff] }
   0x4   :  { %10203 = vmatprep.subr.bf16.mxu0 %v10202_v3  ;;  %10457 = vmatprep.subr.bf16.mxu1 %v10202_v3  ;;  %v7582_v11 = vld [vmem:[%s14255_s1 + $0xa0] sm:$0xff]  ;;  %v7583_v13 = vld [vmem:[%s14255_s1 + $0xa8] sm:$0xff]  ;;  %v7585_v16 = vld [vmem:[%s14255_s1 + $0xb8] sm:$0xff] }
   0x5   :  { %10205 = vmatpush3.bf16.msra.mxu0 %v10202_v3  ;;  %10464 = vmatpush3.bf16.msra.mxu1 %v10202_v3  ;;  %v10214_v12 = vpack.c.bf16 %v7582_v11, %v7581_v10  ;;  %v10218_v15 = vpack.c.bf16 %v7584_v14, %v7583_v13  ;;  %v7586_v17 = vld [vmem:[%s14255_s1 + $0xc0] sm:$0xff]  ;;  %v7587_v19 = vld [vmem:[%s14255_s1 + $0xc8] sm:$0x1]  ;;  %v71_v22 = vld [vmem:[%s14255_s1 + $0x10] sm:$0xff] }
   0x6   :  { %10207 = vmatprep.subr.bf16.mxu0 %v10206_v5  ;;  %8904 = vmatprep.mubr.msk.f32.mxu0 %vm132_vm0, %v82_v8  ;;  %v10222_v18 = vpack.c.bf16 %v7586_v17, %v7585_v16  ;;  %v69_v20 = vld [vmem:[%s14255_s1] sm:$0xff]  ;;  %v70_v21 = vld [vmem:[%s14255_s1 + $0x8] sm:$0xff]  ;;  %v72_v23 = vld [vmem:[%s14255_s1 + $0x18] sm:$0xff] }
   0x7   :  { %10458 = vmatprep.subr.bf16.mxu1 %v10206_v5  ;;  %v10226_v24 = vpack.c.bf16 %v70_v21, %v69_v20  ;;  %v83_v25 = vld [vmem:[%s14254_s0 + $0x9] sm:$0xff]  ;;  %v84_v26 = vld [vmem:[%s14254_s0 + $0x11] sm:$0xff]  ;;  %v10230_v27 = vpack.c.bf16 %v72_v23, %v71_v22  ;;  %v73_v28 = vld [vmem:[%s14255_s1 + $0x20] sm:$0xff] }
   0x8   :  { %v74_v29 = vld [vmem:[%s14255_s1 + $0x28] sm:$0xff]  ;;  %v85_v30 = vld [vmem:[%s14254_s0 + $0x19] sm:$0xff]  ;;  %v75_v33 = vld [vmem:[%s14255_s1 + $0x30] sm:$0xff] }
   0x9   :  { %10209 = vmatpush3.bf16.msra.mxu0 %v10206_v5  ;;  %10465 = vmatpush3.bf16.msra.mxu1 %v10206_v5  ;;  %v86_v31 = vld [vmem:[%s14254_s0 + $0x21] sm:$0xff]  ;;  %v10234_v32 = vpack.c.bf16 %v74_v29, %v73_v28  ;;  %v76_v34 = vld [vmem:[%s14255_s1 + $0x38] sm:$0xff]  ;;  %v87_v35 = vld [vmem:[%s14254_s0 + $0x29] sm:$0xff] }
   0xa   :  { %10211 = vmatprep.subr.bf16.mxu0 %v10210_v9  ;;  %10459 = vmatprep.subr.bf16.mxu1 %v10210_v9  ;;  %v88_v36 = vld [vmem:[%s14254_s0 + $0x31] sm:$0xff]  ;;  %v10238_v37 = vpack.c.bf16 %v76_v34, %v75_v33  ;;  %v77_v38 = vld [vmem:[%s14255_s1 + $0x40] sm:$0xff]  ;;  %v78_v39 = vld [vmem:[%s14255_s1 + $0x48] sm:$0xff] }
   0xb   :  { %v89_v40 = vld [vmem:[%s14254_s0 + $0x39] sm:$0xff] }
   0xd   :  { %10213 = vmatpush3.bf16.msra.mxu0 %v10210_v9  ;;  %10466 = vmatpush3.bf16.msra.mxu1 %v10210_v9 }
   0xe   :  { %10215 = vmatprep.subr.bf16.mxu0 %v10214_v12  ;;  %10460 = vmatprep.subr.bf16.mxu1 %v10214_v12 }
  0x11   :  { %10217 = vmatpush3.bf16.msra.mxu0 %v10214_v12  ;;  %10467 = vmatpush3.bf16.msra.mxu1 %v10214_v12 }
  0x12   :  { %10219 = vmatprep.subr.bf16.mxu0 %v10218_v15  ;;  %10461 = vmatprep.subr.bf16.mxu1 %v10218_v15 }
  0x15   :  { %10221 = vmatpush3.bf16.msra.mxu0 %v10218_v15  ;;  %10468 = vmatpush3.bf16.msra.mxu1 %v10218_v15 }
  0x16   :  { %10223 = vmatprep.subr.bf16.mxu0 %v10222_v18  ;;  %10462 = vmatprep.subr.bf16.mxu1 %v10222_v18 }
  0x19   :  { %10225 = vmatpush3.bf16.msra.mxu0 %v10222_v18  ;;  %10469 = vmatpush3.bf16.msra.mxu1 %v10222_v18 }
  0x1a   :  { %8902 = vmatprep.subr.msk.mxu0 %vm241_vm1, %v7587_v19  ;;  %10463 = vmatprep.subr.msk.mxu1 %vm241_vm1, %v7587_v19 }
  0x1d   :  { %8903 = vmatpush3.msk.msra.mxu0 %vm241_vm1, %v7587_v19  ;;  %10470 = vmatpush3.msk.msra.mxu1 %vm241_vm1, %v7587_v19 }
  0x1e   :  { %8905 = vmatmul.mubr.msk.f32.vlgmr.msra.gmra.mrb[0].mxu0 %vm132_vm0, %v83_v25  ;;  %10227 = vmatprep.subr.bf16.mxu0 %v10226_v24 }
  0x1f   :  { %10229 = vmatpush3.bf16.msra.mxu0 %v10226_v24  ;;  %8907 = vmatprep.mubr.msk.f32.mxu0 %vm132_vm0, %v84_v26 }
  0x20   :  { %10231 = vmatprep.subr.bf16.mxu0 %v10230_v27 }
  0x22   :  { %8908 = vmatmul.mubr.msk.f32.gmra.mrb[2].mxu0 %vm132_vm0, %v85_v30 }
  0x23   :  { %8910 = vmatprep.mubr.msk.f32.mxu0 %vm132_vm0, %v86_v31  ;;  %10233 = vmatpush3.bf16.msra.mxu0 %v10230_v27 }
  0x24   :  { %10235 = vmatprep.subr.bf16.mxu0 %v10234_v32 }
  0x26   :  { %8911 = vmatmul.mubr.msk.f32.gmra.mrb[4].mxu0 %vm132_vm0, %v87_v35 }
  0x27   :  { %8913 = vmatprep.mubr.msk.f32.mxu0 %vm132_vm0, %v88_v36  ;;  %10237 = vmatpush3.bf16.msra.mxu0 %v10234_v32 }
  0x28   :  { %14 = vsyncpa [#allocation9], 0  ;;  %v90_v41 = vld [vmem:[%s14254_s0 + $0x41] sm:$0xff]  ;;  %10239 = vmatprep.subr.bf16.mxu0 %v10238_v37  ;;  %v10242_v42 = vpack.c.bf16 %v78_v39, %v77_v38  ;;  %v79_v43 = vld [vmem:[%s14255_s1 + $0x50] sm:$0xff]  ;;  %vm4091_vm2 = vcmask 64512   ;;  %vm10797_vm3 = vmmov 0  }
  0x29   :  { %v80_v44 = vld [vmem:[%s14255_s1 + $0x58] sm:$0xff]  ;;  %v91_v45 = vld [vmem:[%s14254_s0 + $0x49] sm:$0xff]  ;;  %v94_v49 = vld [vmem:[%s14254_s0 + $0x61] sm:$0xff]  ;;  %s10800_s12 = smov 16   ;;  %s10801_s23 = smov 48  }
  0x2a   :  { %8914 = vmatmul.mubr.msk.f32.gmra.mrb[6].mxu0 %vm132_vm0, %v89_v40  ;;  %v92_v46 = vld [vmem:[%s14254_s0 + $0x51] sm:$0xff]  ;;  %v10246_v47 = vpack.c.bf16 %v80_v44, %v79_v43  ;;  %v93_v48 = vld [vmem:[%s14254_s0 + $0x59] sm:$0xff]  ;;  %v95_v53 = vld [vmem:[%s14254_s0 + $0x69] sm:$0xff]  ;;  %s10802_s24 = smov 64   ;;  %s10803_s25 = smov 80  }
  0x2b   :  { %8916 = vmatprep.mubr.msk.f32.mxu0 %vm132_vm0, %v90_v41  ;;  %10241 = vmatpush3.bf16.msra.mxu0 %v10238_v37  ;;  %v81_v50 = vld [vmem:[%s14255_s1 + $0x60] sm:$0x1]  ;;  %v7662_v51 = vld [vmem:[%s14255_s1 + $0xd0] sm:$0xff]  ;;  %v7663_v52 = vld [vmem:[%s14255_s1 + $0xd8] sm:$0xff]  ;;  %s10804_s11 = smov 96   ;;  %s10806_s10 = smov [#allocation8]  }
  0x2c   :  { %10243 = vmatprep.subr.bf16.mxu0 %v10242_v42  ;;  %v96_v54 = vld [vmem:[%s14254_s0 + $0x71] sm:$0xff]  ;;  %v10250_v55 = vpack.c.bf16 %v7663_v52, %v7662_v51  ;;  %v97_v56 = vld [vmem:[%s14254_s0 + $0x79] sm:$0xff]  ;;  %v98_v57 = vld [vmem:[%s14254_s0 + $0x81] sm:$0xff] }
  0x2d   :  { %v99_v58 = vld [vmem:[%s14254_s0 + $0x89] sm:$0xff]  ;;  %v100_v59 = vld [vmem:[%s14254_s0 + $0x91] sm:$0xff]  ;;  %v101_v60 = vld [vmem:[%s14254_s0 + $0x99] sm:$0xff] }
  0x2e   :  { %8917 = vmatmul.mubr.msk.f32.gmra.mrb[8].mxu0 %vm132_vm0, %v91_v45  ;;  %v102_v61 = vld [vmem:[%s14254_s0 + $0xa1] sm:$0xff]  ;;  %v103_v62 = vld [vmem:[%s14254_s0 + $0xa9] sm:$0xff]  ;;  %v104_v63 = vld [vmem:[%s14254_s0 + $0xb1] sm:$0xff] }
  0x2f   :  { %8919 = vmatprep.mubr.msk.f32.mxu0 %vm132_vm0, %v92_v46  ;;  %10245 = vmatpush3.bf16.msra.mxu0 %v10242_v42  ;;  %v105_v0 = vld [vmem:[%s14254_s0 + $0xb9] sm:$0xff]  ;;  %v106_v1 = vld [vmem:[%s14254_s0 + $0xc1] sm:$0xff]  ;;  %v107_v2 = vld [vmem:[%s14254_s0 + $0xc9] sm:$0xff] }
  0x30   :  { %10247 = vmatprep.subr.bf16.mxu0 %v10246_v47  ;;  %v33_v3 = vld [vmem:[%s14254_s0] sm:$0xff]  ;;  %v7665_v5 = vld [vmem:[%s14255_s1 + $0xe8] sm:$0xff]  ;;  %v35_v7 = vld [vmem:[%s14254_s0 + $0x10] sm:$0xff] }
  0x31   :  { %v7664_v4 = vld [vmem:[%s14255_s1 + $0xe0] sm:$0xff]  ;;  %v34_v6 = vld [vmem:[%s14254_s0 + $0x8] sm:$0xff]  ;;  %v7666_v9 = vld [vmem:[%s14255_s1 + $0xf0] sm:$0xff] }
  0x32   :  { %8920 = vmatmul.mubr.msk.f32.gmra.mrb[10].mxu0 %vm132_vm0, %v93_v48  ;;  %v10254_v8 = vpack.c.bf16 %v7665_v5, %v7664_v4  ;;  %v7667_v10 = vld [vmem:[%s14255_s1 + $0xf8] sm:$0xff]  ;;  %v37_v12 = vld [vmem:[%s14254_s0 + $0x20] sm:$0xff]  ;;  %v7669_v15 = vld [vmem:[%s14255_s1 + $0x108] sm:$0xff] }
  0x33   :  { %8922 = vmatprep.mubr.msk.f32.mxu0 %vm132_vm0, %v94_v49  ;;  %10249 = vmatpush3.bf16.msra.mxu0 %v10246_v47  ;;  %v36_v11 = vld [vmem:[%s14254_s0 + $0x18] sm:$0xff]  ;;  %v10258_v13 = vpack.c.bf16 %v7667_v10, %v7666_v9  ;;  %v7668_v14 = vld [vmem:[%s14255_s1 + $0x100] sm:$0xff]  ;;  %v38_v16 = vld [vmem:[%s14254_s0 + $0x28] sm:$0xff] }
  0x34   :  { %8982 = vmatprep.subr.msk.mxu0 %vm241_vm1, %v81_v50  ;;  %v39_v17 = vld [vmem:[%s14254_s0 + $0x30] sm:$0xff]  ;;  %v10262_v18 = vpack.c.bf16 %v7669_v15, %v7668_v14  ;;  %v7671_v20 = vld [vmem:[%s14255_s1 + $0x118] sm:$0xff]  ;;  %v41_v22 = vld [vmem:[%s14254_s0 + $0x40] sm:$0xff] }
  0x35   :  { %v7670_v19 = vld [vmem:[%s14255_s1 + $0x110] sm:$0xff]  ;;  %v40_v21 = vld [vmem:[%s14254_s0 + $0x38] sm:$0xff]  ;;  %v7672_v24 = vld [vmem:[%s14255_s1 + $0x120] sm:$0xff] }
  0x36   :  { %8923 = vmatmul.mubr.msk.f32.gmra.mrb[12].mxu0 %vm132_vm0, %v95_v53  ;;  %v10266_v23 = vpack.c.bf16 %v7671_v20, %v7670_v19  ;;  %v7673_v25 = vld [vmem:[%s14255_s1 + $0x128] sm:$0xff]  ;;  %v43_v27 = vld [vmem:[%s14254_s0 + $0x50] sm:$0xff]  ;;  %v44_v29 = vld [vmem:[%s14254_s0 + $0x58] sm:$0xff] }
  0x37   :  { %8925 = vmatprep.mubr.msk.f32.mxu0 %vm132_vm0, %v96_v54  ;;  %8983 = vmatpush3.msk.msra.mxu0 %vm241_vm1, %v81_v50  ;;  %v42_v26 = vld [vmem:[%s14254_s0 + $0x48] sm:$0xff]  ;;  %v10270_v28 = vpack.c.bf16 %v7673_v25, %v7672_v24  ;;  %v45_v30 = vld [vmem:[%s14254_s0 + $0x60] sm:$0xff]  ;;  %v7674_v31 = vld [vmem:[%s14255_s1 + $0x130] sm:$0x1] }
  0x38   :  { %10251 = vmatprep.subr.bf16.mxu0 %v10250_v55  ;;  %v7712_v32 = vld [vmem:[%s14255_s1 + $0x138] sm:$0xff]  ;;  %v7713_v33 = vld [vmem:[%s14255_s1 + $0x140] sm:$0xff]  ;;  %v46_v34 = vld [vmem:[%s14254_s0 + $0x68] sm:$0xff] }
  0x39   :  { %v47_v35 = vld [vmem:[%s14254_s0 + $0x70] sm:$0xff]  ;;  %v10274_v36 = vpack.c.bf16 %v7713_v33, %v7712_v32  ;;  %v48_v37 = vld [vmem:[%s14254_s0 + $0x78] sm:$0xff]  ;;  %v49_v38 = vld [vmem:[%s14254_s0 + $0x80] sm:$0xff] }
  0x3a   :  { %8926 = vmatmul.mubr.msk.f32.gmra.mrb[14].mxu0 %vm132_vm0, %v97_v56  ;;  %v50_v39 = vld [vmem:[%s14254_s0 + $0x88] sm:$0xff]  ;;  %v51_v40 = vld [vmem:[%s14254_s0 + $0x90] sm:$0xff]  ;;  %v52_v41 = vld [vmem:[%s14254_s0 + $0x98] sm:$0xff] }
  0x3b   :  { %8928 = vmatprep.mubr.msk.f32.mxu0 %vm132_vm0, %v98_v57  ;;  %v53_v42 = vld [vmem:[%s14254_s0 + $0xa0] sm:$0xff]  ;;  %v54_v43 = vld [vmem:[%s14254_s0 + $0xa8] sm:$0xff]  ;;  %v55_v44 = vld [vmem:[%s14254_s0 + $0xb0] sm:$0xff] }
  0x3c   :  { %v56_v45 = vld [vmem:[%s14254_s0 + $0xb8] sm:$0xff]  ;;  %v57_v46 = vld [vmem:[%s14254_s0 + $0xc0] sm:$0xff]  ;;  %v58_v47 = vld [vmem:[%s14254_s0 + $0xc8] sm:$0xff] }
  0x3d   :  { %v59_v48 = vld [vmem:[%s14254_s0 + $0xd0] sm:$0xff]  ;;  %v60_v49 = vld [vmem:[%s14254_s0 + $0xd8] sm:$0xff]  ;;  %v61_v50 = vld [vmem:[%s14254_s0 + $0xe0] sm:$0xff] }
  0x3e   :  { %8929 = vmatmul.mubr.msk.f32.gmra.mrb[16].mxu0 %vm132_vm0, %v99_v58  ;;  %v62_v51 = vld [vmem:[%s14254_s0 + $0xe8] sm:$0xff]  ;;  %v63_v52 = vld [vmem:[%s14254_s0 + $0xf0] sm:$0xff]  ;;  %v64_v53 = vld [vmem:[%s14254_s0 + $0xf8] sm:$0xff] }
  0x3f   :  { %8931 = vmatprep.mubr.msk.f32.mxu0 %vm132_vm0, %v100_v59  ;;  %v65_v54 = vld [vmem:[%s14254_s0 + $0x100] sm:$0xff]  ;;  %v67_v56 = vld [vmem:[%s14254_s0 + $0x110] sm:$0xff]  ;;  %v68_v57 = vld [vmem:[%s14254_s0 + $0x118] sm:$0xff] }
  0x40   :  { %v846_v58 = vld [vmem:[%s14254_s0 + $0x2] sm:$0xff]  ;;  %v7720_v10 = vld [vmem:[%s14255_s1 + $0x178] sm:$0xff]  ;;  %v859_v25 = vld [vmem:[%s14254_s0 + $0x6a] sm:$0xff] }
  0x41   :  { %v7714_v59 = vld [vmem:[%s14255_s1 + $0x148] sm:$0xff]  ;;  %v857_v20 = vld [vmem:[%s14254_s0 + $0x5a] sm:$0xff] }
  0x42   :  { %8932 = vmatmul.mubr.msk.f32.gmra.mrb[18].mxu0 %vm132_vm0, %v101_v60  ;;  %v7715_v60 = vld [vmem:[%s14255_s1 + $0x150] sm:$0xff]  ;;  %v7718_v5 = vld [vmem:[%s14255_s1 + $0x168] sm:$0xff]  ;;  %v865_v32 = vld [vmem:[%s14254_s0 + $0x9a] sm:$0xff] }
  0x43   :  { %8934 = vmatprep.mubr.msk.f32.mxu0 %vm132_vm0, %v102_v61  ;;  %v847_v61 = vld [vmem:[%s14254_s0 + $0xa] sm:$0xff]  ;;  %v866_v33 = vld [vmem:[%s14254_s0 + $0xa2] sm:$0xff] }
  0x44   :  { %v7722_v15 = vld [vmem:[%s14255_s1 + $0x188] sm:$0xff] }
  0x45   :  { %v7763_v24 = vld [vmem:[%s14255_s1 + $0x1a8] sm:$0xff] }
  0x46   :  { %8935 = vmatmul.mubr.msk.f32.gmra.mrb[20].mxu0 %vm132_vm0, %v103_v62  ;;  %v848_v62 = vld [vmem:[%s14254_s0 + $0x12] sm:$0xff] }
  0x47   :  { %8937 = vmatprep.mubr.msk.f32.mxu0 %vm132_vm0, %v104_v63  ;;  %v10278_v63 = vpack.c.bf16 %v7715_v60, %v7714_v59  ;;  %v7768_v60 = vld [vmem:[%s14255_s1 + $0x1d0] sm:$0xff] }
  0x4a   :  { %8938 = vmatmul.mubr.msk.f32.gmra.mrb[22].mxu0 %vm132_vm0, %v105_v0  ;;  %v7716_v0 = vld [vmem:[%s14255_s1 + $0x158] sm:$0xff] }
  0x4b   :  { %8940 = vmatprep.mubr.msk.f32.mxu0 %vm132_vm0, %v106_v1  ;;  %v7717_v1 = vld [vmem:[%s14255_s1 + $0x160] sm:$0xff] }
  0x4c   :  { %v10282_v4 = vpack.c.bf16 %v7717_v1, %v7716_v0  ;;  %v7770_v1 = vld [vmem:[%s14255_s1 + $0x1e0] sm:$0xff] }
  0x4e   :  { %8941 = vmatmul.mubr.msk.f32.gmra.mrb[24].mxu0 %vm132_vm0, %v107_v2  ;;  %v849_v2 = vld [vmem:[%s14254_s0 + $0x1a] sm:$0xff] }
  0x4f   :  { %8984 = vmatprep.mubr.msk.f32.mxu0 %vm132_vm0, %v33_v3  ;;  %v850_v3 = vld [vmem:[%s14254_s0 + $0x22] sm:$0xff] }
  0x52   :  { %8985 = vmatmul.mubr.msk.f32.vlgmr.msra.gmra.mrb[0].mxu0 %vm132_vm0, %v34_v6  ;;  %v7719_v6 = vld [vmem:[%s14255_s1 + $0x170] sm:$0xff] }
  0x53   :  { %10253 = vmatpush3.bf16.msra.mxu0 %v10250_v55  ;;  %8987 = vmatprep.mubr.msk.f32.mxu0 %vm132_vm0, %v35_v7  ;;  %v66_v55 = vld [vmem:[%s14254_s0 + $0x108] sm:$0xff]  ;;  %v10286_v9 = vpack.c.bf16 %v7719_v6, %v7718_v5  ;;  %v7772_v6 = vld [vmem:[%s14255_s1 + $0x1f0] sm:$0xff] }
  0x54   :  { %10255 = vmatprep.subr.bf16.mxu0 %v10254_v8  ;;  %v851_v7 = vld [vmem:[%s14254_s0 + $0x2a] sm:$0xff] }
  0x56   :  { %8988 = vmatmul.mubr.msk.f32.gmra.mrb[2].mxu0 %vm132_vm0, %v36_v11  ;;  %v7721_v11 = vld [vmem:[%s14255_s1 + $0x180] sm:$0xff] }
  0x57   :  { %8990 = vmatprep.mubr.msk.f32.mxu0 %vm132_vm0, %v37_v12  ;;  %10257 = vmatpush3.bf16.msra.mxu0 %v10254_v8  ;;  %v852_v8 = vld [vmem:[%s14254_s0 + $0x32] sm:$0xff]  ;;  %v853_v12 = vld [vmem:[%s14254_s0 + $0x3a] sm:$0xff]  ;;  %v10290_v14 = vpack.c.bf16 %v7721_v11, %v7720_v10  ;;  %v1299_v11 = vld [vmem:[%s14254_s0 + $0x64] sm:$0xff] }
  0x58   :  { %10259 = vmatprep.subr.bf16.mxu0 %v10258_v13 }
  0x5a   :  { %8991 = vmatmul.mubr.msk.f32.gmra.mrb[4].mxu0 %vm132_vm0, %v38_v16  ;;  %v7723_v16 = vld [vmem:[%s14255_s1 + $0x190] sm:$0xff] }
  0x5b   :  { %8993 = vmatprep.mubr.msk.f32.mxu0 %vm132_vm0, %v39_v17  ;;  %10261 = vmatpush3.bf16.msra.mxu0 %v10258_v13  ;;  %v854_v13 = vld [vmem:[%s14254_s0 + $0x42] sm:$0xff]  ;;  %v855_v17 = vld [vmem:[%s14254_s0 + $0x4a] sm:$0xff]  ;;  %v10294_v19 = vpack.c.bf16 %v7723_v16, %v7722_v15  ;;  %v1301_v16 = vld [vmem:[%s14254_s0 + $0x74] sm:$0xff] }
  0x5c   :  { %10263 = vmatprep.subr.bf16.mxu0 %v10262_v18  ;;  %v7813_v15 = vld [vmem:[%s14255_s1 + $0x210] sm:$0xff] }
  0x5e   :  { %8994 = vmatmul.mubr.msk.f32.gmra.mrb[6].mxu0 %vm132_vm0, %v40_v21  ;;  %v858_v21 = vld [vmem:[%s14254_s0 + $0x62] sm:$0xff] }
  0x5f   :  { %8996 = vmatprep.mubr.msk.f32.mxu0 %vm132_vm0, %v41_v22  ;;  %10265 = vmatpush3.bf16.msra.mxu0 %v10262_v18  ;;  %v856_v18 = vld [vmem:[%s14254_s0 + $0x52] sm:$0xff] }
  0x60   :  { %10267 = vmatprep.subr.bf16.mxu0 %v10266_v23  ;;  %v7724_v22 = vld [vmem:[%s14255_s1 + $0x198] sm:$0x1] }
  0x62   :  { %8997 = vmatmul.mubr.msk.f32.gmra.mrb[8].mxu0 %vm132_vm0, %v42_v26  ;;  %v860_v26 = vld [vmem:[%s14254_s0 + $0x72] sm:$0xff] }
  0x63   :  { %8999 = vmatprep.mubr.msk.f32.mxu0 %vm132_vm0, %v43_v27  ;;  %10269 = vmatpush3.bf16.msra.mxu0 %v10266_v23  ;;  %v7762_v23 = vld [vmem:[%s14255_s1 + $0x1a0] sm:$0xff] }
  0x64   :  { %10271 = vmatprep.subr.bf16.mxu0 %v10270_v28  ;;  %v10298_v27 = vpack.c.bf16 %v7763_v24, %v7762_v23  ;;  %v1307_v23 = vld [vmem:[%s14254_s0 + $0xa4] sm:$0xff]  ;;  %v1308_v24 = vld [vmem:[%s14254_s0 + $0xac] sm:$0xff] }
  0x66   :  { %9000 = vmatmul.mubr.msk.f32.gmra.mrb[10].mxu0 %vm132_vm0, %v44_v29  ;;  %v862_v29 = vld [vmem:[%s14254_s0 + $0x82] sm:$0xff] }
  0x67   :  { %9002 = vmatprep.mubr.msk.f32.mxu0 %vm132_vm0, %v45_v30  ;;  %10273 = vmatpush3.bf16.msra.mxu0 %v10270_v28  ;;  %v861_v28 = vld [vmem:[%s14254_s0 + $0x7a] sm:$0xff]  ;;  %v863_v30 = vld [vmem:[%s14254_s0 + $0x8a] sm:$0xff] }
  0x68   :  { %9062 = vmatprep.subr.msk.mxu0 %vm241_vm1, %v7674_v31 }
  0x6a   :  { %9003 = vmatmul.mubr.msk.f32.gmra.mrb[12].mxu0 %vm132_vm0, %v46_v34  ;;  %v867_v34 = vld [vmem:[%s14254_s0 + $0xaa] sm:$0xff] }
  0x6b   :  { %9005 = vmatprep.mubr.msk.f32.mxu0 %vm132_vm0, %v47_v35  ;;  %9063 = vmatpush3.msk.msra.mxu0 %vm241_vm1, %v7674_v31  ;;  %v864_v31 = vld [vmem:[%s14254_s0 + $0x92] sm:$0xff] }
  0x6c   :  { %10275 = vmatprep.subr.bf16.mxu0 %v10274_v36  ;;  %v868_v35 = vld [vmem:[%s14254_s0 + $0xb2] sm:$0xff] }
  0x6e   :  { %9006 = vmatmul.mubr.msk.f32.gmra.mrb[14].mxu0 %vm132_vm0, %v48_v37  ;;  %v870_v37 = vld [vmem:[%s14254_s0 + $0xc2] sm:$0xff] }
  0x6f   :  { %9008 = vmatprep.mubr.msk.f32.mxu0 %vm132_vm0, %v49_v38  ;;  %v871_v38 = vld [vmem:[%s14254_s0 + $0xca] sm:$0xff] }
  0x72   :  { %9009 = vmatmul.mubr.msk.f32.gmra.mrb[16].mxu0 %vm132_vm0, %v50_v39  ;;  %v872_v39 = vld [vmem:[%s14254_s0 + $0xd2] sm:$0xff] }
  0x73   :  { %9011 = vmatprep.mubr.msk.f32.mxu0 %vm132_vm0, %v51_v40  ;;  %v873_v40 = vld [vmem:[%s14254_s0 + $0xda] sm:$0xff] }
  0x76   :  { %9012 = vmatmul.mubr.msk.f32.gmra.mrb[18].mxu0 %vm132_vm0, %v52_v41  ;;  %v874_v41 = vld [vmem:[%s14254_s0 + $0xe2] sm:$0xff] }
  0x77   :  { %9014 = vmatprep.mubr.msk.f32.mxu0 %vm132_vm0, %v53_v42  ;;  %v875_v42 = vld [vmem:[%s14254_s0 + $0xea] sm:$0xff] }
  0x7a   :  { %9015 = vmatmul.mubr.msk.f32.gmra.mrb[20].mxu0 %vm132_vm0, %v54_v43  ;;  %v876_v43 = vld [vmem:[%s14254_s0 + $0xf2] sm:$0xff] }
  0x7b   :  { %9017 = vmatprep.mubr.msk.f32.mxu0 %vm132_vm0, %v55_v44  ;;  %v877_v44 = vld [vmem:[%s14254_s0 + $0xfa] sm:$0xff] }
  0x7e   :  { %9018 = vmatmul.mubr.msk.f32.gmra.mrb[22].mxu0 %vm132_vm0, %v56_v45  ;;  %v878_v45 = vld [vmem:[%s14254_s0 + $0x102] sm:$0xff] }
  0x7f   :  { %9020 = vmatprep.mubr.msk.f32.mxu0 %vm132_vm0, %v57_v46  ;;  %v879_v46 = vld [vmem:[%s14254_s0 + $0x10a] sm:$0xff] }
  0x82   :  { %9021 = vmatmul.mubr.msk.f32.gmra.mrb[24].mxu0 %vm132_vm0, %v58_v47  ;;  %v880_v47 = vld [vmem:[%s14254_s0 + $0x112] sm:$0xff] }
  0x83   :  { %9023 = vmatprep.mubr.msk.f32.mxu0 %vm132_vm0, %v59_v48  ;;  %v881_v48 = vld [vmem:[%s14254_s0 + $0x11a] sm:$0xff] }
  0x86   :  { %9024 = vmatmul.mubr.msk.f32.gmra.mrb[26].mxu0 %vm132_vm0, %v60_v49  ;;  %v1288_v49 = vld [vmem:[%s14254_s0 + $0xc] sm:$0xff] }
  0x87   :  { %9026 = vmatprep.mubr.msk.f32.mxu0 %vm132_vm0, %v61_v50  ;;  %v7764_v50 = vld [vmem:[%s14255_s1 + $0x1b0] sm:$0xff] }
  0x8a   :  { %9027 = vmatmul.mubr.msk.f32.gmra.mrb[28].mxu0 %vm132_vm0, %v62_v51  ;;  %v7765_v51 = vld [vmem:[%s14255_s1 + $0x1b8] sm:$0xff] }
  0x8b   :  { %9029 = vmatprep.mubr.msk.f32.mxu0 %vm132_vm0, %v63_v52  ;;  %v1289_v52 = vld [vmem:[%s14254_s0 + $0x14] sm:$0xff] }
  0x8e   :  { %9030 = vmatmul.mubr.msk.f32.gmra.mrb[30].mxu0 %vm132_vm0, %v64_v53  ;;  %v1290_v53 = vld [vmem:[%s14254_s0 + $0x1c] sm:$0xff] }
  0x8f   :  { %9032 = vmatprep.mubr.msk.f32.mxu0 %vm132_vm0, %v65_v54  ;;  %v10302_v54 = vpack.c.bf16 %v7765_v51, %v7764_v50  ;;  %v7818_v51 = vld [vmem:[%s14255_s1 + $0x238] sm:$0xff] }
  0x92   :  { %9033 = vmatmul.mubr.msk.f32.gmra.mrb[32].mxu0 %vm132_vm0, %v66_v55  ;;  %v7766_v55 = vld [vmem:[%s14255_s1 + $0x1c0] sm:$0xff] }
  0x93   :  { %9035 = vmatprep.mubr.msk.f32.mxu0 %vm132_vm0, %v67_v56  ;;  %v7767_v56 = vld [vmem:[%s14255_s1 + $0x1c8] sm:$0xff] }
  0x94   :  { %v10306_v59 = vpack.c.bf16 %v7767_v56, %v7766_v55  ;;  %v7820_v56 = vld [vmem:[%s14255_s1 + $0x248] sm:$0xff] }
  0x96   :  { %9036 = vmatmul.mubr.msk.f32.gmra.mrb[34].mxu0 %vm132_vm0, %v68_v57  ;;  %v1291_v57 = vld [vmem:[%s14254_s0 + $0x24] sm:$0xff] }
  0x97   :  { %9064 = vmatprep.mubr.msk.f32.mxu0 %vm132_vm0, %v846_v58  ;;  %v1292_v58 = vld [vmem:[%s14254_s0 + $0x2c] sm:$0xff] }
  0x9a   :  { %9065 = vmatmul.mubr.msk.f32.vlgmr.msra.gmra.mrb[0].mxu0 %vm132_vm0, %v847_v61  ;;  %v7769_v61 = vld [vmem:[%s14255_s1 + $0x1d8] sm:$0xff] }
  0x9b   :  { %10277 = vmatpush3.bf16.msra.mxu0 %v10274_v36  ;;  %9067 = vmatprep.mubr.msk.f32.mxu0 %vm132_vm0, %v848_v62  ;;  %v869_v36 = vld [vmem:[%s14254_s0 + $0xba] sm:$0xff]  ;;  %v10310_v0 = vpack.c.bf16 %v7769_v61, %v7768_v60 }
  0x9c   :  { %10279 = vmatprep.subr.bf16.mxu0 %v10278_v63  ;;  %v1293_v62 = vld [vmem:[%s14254_s0 + $0x34] sm:$0xff] }
  0x9d   :  { %v7822_v61 = vld [vmem:[%s14255_s1 + $0x258] sm:$0xff] }
  0x9e   :  { %9068 = vmatmul.mubr.msk.f32.gmra.mrb[2].mxu0 %vm132_vm0, %v849_v2  ;;  %v7771_v2 = vld [vmem:[%s14255_s1 + $0x1e8] sm:$0xff] }
  0x9f   :  { %9070 = vmatprep.mubr.msk.f32.mxu0 %vm132_vm0, %v850_v3  ;;  %10281 = vmatpush3.bf16.msra.mxu0 %v10278_v63  ;;  %v1294_v63 = vld [vmem:[%s14254_s0 + $0x3c] sm:$0xff]  ;;  %v1295_v3 = vld [vmem:[%s14254_s0 + $0x44] sm:$0xff]  ;;  %v10314_v5 = vpack.c.bf16 %v7771_v2, %v7770_v1 }
  0xa0   :  { %10283 = vmatprep.subr.bf16.mxu0 %v10282_v4  ;;  %v1741_v2 = vld [vmem:[%s14254_s0 + $0x65] sm:$0xff] }
  0xa2   :  { %9071 = vmatmul.mubr.msk.f32.gmra.mrb[4].mxu0 %vm132_vm0, %v851_v7  ;;  %v7773_v7 = vld [vmem:[%s14255_s1 + $0x1f8] sm:$0xff] }
  0xa3   :  { %9073 = vmatprep.mubr.msk.f32.mxu0 %vm132_vm0, %v852_v8  ;;  %10285 = vmatpush3.bf16.msra.mxu0 %v10282_v4  ;;  %v1296_v4 = vld [vmem:[%s14254_s0 + $0x4c] sm:$0xff]  ;;  %v1297_v8 = vld [vmem:[%s14254_s0 + $0x54] sm:$0xff]  ;;  %v10318_v10 = vpack.c.bf16 %v7773_v7, %v7772_v6 }
  0xa4   :  { %10287 = vmatprep.subr.bf16.mxu0 %v10286_v9  ;;  %v7863_v6 = vld [vmem:[%s14255_s1 + $0x278] sm:$0xff] }
  0xa5   :  { %v1743_v7 = vld [vmem:[%s14254_s0 + $0x75] sm:$0xff] }
  0xa6   :  { %9074 = vmatmul.mubr.msk.f32.gmra.mrb[6].mxu0 %vm132_vm0, %v853_v12  ;;  %v1300_v12 = vld [vmem:[%s14254_s0 + $0x6c] sm:$0xff] }
  0xa7   :  { %9076 = vmatprep.mubr.msk.f32.mxu0 %vm132_vm0, %v854_v13  ;;  %10289 = vmatpush3.bf16.msra.mxu0 %v10286_v9  ;;  %v1298_v9 = vld [vmem:[%s14254_s0 + $0x5c] sm:$0xff] }
  0xa8   :  { %10291 = vmatprep.subr.bf16.mxu0 %v10290_v14  ;;  %v7774_v13 = vld [vmem:[%s14255_s1 + $0x200] sm:$0x1] }
  0xaa   :  { %9077 = vmatmul.mubr.msk.f32.gmra.mrb[8].mxu0 %vm132_vm0, %v855_v17  ;;  %v1302_v17 = vld [vmem:[%s14254_s0 + $0x7c] sm:$0xff] }
  0xab   :  { %9079 = vmatprep.mubr.msk.f32.mxu0 %vm132_vm0, %v856_v18  ;;  %10293 = vmatpush3.bf16.msra.mxu0 %v10290_v14  ;;  %v7812_v14 = vld [vmem:[%s14255_s1 + $0x208] sm:$0xff] }
  0xac   :  { %10295 = vmatprep.subr.bf16.mxu0 %v10294_v19  ;;  %v10322_v18 = vpack.c.bf16 %v7813_v15, %v7812_v14  ;;  %v1749_v14 = vld [vmem:[%s14254_s0 + $0xa5] sm:$0xff]  ;;  %v1750_v15 = vld [vmem:[%s14254_s0 + $0xad] sm:$0xff] }
  0xae   :  { %9080 = vmatmul.mubr.msk.f32.gmra.mrb[10].mxu0 %vm132_vm0, %v857_v20  ;;  %v1304_v20 = vld [vmem:[%s14254_s0 + $0x8c] sm:$0xff] }
  0xaf   :  { %9082 = vmatprep.mubr.msk.f32.mxu0 %vm132_vm0, %v858_v21  ;;  %10297 = vmatpush3.bf16.msra.mxu0 %v10294_v19  ;;  %v1303_v19 = vld [vmem:[%s14254_s0 + $0x84] sm:$0xff]  ;;  %v1305_v21 = vld [vmem:[%s14254_s0 + $0x94] sm:$0xff] }
  0xb0   :  { %9142 = vmatprep.subr.msk.mxu0 %vm241_vm1, %v7724_v22 }
  0xb2   :  { %9083 = vmatmul.mubr.msk.f32.gmra.mrb[12].mxu0 %vm132_vm0, %v859_v25  ;;  %v1309_v25 = vld [vmem:[%s14254_s0 + $0xb4] sm:$0xff] }
  0xb3   :  { %9085 = vmatprep.mubr.msk.f32.mxu0 %vm132_vm0, %v860_v26  ;;  %9143 = vmatpush3.msk.msra.mxu0 %vm241_vm1, %v7724_v22  ;;  %v1306_v22 = vld [vmem:[%s14254_s0 + $0x9c] sm:$0xff] }
  0xb4   :  { %10299 = vmatprep.subr.bf16.mxu0 %v10298_v27  ;;  %v1310_v26 = vld [vmem:[%s14254_s0 + $0xbc] sm:$0xff] }
  0xb6   :  { %9086 = vmatmul.mubr.msk.f32.gmra.mrb[14].mxu0 %vm132_vm0, %v861_v28  ;;  %v1312_v28 = vld [vmem:[%s14254_s0 + $0xcc] sm:$0xff] }
  0xb7   :  { %9088 = vmatprep.mubr.msk.f32.mxu0 %vm132_vm0, %v862_v29  ;;  %v1313_v29 = vld [vmem:[%s14254_s0 + $0xd4] sm:$0xff] }
  0xba   :  { %9089 = vmatmul.mubr.msk.f32.gmra.mrb[16].mxu0 %vm132_vm0, %v863_v30  ;;  %v1314_v30 = vld [vmem:[%s14254_s0 + $0xdc] sm:$0xff] }
  0xbb   :  { %9091 = vmatprep.mubr.msk.f32.mxu0 %vm132_vm0, %v864_v31  ;;  %v1315_v31 = vld [vmem:[%s14254_s0 + $0xe4] sm:$0xff] }
  0xbe   :  { %9092 = vmatmul.mubr.msk.f32.gmra.mrb[18].mxu0 %vm132_vm0, %v865_v32  ;;  %v1316_v32 = vld [vmem:[%s14254_s0 + $0xec] sm:$0xff] }
  0xbf   :  { %9094 = vmatprep.mubr.msk.f32.mxu0 %vm132_vm0, %v866_v33  ;;  %v1317_v33 = vld [vmem:[%s14254_s0 + $0xf4] sm:$0xff] }
  0xc2   :  { %9095 = vmatmul.mubr.msk.f32.gmra.mrb[20].mxu0 %vm132_vm0, %v867_v34  ;;  %v1318_v34 = vld [vmem:[%s14254_s0 + $0xfc] sm:$0xff] }
  0xc3   :  { %9097 = vmatprep.mubr.msk.f32.mxu0 %vm132_vm0, %v868_v35  ;;  %v1319_v35 = vld [vmem:[%s14254_s0 + $0x104] sm:$0xff] }
  0xc6   :  { %9098 = vmatmul.mubr.msk.f32.gmra.mrb[22].mxu0 %vm132_vm0, %v869_v36  ;;  %v1320_v36 = vld [vmem:[%s14254_s0 + $0x10c] sm:$0xff] }
  0xc7   :  { %9100 = vmatprep.mubr.msk.f32.mxu0 %vm132_vm0, %v870_v37  ;;  %v1321_v37 = vld [vmem:[%s14254_s0 + $0x114] sm:$0xff] }
  0xca   :  { %9101 = vmatmul.mubr.msk.f32.gmra.mrb[24].mxu0 %vm132_vm0, %v871_v38  ;;  %v1322_v38 = vld [vmem:[%s14254_s0 + $0x11c] sm:$0xff] }
  0xcb   :  { %9103 = vmatprep.mubr.msk.f32.mxu0 %vm132_vm0, %v872_v39  ;;  %v1323_v39 = vld [vmem:[%s14254_s0 + $0x124] sm:$0xff] }
  0xce   :  { %9104 = vmatmul.mubr.msk.f32.gmra.mrb[26].mxu0 %vm132_vm0, %v873_v40  ;;  %v1730_v40 = vld [vmem:[%s14254_s0 + $0xd] sm:$0xff] }
  0xcf   :  { %9106 = vmatprep.mubr.msk.f32.mxu0 %vm132_vm0, %v874_v41  ;;  %v7814_v41 = vld [vmem:[%s14255_s1 + $0x218] sm:$0xff] }
  0xd2   :  { %9107 = vmatmul.mubr.msk.f32.gmra.mrb[28].mxu0 %vm132_vm0, %v875_v42  ;;  %v7815_v42 = vld [vmem:[%s14255_s1 + $0x220] sm:$0xff] }
  0xd3   :  { %9109 = vmatprep.mubr.msk.f32.mxu0 %vm132_vm0, %v876_v43  ;;  %v1731_v43 = vld [vmem:[%s14254_s0 + $0x15] sm:$0xff] }
  0xd6   :  { %9110 = vmatmul.mubr.msk.f32.gmra.mrb[30].mxu0 %vm132_vm0, %v877_v44  ;;  %v1732_v44 = vld [vmem:[%s14254_s0 + $0x1d] sm:$0xff] }
  0xd7   :  { %9112 = vmatprep.mubr.msk.f32.mxu0 %vm132_vm0, %v878_v45  ;;  %v10326_v45 = vpack.c.bf16 %v7815_v42, %v7814_v41  ;;  %v7868_v42 = vld [vmem:[%s14255_s1 + $0x2a0] sm:$0xff] }
  0xda   :  { %9113 = vmatmul.mubr.msk.f32.gmra.mrb[32].mxu0 %vm132_vm0, %v879_v46  ;;  %v7816_v46 = vld [vmem:[%s14255_s1 + $0x228] sm:$0xff] }
  0xdb   :  { %9115 = vmatprep.mubr.msk.f32.mxu0 %vm132_vm0, %v880_v47  ;;  %v7817_v47 = vld [vmem:[%s14255_s1 + $0x230] sm:$0xff] }
  0xdc   :  { %v10330_v50 = vpack.c.bf16 %v7817_v47, %v7816_v46  ;;  %v7870_v47 = vld [vmem:[%s14255_s1 + $0x2b0] sm:$0xff] }
  0xde   :  { %9116 = vmatmul.mubr.msk.f32.gmra.mrb[34].mxu0 %vm132_vm0, %v881_v48  ;;  %v1733_v48 = vld [vmem:[%s14254_s0 + $0x25] sm:$0xff] }
  0xdf   :  { %9144 = vmatprep.mubr.msk.f32.mxu0 %vm132_vm0, %v1288_v49  ;;  %v1734_v49 = vld [vmem:[%s14254_s0 + $0x2d] sm:$0xff] }
  0xe2   :  { %9145 = vmatmul.mubr.msk.f32.vlgmr.msra.gmra.mrb[0].mxu0 %vm132_vm0, %v1289_v52  ;;  %v7819_v52 = vld [vmem:[%s14255_s1 + $0x240] sm:$0xff] }
  0xe3   :  { %10301 = vmatpush3.bf16.msra.mxu0 %v10298_v27  ;;  %9147 = vmatprep.mubr.msk.f32.mxu0 %vm132_vm0, %v1290_v53  ;;  %v1311_v27 = vld [vmem:[%s14254_s0 + $0xc4] sm:$0xff]  ;;  %v1735_v53 = vld [vmem:[%s14254_s0 + $0x35] sm:$0xff]  ;;  %v10334_v55 = vpack.c.bf16 %v7819_v52, %v7818_v51 }
  0xe4   :  { %10303 = vmatprep.subr.bf16.mxu0 %v10302_v54  ;;  %v7872_v52 = vld [vmem:[%s14255_s1 + $0x2c0] sm:$0xff] }
  0xe6   :  { %9148 = vmatmul.mubr.msk.f32.gmra.mrb[2].mxu0 %vm132_vm0, %v1291_v57  ;;  %v7821_v57 = vld [vmem:[%s14255_s1 + $0x250] sm:$0xff] }
  0xe7   :  { %9150 = vmatprep.mubr.msk.f32.mxu0 %vm132_vm0, %v1292_v58  ;;  %10305 = vmatpush3.bf16.msra.mxu0 %v10302_v54  ;;  %v1736_v54 = vld [vmem:[%s14254_s0 + $0x3d] sm:$0xff]  ;;  %v1737_v58 = vld [vmem:[%s14254_s0 + $0x45] sm:$0xff]  ;;  %v10338_v60 = vpack.c.bf16 %v7821_v57, %v7820_v56 }
  0xe8   :  { %10307 = vmatprep.subr.bf16.mxu0 %v10306_v59  ;;  %v2183_v57 = vld [vmem:[%s14254_s0 + $0x66] sm:$0xff] }
  0xea   :  { %9151 = vmatmul.mubr.msk.f32.gmra.mrb[4].mxu0 %vm132_vm0, %v1293_v62  ;;  %v7823_v62 = vld [vmem:[%s14255_s1 + $0x260] sm:$0xff] }
  0xeb   :  { %9153 = vmatprep.mubr.msk.f32.mxu0 %vm132_vm0, %v1294_v63  ;;  %10309 = vmatpush3.bf16.msra.mxu0 %v10306_v59  ;;  %v1738_v59 = vld [vmem:[%s14254_s0 + $0x4d] sm:$0xff]  ;;  %v1739_v63 = vld [vmem:[%s14254_s0 + $0x55] sm:$0xff]  ;;  %v10342_v1 = vpack.c.bf16 %v7823_v62, %v7822_v61  ;;  %v7913_v61 = vld [vmem:[%s14255_s1 + $0x2e0] sm:$0xff] }
  0xec   :  { %10311 = vmatprep.subr.bf16.mxu0 %v10310_v0  ;;  %v2185_v62 = vld [vmem:[%s14254_s0 + $0x76] sm:$0xff] }
  0xee   :  { %9154 = vmatmul.mubr.msk.f32.gmra.mrb[6].mxu0 %vm132_vm0, %v1295_v3  ;;  %v1742_v3 = vld [vmem:[%s14254_s0 + $0x6d] sm:$0xff] }
  0xef   :  { %9156 = vmatprep.mubr.msk.f32.mxu0 %vm132_vm0, %v1296_v4  ;;  %10313 = vmatpush3.bf16.msra.mxu0 %v10310_v0  ;;  %v1740_v0 = vld [vmem:[%s14254_s0 + $0x5d] sm:$0xff]  ;;  %v7824_v4 = vld [vmem:[%s14255_s1 + $0x268] sm:$0x1] }
  0xf0   :  { %10315 = vmatprep.subr.bf16.mxu0 %v10314_v5 }
  0xf2   :  { %9157 = vmatmul.mubr.msk.f32.gmra.mrb[8].mxu0 %vm132_vm0, %v1297_v8  ;;  %v1744_v8 = vld [vmem:[%s14254_s0 + $0x7d] sm:$0xff] }
  0xf3   :  { %9159 = vmatprep.mubr.msk.f32.mxu0 %vm132_vm0, %v1298_v9  ;;  %10317 = vmatpush3.bf16.msra.mxu0 %v10314_v5  ;;  %v7862_v5 = vld [vmem:[%s14255_s1 + $0x270] sm:$0xff] }
  0xf4   :  { %10319 = vmatprep.subr.bf16.mxu0 %v10318_v10  ;;  %v10346_v9 = vpack.c.bf16 %v7863_v6, %v7862_v5  ;;  %v2191_v5 = vld [vmem:[%s14254_s0 + $0xa6] sm:$0xff]  ;;  %v2192_v6 = vld [vmem:[%s14254_s0 + $0xae] sm:$0xff] }
  0xf6   :  { %9160 = vmatmul.mubr.msk.f32.gmra.mrb[10].mxu0 %vm132_vm0, %v1299_v11  ;;  %v1746_v11 = vld [vmem:[%s14254_s0 + $0x8d] sm:$0xff] }
  0xf7   :  { %9162 = vmatprep.mubr.msk.f32.mxu0 %vm132_vm0, %v1300_v12  ;;  %10321 = vmatpush3.bf16.msra.mxu0 %v10318_v10  ;;  %v1745_v10 = vld [vmem:[%s14254_s0 + $0x85] sm:$0xff]  ;;  %v1747_v12 = vld [vmem:[%s14254_s0 + $0x95] sm:$0xff] }
  0xf8   :  { %9222 = vmatprep.subr.msk.mxu0 %vm241_vm1, %v7774_v13 }
  0xfa   :  { %9163 = vmatmul.mubr.msk.f32.gmra.mrb[12].mxu0 %vm132_vm0, %v1301_v16  ;;  %v1751_v16 = vld [vmem:[%s14254_s0 + $0xb5] sm:$0xff] }
  0xfb   :  { %9165 = vmatprep.mubr.msk.f32.mxu0 %vm132_vm0, %v1302_v17  ;;  %9223 = vmatpush3.msk.msra.mxu0 %vm241_vm1, %v7774_v13  ;;  %v1748_v13 = vld [vmem:[%s14254_s0 + $0x9d] sm:$0xff] }
  0xfc   :  { %10323 = vmatprep.subr.bf16.mxu0 %v10322_v18  ;;  %v1752_v17 = vld [vmem:[%s14254_s0 + $0xbd] sm:$0xff] }
  0xfe   :  { %9166 = vmatmul.mubr.msk.f32.gmra.mrb[14].mxu0 %vm132_vm0, %v1303_v19  ;;  %v1754_v19 = vld [vmem:[%s14254_s0 + $0xcd] sm:$0xff] }
  0xff   :  { %9168 = vmatprep.mubr.msk.f32.mxu0 %vm132_vm0, %v1304_v20  ;;  %v1755_v20 = vld [vmem:[%s14254_s0 + $0xd5] sm:$0xff] }
 0x102   :  { %9169 = vmatmul.mubr.msk.f32.gmra.mrb[16].mxu0 %vm132_vm0, %v1305_v21  ;;  %v1756_v21 = vld [vmem:[%s14254_s0 + $0xdd] sm:$0xff] }
 0x103   :  { %9171 = vmatprep.mubr.msk.f32.mxu0 %vm132_vm0, %v1306_v22  ;;  %v1757_v22 = vld [vmem:[%s14254_s0 + $0xe5] sm:$0xff] }
 0x106   :  { %9172 = vmatmul.mubr.msk.f32.gmra.mrb[18].mxu0 %vm132_vm0, %v1307_v23  ;;  %v1758_v23 = vld [vmem:[%s14254_s0 + $0xed] sm:$0xff] }
 0x107   :  { %9174 = vmatprep.mubr.msk.f32.mxu0 %vm132_vm0, %v1308_v24  ;;  %v1759_v24 = vld [vmem:[%s14254_s0 + $0xf5] sm:$0xff] }
 0x10a   :  { %9175 = vmatmul.mubr.msk.f32.gmra.mrb[20].mxu0 %vm132_vm0, %v1309_v25  ;;  %v1760_v25 = vld [vmem:[%s14254_s0 + $0xfd] sm:$0xff] }
 0x10b   :  { %9177 = vmatprep.mubr.msk.f32.mxu0 %vm132_vm0, %v1310_v26  ;;  %v1761_v26 = vld [vmem:[%s14254_s0 + $0x105] sm:$0xff] }
 0x10e   :  { %9178 = vmatmul.mubr.msk.f32.gmra.mrb[22].mxu0 %vm132_vm0, %v1311_v27  ;;  %v1762_v27 = vld [vmem:[%s14254_s0 + $0x10d] sm:$0xff] }
 0x10f   :  { %9180 = vmatprep.mubr.msk.f32.mxu0 %vm132_vm0, %v1312_v28  ;;  %v1763_v28 = vld [vmem:[%s14254_s0 + $0x115] sm:$0xff] }
 0x112   :  { %9181 = vmatmul.mubr.msk.f32.gmra.mrb[24].mxu0 %vm132_vm0, %v1313_v29  ;;  %v1764_v29 = vld [vmem:[%s14254_s0 + $0x11d] sm:$0xff] }
 0x113   :  { %9183 = vmatprep.mubr.msk.f32.mxu0 %vm132_vm0, %v1314_v30  ;;  %v1765_v30 = vld [vmem:[%s14254_s0 + $0x125] sm:$0xff] }
 0x116   :  { %9184 = vmatmul.mubr.msk.f32.gmra.mrb[26].mxu0 %vm132_vm0, %v1315_v31  ;;  %v2172_v31 = vld [vmem:[%s14254_s0 + $0xe] sm:$0xff] }
 0x117   :  { %9186 = vmatprep.mubr.msk.f32.mxu0 %vm132_vm0, %v1316_v32  ;;  %v7864_v32 = vld [vmem:[%s14255_s1 + $0x280] sm:$0xff] }
 0x11a   :  { %9187 = vmatmul.mubr.msk.f32.gmra.mrb[28].mxu0 %vm132_vm0, %v1317_v33  ;;  %v7865_v33 = vld [vmem:[%s14255_s1 + $0x288] sm:$0xff] }
 0x11b   :  { %9189 = vmatprep.mubr.msk.f32.mxu0 %vm132_vm0, %v1318_v34  ;;  %v2173_v34 = vld [vmem:[%s14254_s0 + $0x16] sm:$0xff] }
 0x11e   :  { %9190 = vmatmul.mubr.msk.f32.gmra.mrb[30].mxu0 %vm132_vm0, %v1319_v35  ;;  %v2174_v35 = vld [vmem:[%s14254_s0 + $0x1e] sm:$0xff] }
 0x11f   :  { %9192 = vmatprep.mubr.msk.f32.mxu0 %vm132_vm0, %v1320_v36  ;;  %v10350_v36 = vpack.c.bf16 %v7865_v33, %v7864_v32  ;;  %v12035_v32 = vld [vmem:[%s14254_s0 + $0x101] sm:$0xff] }
 0x120   :  { %v2616_v33 = vld [vmem:[%s14254_s0 + $0x28] sm:$0xff] }
 0x122   :  { %9193 = vmatmul.mubr.msk.f32.gmra.mrb[32].mxu0 %vm132_vm0, %v1321_v37  ;;  %v7866_v37 = vld [vmem:[%s14255_s1 + $0x290] sm:$0xff] }
 0x123   :  { %9195 = vmatprep.mubr.msk.f32.mxu0 %vm132_vm0, %v1322_v38  ;;  %v7867_v38 = vld [vmem:[%s14255_s1 + $0x298] sm:$0xff] }
 0x124   :  { %v10354_v41 = vpack.c.bf16 %v7867_v38, %v7866_v37  ;;  %v2617_v37 = vld [vmem:[%s14254_s0 + $0x30] sm:$0xff] }
 0x125   :  { %v12059_v38 = vld [vmem:[%s14254_s0 + $0x109] sm:$0xff] }
 0x126   :  { %9196 = vmatmul.mubr.msk.f32.gmra.mrb[34].mxu0 %vm132_vm0, %v1323_v39  ;;  %v2175_v39 = vld [vmem:[%s14254_s0 + $0x26] sm:$0xff] }
 0x127   :  { %9224 = vmatprep.mubr.msk.f32.mxu0 %vm132_vm0, %v1730_v40  ;;  %v2176_v40 = vld [vmem:[%s14254_s0 + $0x2e] sm:$0xff] }
 0x12a   :  { %9225 = vmatmul.mubr.msk.f32.vlgmr.msra.gmra.mrb[0].mxu0 %vm132_vm0, %v1731_v43  ;;  %v7869_v43 = vld [vmem:[%s14255_s1 + $0x2a8] sm:$0xff] }
 0x12b   :  { %10325 = vmatpush3.bf16.msra.mxu0 %v10322_v18  ;;  %9227 = vmatprep.mubr.msk.f32.mxu0 %vm132_vm0, %v1732_v44  ;;  %v1753_v18 = vld [vmem:[%s14254_s0 + $0xc5] sm:$0xff]  ;;  %v2177_v44 = vld [vmem:[%s14254_s0 + $0x36] sm:$0xff]  ;;  %v10358_v46 = vpack.c.bf16 %v7869_v43, %v7868_v42 }
 0x12c   :  { %10327 = vmatprep.subr.bf16.mxu0 %v10326_v45  ;;  %v7918_v42 = vld [vmem:[%s14255_s1 + $0x308] sm:$0xff]  ;;  %v7919_v43 = vld [vmem:[%s14255_s1 + $0x310] sm:$0xff] }
 0x12e   :  { %9228 = vmatmul.mubr.msk.f32.gmra.mrb[2].mxu0 %vm132_vm0, %v1733_v48  ;;  %v7871_v48 = vld [vmem:[%s14255_s1 + $0x2b8] sm:$0xff] }
 0x12f   :  { %9230 = vmatprep.mubr.msk.f32.mxu0 %vm132_vm0, %v1734_v49  ;;  %10329 = vmatpush3.bf16.msra.mxu0 %v10326_v45  ;;  %v2178_v45 = vld [vmem:[%s14254_s0 + $0x3e] sm:$0xff]  ;;  %v2179_v49 = vld [vmem:[%s14254_s0 + $0x46] sm:$0xff]  ;;  %v10362_v51 = vpack.c.bf16 %v7871_v48, %v7870_v47  ;;  %v10382_v47 = vpack.c.bf16 %v7919_v43, %v7918_v42  ;;  %v7968_v43 = vld [vmem:[%s14255_s1 + $0x370] sm:$0xff] }
 0x130   :  { %10331 = vmatprep.subr.bf16.mxu0 %v10330_v50  ;;  %v7920_v48 = vld [vmem:[%s14255_s1 + $0x318] sm:$0xff] }
 0x132   :  { %9231 = vmatmul.mubr.msk.f32.gmra.mrb[4].mxu0 %vm132_vm0, %v1735_v53  ;;  %v7873_v53 = vld [vmem:[%s14255_s1 + $0x2c8] sm:$0xff] }
 0x133   :  { %9233 = vmatprep.mubr.msk.f32.mxu0 %vm132_vm0, %v1736_v54  ;;  %10333 = vmatpush3.bf16.msra.mxu0 %v10330_v50  ;;  %v2180_v50 = vld [vmem:[%s14254_s0 + $0x4e] sm:$0xff]  ;;  %v2181_v54 = vld [vmem:[%s14254_s0 + $0x56] sm:$0xff]  ;;  %v10366_v56 = vpack.c.bf16 %v7873_v53, %v7872_v52 }
 0x134   :  { %10335 = vmatprep.subr.bf16.mxu0 %v10334_v55  ;;  %v7922_v53 = vld [vmem:[%s14255_s1 + $0x328] sm:$0xff] }
 0x136   :  { %9234 = vmatmul.mubr.msk.f32.gmra.mrb[6].mxu0 %vm132_vm0, %v1737_v58  ;;  %v2184_v58 = vld [vmem:[%s14254_s0 + $0x6e] sm:$0xff] }
 0x137   :  { %9236 = vmatprep.mubr.msk.f32.mxu0 %vm132_vm0, %v1738_v59  ;;  %10337 = vmatpush3.bf16.msra.mxu0 %v10334_v55  ;;  %v2182_v55 = vld [vmem:[%s14254_s0 + $0x5e] sm:$0xff]  ;;  %v7874_v59 = vld [vmem:[%s14255_s1 + $0x2d0] sm:$0x1] }
 0x138   :  { %10339 = vmatprep.subr.bf16.mxu0 %v10338_v60 }
 0x13a   :  { %9237 = vmatmul.mubr.msk.f32.gmra.mrb[8].mxu0 %vm132_vm0, %v1739_v63  ;;  %v2186_v63 = vld [vmem:[%s14254_s0 + $0x7e] sm:$0xff] }
 0x13b   :  { %9239 = vmatprep.mubr.msk.f32.mxu0 %vm132_vm0, %v1740_v0  ;;  %10341 = vmatpush3.bf16.msra.mxu0 %v10338_v60  ;;  %v7912_v60 = vld [vmem:[%s14255_s1 + $0x2d8] sm:$0xff] }
 0x13c   :  { %10343 = vmatprep.subr.bf16.mxu0 %v10342_v1  ;;  %v11889_v0 = vpack.c.bf16 %v7913_v61, %v7912_v60  ;;  %v7924_v60 = vld [vmem:[%s14255_s1 + $0x338] sm:$0x1]  ;;  %v7962_v61 = vld [vmem:[%s14255_s1 + $0x340] sm:$0xff] }
 0x13e   :  { %9240 = vmatmul.mubr.msk.f32.gmra.mrb[10].mxu0 %vm132_vm0, %v1741_v2  ;;  %v2188_v2 = vld [vmem:[%s14254_s0 + $0x8e] sm:$0xff] }
 0x13f   :  { %9242 = vmatprep.mubr.msk.f32.mxu0 %vm132_vm0, %v1742_v3  ;;  %10345 = vmatpush3.bf16.msra.mxu0 %v10342_v1  ;;  %v2187_v1 = vld [vmem:[%s14254_s0 + $0x86] sm:$0xff]  ;;  %v2189_v3 = vld [vmem:[%s14254_s0 + $0x96] sm:$0xff] }
 0x140   :  { %9302 = vmatprep.subr.msk.mxu0 %vm241_vm1, %v7824_v4 }
 0x142   :  { %9243 = vmatmul.mubr.msk.f32.gmra.mrb[12].mxu0 %vm132_vm0, %v1743_v7  ;;  %v2193_v7 = vld [vmem:[%s14254_s0 + $0xb6] sm:$0xff] }
 0x143   :  { %9245 = vmatprep.mubr.msk.f32.mxu0 %vm132_vm0, %v1744_v8  ;;  %9303 = vmatpush3.msk.msra.mxu0 %vm241_vm1, %v7824_v4  ;;  %v2190_v4 = vld [vmem:[%s14254_s0 + $0x9e] sm:$0xff] }
 0x144   :  { %10347 = vmatprep.subr.bf16.mxu0 %v10346_v9  ;;  %v2194_v8 = vld [vmem:[%s14254_s0 + $0xbe] sm:$0xff] }
 0x146   :  { %9246 = vmatmul.mubr.msk.f32.gmra.mrb[14].mxu0 %vm132_vm0, %v1745_v10  ;;  %v2196_v10 = vld [vmem:[%s14254_s0 + $0xce] sm:$0xff] }
 0x147   :  { %9248 = vmatprep.mubr.msk.f32.mxu0 %vm132_vm0, %v1746_v11  ;;  %v2197_v11 = vld [vmem:[%s14254_s0 + $0xd6] sm:$0xff] }
 0x14a   :  { %9249 = vmatmul.mubr.msk.f32.gmra.mrb[16].mxu0 %vm132_vm0, %v1747_v12  ;;  %v2198_v12 = vld [vmem:[%s14254_s0 + $0xde] sm:$0xff] }
 0x14b   :  { %9251 = vmatprep.mubr.msk.f32.mxu0 %vm132_vm0, %v1748_v13  ;;  %v2199_v13 = vld [vmem:[%s14254_s0 + $0xe6] sm:$0xff] }
 0x14e   :  { %9252 = vmatmul.mubr.msk.f32.gmra.mrb[18].mxu0 %vm132_vm0, %v1749_v14  ;;  %v2200_v14 = vld [vmem:[%s14254_s0 + $0xee] sm:$0xff] }
 0x14f   :  { %9254 = vmatprep.mubr.msk.f32.mxu0 %vm132_vm0, %v1750_v15  ;;  %v2201_v15 = vld [vmem:[%s14254_s0 + $0xf6] sm:$0xff] }
 0x152   :  { %9255 = vmatmul.mubr.msk.f32.gmra.mrb[20].mxu0 %vm132_vm0, %v1751_v16  ;;  %v2202_v16 = vld [vmem:[%s14254_s0 + $0xfe] sm:$0xff] }
 0x153   :  { %9257 = vmatprep.mubr.msk.f32.mxu0 %vm132_vm0, %v1752_v17  ;;  %v2203_v17 = vld [vmem:[%s14254_s0 + $0x106] sm:$0xff] }
 0x156   :  { %9258 = vmatmul.mubr.msk.f32.gmra.mrb[22].mxu0 %vm132_vm0, %v1753_v18  ;;  %v11965_v18 = vld [vmem:[%s14254_s0 + $0xd1] sm:$0xff] }
 0x157   :  { %9260 = vmatprep.mubr.msk.f32.mxu0 %vm132_vm0, %v1754_v19  ;;  %v2204_v19 = vld [vmem:[%s14254_s0 + $0x10e] sm:$0xff]  ;;  %8943 = vmatprep.mubr.msk.f32.mxu1 %vm132_vm0, %v11965_v18 }
 0x15a   :  { %9261 = vmatmul.mubr.msk.f32.gmra.mrb[24].mxu0 %vm132_vm0, %v1755_v20  ;;  %v11976_v20 = vld [vmem:[%s14254_s0 + $0xd9] sm:$0xff] }
 0x15b   :  { %9263 = vmatprep.mubr.msk.f32.mxu0 %vm132_vm0, %v1756_v21  ;;  %v2205_v21 = vld [vmem:[%s14254_s0 + $0x116] sm:$0xff]  ;;  %8944 = vmatmul.mubr.msk.f32.vlgmr.msra.gmra.mrb[0].mxu1 %vm132_vm0, %v11976_v20 }
 0x15e   :  { %9264 = vmatmul.mubr.msk.f32.gmra.mrb[26].mxu0 %vm132_vm0, %v1757_v22  ;;  %v11985_v22 = vld [vmem:[%s14254_s0 + $0xe1] sm:$0xff] }
 0x15f   :  { %9266 = vmatprep.mubr.msk.f32.mxu0 %vm132_vm0, %v1758_v23  ;;  %v2206_v23 = vld [vmem:[%s14254_s0 + $0x11e] sm:$0xff]  ;;  %8946 = vmatprep.mubr.msk.f32.mxu1 %vm132_vm0, %v11985_v22 }
 0x162   :  { %9267 = vmatmul.mubr.msk.f32.gmra.mrb[28].mxu0 %vm132_vm0, %v1759_v24  ;;  %v11998_v24 = vld [vmem:[%s14254_s0 + $0xe9] sm:$0xff] }
 0x163   :  { %9269 = vmatprep.mubr.msk.f32.mxu0 %vm132_vm0, %v1760_v25  ;;  %v2207_v25 = vld [vmem:[%s14254_s0 + $0x126] sm:$0xff]  ;;  %8947 = vmatmul.mubr.msk.f32.gmra.mrb[2].mxu1 %vm132_vm0, %v11998_v24 }
 0x166   :  { %9270 = vmatmul.mubr.msk.f32.gmra.mrb[30].mxu0 %vm132_vm0, %v1761_v26  ;;  %v12007_v26 = vld [vmem:[%s14254_s0 + $0xf1] sm:$0xff] }
 0x167   :  { %9272 = vmatprep.mubr.msk.f32.mxu0 %vm132_vm0, %v1762_v27  ;;  %v2614_v27 = vld [vmem:[%s14254_s0 + $0x18] sm:$0xff]  ;;  %8949 = vmatprep.mubr.msk.f32.mxu1 %vm132_vm0, %v12007_v26 }
 0x16a   :  { %9273 = vmatmul.mubr.msk.f32.gmra.mrb[32].mxu0 %vm132_vm0, %v1763_v28  ;;  %v7914_v28 = vld [vmem:[%s14255_s1 + $0x2e8] sm:$0xff] }
 0x16b   :  { %9275 = vmatprep.mubr.msk.f32.mxu0 %vm132_vm0, %v1764_v29  ;;  %v7915_v29 = vld [vmem:[%s14255_s1 + $0x2f0] sm:$0xff] }
 0x16e   :  { %9276 = vmatmul.mubr.msk.f32.gmra.mrb[34].mxu0 %vm132_vm0, %v1765_v30  ;;  %v12026_v30 = vld [vmem:[%s14254_s0 + $0xf9] sm:$0xff] }
 0x16f   :  { %9304 = vmatprep.mubr.msk.f32.mxu0 %vm132_vm0, %v2172_v31  ;;  %v2615_v31 = vld [vmem:[%s14254_s0 + $0x20] sm:$0xff]  ;;  %8950 = vmatmul.mubr.msk.f32.gmra.mrb[4].mxu1 %vm132_vm0, %v12026_v30 }
 0x170   :  { %8952 = vmatprep.mubr.msk.f32.mxu1 %vm132_vm0, %v12035_v32 }
 0x172   :  { %9305 = vmatmul.mubr.msk.f32.vlgmr.msra.gmra.mrb[0].mxu0 %vm132_vm0, %v2173_v34  ;;  %v10374_v34 = vpack.c.bf16 %v7915_v29, %v7914_v28  ;;  %v3056_v28 = vld [vmem:[%s14254_s0 + $0x19] sm:$0xff]  ;;  %v7964_v29 = vld [vmem:[%s14255_s1 + $0x350] sm:$0xff] }
 0x173   :  { %10349 = vmatpush3.bf16.msra.mxu0 %v10346_v9  ;;  %9307 = vmatprep.mubr.msk.f32.mxu0 %vm132_vm0, %v2174_v35  ;;  %v2195_v9 = vld [vmem:[%s14254_s0 + $0xc6] sm:$0xff]  ;;  %v7916_v35 = vld [vmem:[%s14255_s1 + $0x2f8] sm:$0xff] }
 0x174   :  { %10351 = vmatprep.subr.bf16.mxu0 %v10350_v36  ;;  %8953 = vmatmul.mubr.msk.f32.gmra.mrb[6].mxu1 %vm132_vm0, %v12059_v38 }
 0x176   :  { %9308 = vmatmul.mubr.msk.f32.gmra.mrb[2].mxu0 %vm132_vm0, %v2175_v39  ;;  %v2618_v39 = vld [vmem:[%s14254_s0 + $0x38] sm:$0xff] }
 0x177   :  { %9310 = vmatprep.mubr.msk.f32.mxu0 %vm132_vm0, %v2176_v40  ;;  %10353 = vmatpush3.bf16.msra.mxu0 %v10350_v36  ;;  %v7917_v36 = vld [vmem:[%s14255_s1 + $0x300] sm:$0xff] }
 0x178   :  { %10355 = vmatprep.subr.bf16.mxu0 %v10354_v41  ;;  %v10378_v40 = vpack.c.bf16 %v7917_v36, %v7916_v35  ;;  %v7966_v36 = vld [vmem:[%s14255_s1 + $0x360] sm:$0xff] }
 0x17a   :  { %9311 = vmatmul.mubr.msk.f32.gmra.mrb[4].mxu0 %vm132_vm0, %v2177_v44  ;;  %v2619_v44 = vld [vmem:[%s14254_s0 + $0x40] sm:$0xff] }
 0x17b   :  { %9313 = vmatprep.mubr.msk.f32.mxu0 %vm132_vm0, %v2178_v45  ;;  %10357 = vmatpush3.bf16.msra.mxu0 %v10354_v41  ;;  %v12067_v41 = vld [vmem:[%s14254_s0 + $0x111] sm:$0xff]  ;;  %v12087_v45 = vld [vmem:[%s14254_s0 + $0x119] sm:$0xff] }
 0x17c   :  { %10359 = vmatprep.subr.bf16.mxu0 %v10358_v46  ;;  %8955 = vmatprep.mubr.msk.f32.mxu1 %vm132_vm0, %v12067_v41 }
 0x17d   :  { %8956 = vmatmul.mubr.msk.f32.gmra.mrb[8].mxu1 %vm132_vm0, %v12087_v45 }
 0x17e   :  { %9314 = vmatmul.mubr.msk.f32.gmra.mrb[6].mxu0 %vm132_vm0, %v2179_v49  ;;  %v7921_v49 = vld [vmem:[%s14255_s1 + $0x320] sm:$0xff] }
 0x17f   :  { %9316 = vmatprep.mubr.msk.f32.mxu0 %vm132_vm0, %v2180_v50  ;;  %10361 = vmatpush3.bf16.msra.mxu0 %v10358_v46  ;;  %v2620_v46 = vld [vmem:[%s14254_s0 + $0x48] sm:$0xff]  ;;  %v2621_v50 = vld [vmem:[%s14254_s0 + $0x50] sm:$0xff]  ;;  %v10386_v52 = vpack.c.bf16 %v7921_v49, %v7920_v48  ;;  %v7970_v49 = vld [vmem:[%s14255_s1 + $0x380] sm:$0xff] }
 0x180   :  { %10363 = vmatprep.subr.bf16.mxu0 %v10362_v51 }
 0x182   :  { %9317 = vmatmul.mubr.msk.f32.gmra.mrb[8].mxu0 %vm132_vm0, %v2181_v54  ;;  %v7923_v54 = vld [vmem:[%s14255_s1 + $0x330] sm:$0xff] }
 0x183   :  { %9319 = vmatprep.mubr.msk.f32.mxu0 %vm132_vm0, %v2182_v55  ;;  %10365 = vmatpush3.bf16.msra.mxu0 %v10362_v51  ;;  %v2622_v51 = vld [vmem:[%s14254_s0 + $0x58] sm:$0xff]  ;;  %v2623_v55 = vld [vmem:[%s14254_s0 + $0x60] sm:$0xff] }
 0x184   :  { %10367 = vmatprep.subr.bf16.mxu0 %v10366_v56 }
 0x186   :  { %9320 = vmatmul.mubr.msk.f32.gmra.mrb[10].mxu0 %vm132_vm0, %v2183_v57  ;;  %v10390_v57 = vpack.c.bf16 %v7923_v54, %v7922_v53  ;;  %v7972_v54 = vld [vmem:[%s14255_s1 + $0x390] sm:$0xff] }
 0x187   :  { %9322 = vmatprep.mubr.msk.f32.mxu0 %vm132_vm0, %v2184_v58  ;;  %10369 = vmatpush3.bf16.msra.mxu0 %v10366_v56  ;;  %v2624_v56 = vld [vmem:[%s14254_s0 + $0x68] sm:$0xff]  ;;  %v2625_v58 = vld [vmem:[%s14254_s0 + $0x70] sm:$0xff] }
 0x188   :  { %9382 = vmatprep.subr.msk.mxu0 %vm241_vm1, %v7874_v59 }
 0x18a   :  { %9323 = vmatmul.mubr.msk.f32.gmra.mrb[12].mxu0 %vm132_vm0, %v2185_v62  ;;  %v7963_v62 = vld [vmem:[%s14255_s1 + $0x348] sm:$0xff] }
 0x18b   :  { %9325 = vmatprep.mubr.msk.f32.mxu0 %vm132_vm0, %v2186_v63  ;;  %9383 = vmatpush3.msk.msra.mxu0 %vm241_vm1, %v7874_v59  ;;  %v2626_v59 = vld [vmem:[%s14254_s0 + $0x78] sm:$0xff]  ;;  %v2627_v63 = vld [vmem:[%s14254_s0 + $0x80] sm:$0xff] }
 0x18c   :  { %10371 = vmatprep.subr.bf16.mxu0 %v11889_v0 }
 0x18e   :  { %9326 = vmatmul.mubr.msk.f32.gmra.mrb[14].mxu0 %vm132_vm0, %v2187_v1  ;;  %v10394_v1 = vpack.c.bf16 %v7963_v62, %v7962_v61  ;;  %v7974_v61 = vld [vmem:[%s14255_s1 + $0x3a0] sm:$0x1]  ;;  %v3069_v62 = vld [vmem:[%s14254_s0 + $0x81] sm:$0xff] }
 0x18f   :  { %9328 = vmatprep.mubr.msk.f32.mxu0 %vm132_vm0, %v2188_v2  ;;  %v2629_v2 = vld [vmem:[%s14254_s0 + $0x90] sm:$0xff] }
 0x192   :  { %9329 = vmatmul.mubr.msk.f32.gmra.mrb[16].mxu0 %vm132_vm0, %v2189_v3  ;;  %v2630_v3 = vld [vmem:[%s14254_s0 + $0x98] sm:$0xff] }
 0x193   :  { %9331 = vmatprep.mubr.msk.f32.mxu0 %vm132_vm0, %v2190_v4  ;;  %v2631_v4 = vld [vmem:[%s14254_s0 + $0xa0] sm:$0xff] }
 0x196   :  { %9332 = vmatmul.mubr.msk.f32.gmra.mrb[18].mxu0 %vm132_vm0, %v2191_v5  ;;  %v2632_v5 = vld [vmem:[%s14254_s0 + $0xa8] sm:$0xff] }
 0x197   :  { %9334 = vmatprep.mubr.msk.f32.mxu0 %vm132_vm0, %v2192_v6  ;;  %v2633_v6 = vld [vmem:[%s14254_s0 + $0xb0] sm:$0xff] }
 0x19a   :  { %9335 = vmatmul.mubr.msk.f32.gmra.mrb[20].mxu0 %vm132_vm0, %v2193_v7  ;;  %v2634_v7 = vld [vmem:[%s14254_s0 + $0xb8] sm:$0xff] }
 0x19b   :  { %9337 = vmatprep.mubr.msk.f32.mxu0 %vm132_vm0, %v2194_v8  ;;  %v2635_v8 = vld [vmem:[%s14254_s0 + $0xc0] sm:$0xff] }
 0x19e   :  { %9338 = vmatmul.mubr.msk.f32.gmra.mrb[22].mxu0 %vm132_vm0, %v2195_v9  ;;  %v2636_v9 = vld [vmem:[%s14254_s0 + $0xc8] sm:$0xff] }
 0x19f   :  { %9340 = vmatprep.mubr.msk.f32.mxu0 %vm132_vm0, %v2196_v10  ;;  %v2637_v10 = vld [vmem:[%s14254_s0 + $0xd0] sm:$0xff] }
 0x1a2   :  { %9341 = vmatmul.mubr.msk.f32.gmra.mrb[24].mxu0 %vm132_vm0, %v2197_v11  ;;  %v2638_v11 = vld [vmem:[%s14254_s0 + $0xd8] sm:$0xff] }
 0x1a3   :  { %9343 = vmatprep.mubr.msk.f32.mxu0 %vm132_vm0, %v2198_v12  ;;  %v2639_v12 = vld [vmem:[%s14254_s0 + $0xe0] sm:$0xff] }
 0x1a6   :  { %9344 = vmatmul.mubr.msk.f32.gmra.mrb[26].mxu0 %vm132_vm0, %v2199_v13  ;;  %v2640_v13 = vld [vmem:[%s14254_s0 + $0xe8] sm:$0xff] }
 0x1a7   :  { %9346 = vmatprep.mubr.msk.f32.mxu0 %vm132_vm0, %v2200_v14  ;;  %v2641_v14 = vld [vmem:[%s14254_s0 + $0xf0] sm:$0xff] }
 0x1aa   :  { %9347 = vmatmul.mubr.msk.f32.gmra.mrb[28].mxu0 %vm132_vm0, %v2201_v15  ;;  %v2642_v15 = vld [vmem:[%s14254_s0 + $0xf8] sm:$0xff] }
 0x1ab   :  { %9349 = vmatprep.mubr.msk.f32.mxu0 %vm132_vm0, %v2202_v16  ;;  %v2643_v16 = vld [vmem:[%s14254_s0 + $0x100] sm:$0xff] }
 0x1ae   :  { %9350 = vmatmul.mubr.msk.f32.gmra.mrb[30].mxu0 %vm132_vm0, %v2203_v17  ;;  %v2644_v17 = vld [vmem:[%s14254_s0 + $0x108] sm:$0xff] }
 0x1af   :  { %9352 = vmatprep.mubr.msk.f32.mxu0 %vm132_vm0, %v2204_v19  ;;  %v2645_v19 = vld [vmem:[%s14254_s0 + $0x110] sm:$0xff] }
 0x1b2   :  { %9353 = vmatmul.mubr.msk.f32.gmra.mrb[32].mxu0 %vm132_vm0, %v2205_v21  ;;  %v2646_v21 = vld [vmem:[%s14254_s0 + $0x118] sm:$0xff] }
 0x1b3   :  { %9355 = vmatprep.mubr.msk.f32.mxu0 %vm132_vm0, %v2206_v23  ;;  %v2647_v23 = vld [vmem:[%s14254_s0 + $0x120] sm:$0xff] }
 0x1b6   :  { %9356 = vmatmul.mubr.msk.f32.gmra.mrb[34].mxu0 %vm132_vm0, %v2207_v25  ;;  %v2648_v25 = vld [vmem:[%s14254_s0 + $0x128] sm:$0xff] }
 0x1b7   :  { %9384 = vmatprep.mubr.msk.f32.mxu0 %vm132_vm0, %v2614_v27  ;;  %v2649_v27 = vld [vmem:[%s14254_s0 + $0x130] sm:$0xff] }
 0x1ba   :  { %9385 = vmatmul.mubr.msk.f32.vlgmr.msra.gmra.mrb[0].mxu0 %vm132_vm0, %v2615_v31  ;;  %v7965_v31 = vld [vmem:[%s14255_s1 + $0x358] sm:$0xff] }
 0x1bb   :  { %10373 = vmatpush3.bf16.msra.mxu0 %v11889_v0  ;;  %9387 = vmatprep.mubr.msk.f32.mxu0 %vm132_vm0, %v2616_v33  ;;  %v2628_v0 = vld [vmem:[%s14254_s0 + $0x88] sm:$0xff]  ;;  %v10398_v35 = vpack.c.bf16 %v7965_v31, %v7964_v29  ;;  %v3521_v29 = vld [vmem:[%s14254_s0 + $0xd2] sm:$0xff]  ;;  %v3522_v31 = vld [vmem:[%s14254_s0 + $0xda] sm:$0xff] }
 0x1bc   :  { %10375 = vmatprep.subr.bf16.mxu0 %v10374_v34  ;;  %v3057_v33 = vld [vmem:[%s14254_s0 + $0x21] sm:$0xff] }
 0x1be   :  { %9388 = vmatmul.mubr.msk.f32.gmra.mrb[2].mxu0 %vm132_vm0, %v2617_v37  ;;  %v7967_v37 = vld [vmem:[%s14255_s1 + $0x368] sm:$0xff] }
 0x1bf   :  { %9390 = vmatprep.mubr.msk.f32.mxu0 %vm132_vm0, %v2618_v39  ;;  %10377 = vmatpush3.bf16.msra.mxu0 %v10374_v34  ;;  %v3058_v34 = vld [vmem:[%s14254_s0 + $0x29] sm:$0xff]  ;;  %v3059_v39 = vld [vmem:[%s14254_s0 + $0x31] sm:$0xff]  ;;  %v10402_v42 = vpack.c.bf16 %v7967_v37, %v7966_v36  ;;  %v3526_v36 = vld [vmem:[%s14254_s0 + $0xfa] sm:$0xff] }
 0x1c0   :  { %10379 = vmatprep.subr.bf16.mxu0 %v10378_v40  ;;  %v3527_v37 = vld [vmem:[%s14254_s0 + $0x102] sm:$0xff] }
 0x1c2   :  { %9391 = vmatmul.mubr.msk.f32.gmra.mrb[4].mxu0 %vm132_vm0, %v2619_v44  ;;  %v7969_v44 = vld [vmem:[%s14255_s1 + $0x378] sm:$0xff] }
 0x1c3   :  { %9393 = vmatprep.mubr.msk.f32.mxu0 %vm132_vm0, %v2620_v46  ;;  %10381 = vmatpush3.bf16.msra.mxu0 %v10378_v40  ;;  %v3060_v40 = vld [vmem:[%s14254_s0 + $0x39] sm:$0xff]  ;;  %v3061_v46 = vld [vmem:[%s14254_s0 + $0x41] sm:$0xff]  ;;  %v10406_v48 = vpack.c.bf16 %v7969_v44, %v7968_v43  ;;  %v3532_v44 = vld [vmem:[%s14254_s0 + $0x12a] sm:$0xff] }
 0x1c4   :  { %10383 = vmatprep.subr.bf16.mxu0 %v10382_v47  ;;  %v3531_v43 = vld [vmem:[%s14254_s0 + $0x122] sm:$0xff] }
 0x1c6   :  { %9394 = vmatmul.mubr.msk.f32.gmra.mrb[6].mxu0 %vm132_vm0, %v2621_v50  ;;  %v7971_v50 = vld [vmem:[%s14255_s1 + $0x388] sm:$0xff] }
 0x1c7   :  { %9396 = vmatprep.mubr.msk.f32.mxu0 %vm132_vm0, %v2622_v51  ;;  %10385 = vmatpush3.bf16.msra.mxu0 %v10382_v47  ;;  %v3062_v47 = vld [vmem:[%s14254_s0 + $0x49] sm:$0xff]  ;;  %v3063_v51 = vld [vmem:[%s14254_s0 + $0x51] sm:$0xff]  ;;  %v10410_v53 = vpack.c.bf16 %v7971_v50, %v7970_v49 }
 0x1c8   :  { %10387 = vmatprep.subr.bf16.mxu0 %v10386_v52 }
 0x1ca   :  { %9397 = vmatmul.mubr.msk.f32.gmra.mrb[8].mxu0 %vm132_vm0, %v2623_v55  ;;  %v7973_v55 = vld [vmem:[%s14255_s1 + $0x398] sm:$0xff] }
 0x1cb   :  { %9399 = vmatprep.mubr.msk.f32.mxu0 %vm132_vm0, %v2624_v56  ;;  %10389 = vmatpush3.bf16.msra.mxu0 %v10386_v52  ;;  %v3064_v52 = vld [vmem:[%s14254_s0 + $0x59] sm:$0xff]  ;;  %v3065_v56 = vld [vmem:[%s14254_s0 + $0x61] sm:$0xff] }
 0x1cc   :  { %10391 = vmatprep.subr.bf16.mxu0 %v10390_v57 }
 0x1ce   :  { %9400 = vmatmul.mubr.msk.f32.gmra.mrb[10].mxu0 %vm132_vm0, %v2625_v58  ;;  %v10414_v58 = vpack.c.bf16 %v7973_v55, %v7972_v54 }
 0x1cf   :  { %9402 = vmatprep.mubr.msk.f32.mxu0 %vm132_vm0, %v2626_v59  ;;  %10393 = vmatpush3.bf16.msra.mxu0 %v10390_v57  ;;  %v3066_v57 = vld [vmem:[%s14254_s0 + $0x69] sm:$0xff]  ;;  %v3067_v59 = vld [vmem:[%s14254_s0 + $0x71] sm:$0xff] }
 0x1d0   :  { %9462 = vmatprep.subr.msk.mxu0 %vm241_vm1, %v7924_v60 }
 0x1d2   :  { %9403 = vmatmul.mubr.msk.f32.gmra.mrb[12].mxu0 %vm132_vm0, %v2627_v63  ;;  %v3070_v63 = vld [vmem:[%s14254_s0 + $0x89] sm:$0xff] }
 0x1d3   :  { %9405 = vmatprep.mubr.msk.f32.mxu0 %vm132_vm0, %v2628_v0  ;;  %9463 = vmatpush3.msk.msra.mxu0 %vm241_vm1, %v7924_v60  ;;  %v3068_v60 = vld [vmem:[%s14254_s0 + $0x79] sm:$0xff]  ;;  %v3071_v0 = vld [vmem:[%s14254_s0 + $0x91] sm:$0xff] }
 0x1d4   :  { %10395 = vmatprep.subr.bf16.mxu0 %v10394_v1 }
 0x1d6   :  { %9406 = vmatmul.mubr.msk.f32.gmra.mrb[14].mxu0 %vm132_vm0, %v2629_v2  ;;  %v3073_v2 = vld [vmem:[%s14254_s0 + $0xa1] sm:$0xff] }
 0x1d7   :  { %9408 = vmatprep.mubr.msk.f32.mxu0 %vm132_vm0, %v2630_v3  ;;  %v3074_v3 = vld [vmem:[%s14254_s0 + $0xa9] sm:$0xff] }
 0x1da   :  { %9409 = vmatmul.mubr.msk.f32.gmra.mrb[16].mxu0 %vm132_vm0, %v2631_v4  ;;  %v3075_v4 = vld [vmem:[%s14254_s0 + $0xb1] sm:$0xff] }
 0x1db   :  { %9411 = vmatprep.mubr.msk.f32.mxu0 %vm132_vm0, %v2632_v5  ;;  %v3076_v5 = vld [vmem:[%s14254_s0 + $0xb9] sm:$0xff] }
 0x1de   :  { %9412 = vmatmul.mubr.msk.f32.gmra.mrb[18].mxu0 %vm132_vm0, %v2633_v6  ;;  %v3077_v6 = vld [vmem:[%s14254_s0 + $0xc1] sm:$0xff] }
 0x1df   :  { %9414 = vmatprep.mubr.msk.f32.mxu0 %vm132_vm0, %v2634_v7  ;;  %v3078_v7 = vld [vmem:[%s14254_s0 + $0xc9] sm:$0xff] }
 0x1e2   :  { %9415 = vmatmul.mubr.msk.f32.gmra.mrb[20].mxu0 %vm132_vm0, %v2635_v8  ;;  %v3505_v8 = vld [vmem:[%s14254_s0 + $0x52] sm:$0xff] }
 0x1e3   :  { %9417 = vmatprep.mubr.msk.f32.mxu0 %vm132_vm0, %v2636_v9  ;;  %v3506_v9 = vld [vmem:[%s14254_s0 + $0x5a] sm:$0xff] }
 0x1e6   :  { %9418 = vmatmul.mubr.msk.f32.gmra.mrb[22].mxu0 %vm132_vm0, %v2637_v10  ;;  %v3507_v10 = vld [vmem:[%s14254_s0 + $0x62] sm:$0xff] }
 0x1e7   :  { %9420 = vmatprep.mubr.msk.f32.mxu0 %vm132_vm0, %v2638_v11  ;;  %v3508_v11 = vld [vmem:[%s14254_s0 + $0x6a] sm:$0xff] }
 0x1ea   :  { %9421 = vmatmul.mubr.msk.f32.gmra.mrb[24].mxu0 %vm132_vm0, %v2639_v12  ;;  %v3509_v12 = vld [vmem:[%s14254_s0 + $0x72] sm:$0xff] }
 0x1eb   :  { %9423 = vmatprep.mubr.msk.f32.mxu0 %vm132_vm0, %v2640_v13  ;;  %v3510_v13 = vld [vmem:[%s14254_s0 + $0x7a] sm:$0xff] }
 0x1ee   :  { %9424 = vmatmul.mubr.msk.f32.gmra.mrb[26].mxu0 %vm132_vm0, %v2641_v14  ;;  %v3511_v14 = vld [vmem:[%s14254_s0 + $0x82] sm:$0xff] }
 0x1ef   :  { %9426 = vmatprep.mubr.msk.f32.mxu0 %vm132_vm0, %v2642_v15  ;;  %v3512_v15 = vld [vmem:[%s14254_s0 + $0x8a] sm:$0xff] }
 0x1f2   :  { %9427 = vmatmul.mubr.msk.f32.gmra.mrb[28].mxu0 %vm132_vm0, %v2643_v16  ;;  %v3513_v16 = vld [vmem:[%s14254_s0 + $0x92] sm:$0xff] }
 0x1f3   :  { %9429 = vmatprep.mubr.msk.f32.mxu0 %vm132_vm0, %v2644_v17  ;;  %v3514_v17 = vld [vmem:[%s14254_s0 + $0x9a] sm:$0xff] }
 0x1f6   :  { %9430 = vmatmul.mubr.msk.f32.gmra.mrb[30].mxu0 %vm132_vm0, %v2645_v19  ;;  %v3515_v19 = vld [vmem:[%s14254_s0 + $0xa2] sm:$0xff] }
 0x1f7   :  { %9432 = vmatprep.mubr.msk.f32.mxu0 %vm132_vm0, %v2646_v21  ;;  %v3516_v21 = vld [vmem:[%s14254_s0 + $0xaa] sm:$0xff] }
 0x1fa   :  { %9433 = vmatmul.mubr.msk.f32.gmra.mrb[32].mxu0 %vm132_vm0, %v2647_v23  ;;  %v3517_v23 = vld [vmem:[%s14254_s0 + $0xb2] sm:$0xff] }
 0x1fb   :  { %9435 = vmatprep.mubr.msk.f32.mxu0 %vm132_vm0, %v2648_v25  ;;  %v3518_v25 = vld [vmem:[%s14254_s0 + $0xba] sm:$0xff] }
 0x1fe   :  { %9436 = vmatmul.mubr.msk.f32.gmra.mrb[34].mxu0 %vm132_vm0, %v2649_v27  ;;  %v3519_v27 = vld [vmem:[%s14254_s0 + $0xc2] sm:$0xff] }
 0x1ff   :  { %9464 = vmatprep.mubr.msk.f32.mxu0 %vm132_vm0, %v3056_v28  ;;  %v3520_v28 = vld [vmem:[%s14254_s0 + $0xca] sm:$0xff] }
 0x202   :  { %9465 = vmatmul.mubr.msk.f32.vlgmr.msra.gmra.mrb[0].mxu0 %vm132_vm0, %v3057_v33  ;;  %v3523_v33 = vld [vmem:[%s14254_s0 + $0xe2] sm:$0xff] }
 0x203   :  { %10397 = vmatpush3.bf16.msra.mxu0 %v10394_v1  ;;  %9467 = vmatprep.mubr.msk.f32.mxu0 %vm132_vm0, %v3058_v34  ;;  %v3072_v1 = vld [vmem:[%s14254_s0 + $0x99] sm:$0xff]  ;;  %v3524_v34 = vld [vmem:[%s14254_s0 + $0xea] sm:$0xff] }
 0x204   :  { %10399 = vmatprep.subr.bf16.mxu0 %v10398_v35 }
 0x206   :  { %9468 = vmatmul.mubr.msk.f32.gmra.mrb[2].mxu0 %vm132_vm0, %v3059_v39  ;;  %v3528_v39 = vld [vmem:[%s14254_s0 + $0x10a] sm:$0xff] }
 0x207   :  { %9470 = vmatprep.mubr.msk.f32.mxu0 %vm132_vm0, %v3060_v40  ;;  %10401 = vmatpush3.bf16.msra.mxu0 %v10398_v35  ;;  %v3525_v35 = vld [vmem:[%s14254_s0 + $0xf2] sm:$0xff] }
 0x208   :  { %10403 = vmatprep.subr.bf16.mxu0 %v10402_v42  ;;  %v3529_v40 = vld [vmem:[%s14254_s0 + $0x112] sm:$0xff] }
 0x20a   :  { %9471 = vmatmul.mubr.msk.f32.gmra.mrb[4].mxu0 %vm132_vm0, %v3061_v46  ;;  %v3533_v46 = vld [vmem:[%s14254_s0 + $0x132] sm:$0xff] }
 0x20b   :  { %9473 = vmatprep.mubr.msk.f32.mxu0 %vm132_vm0, %v3062_v47  ;;  %10405 = vmatpush3.bf16.msra.mxu0 %v10402_v42  ;;  %v3530_v42 = vld [vmem:[%s14254_s0 + $0x11a] sm:$0xff]  ;;  %v10796_v47 = vmov 0.0  }
 0x20c   :  { %10407 = vmatprep.subr.bf16.mxu0 %v10406_v48  ;;  %9598 = vmatprep.subr.mxu1 %v10796_v47  ;;  %4409 = vst.msk [vmem:[#allocation4] sm:$0xff] %vm4091_vm2, %v10796_v47  ;;  %4410 = vst.msk [vmem:[#allocation4 + $0x8] sm:$0xff] %vm4091_vm2, %v10796_v47 }
 0x20d   :  { %4411 = vst.msk [vmem:[#allocation4 + $0x10] sm:$0xff] %vm4091_vm2, %v10796_v47  ;;  %4412 = vst.msk [vmem:[#allocation4 + $0x18] sm:$0xff] %vm4091_vm2, %v10796_v47  ;;  %9600 = vmatprep.mubr.msk.f32.mxu1 %vm10797_vm3, %v10796_v47 }
 0x20e   :  { %9474 = vmatmul.mubr.msk.f32.gmra.mrb[6].mxu0 %vm132_vm0, %v3063_v51  ;;  %4413 = vst.msk [vmem:[#allocation4 + $0x20] sm:$0xff] %vm4091_vm2, %v10796_v47  ;;  %4414 = vst.msk [vmem:[#allocation4 + $0x28] sm:$0xff] %vm4091_vm2, %v10796_v47  ;;  %v8188_v51 = vld [vmem:[%s14257_s3 + $0x40] sm:$0xff] }
 0x20f   :  { %9476 = vmatprep.mubr.msk.f32.mxu0 %vm132_vm0, %v3064_v52  ;;  %10409 = vmatpush3.bf16.msra.mxu0 %v10406_v48  ;;  %4415 = vst.msk [vmem:[#allocation4 + $0x30] sm:$0xff] %vm4091_vm2, %v10796_v47  ;;  %4416 = vst.msk [vmem:[#allocation4 + $0x38] sm:$0xff] %vm4091_vm2, %v10796_v47  ;;  %v8013_v48 = vld [vmem:[%s14257_s3 + $0x8] sm:$0xff] }
 0x210   :  { %10411 = vmatprep.subr.bf16.mxu0 %v10410_v53  ;;  %4417 = vst.msk [vmem:[#allocation4 + $0x40] sm:$0xff] %vm4091_vm2, %v10796_v47  ;;  %4418 = vst.msk [vmem:[#allocation4 + $0x48] sm:$0xff] %vm4091_vm2, %v10796_v47  ;;  %9599 = vmatpush3.msra.mxu1 %v8013_v48 }
 0x211   :  { %4419 = vst.msk [vmem:[#allocation4 + $0x50] sm:$0xff] %vm4091_vm2, %v10796_v47  ;;  %4420 = vst.msk [vmem:[#allocation4 + $0x58] sm:$0xff] %vm4091_vm2, %v10796_v47  ;;  %9663 = vmatprep.subr.mxu1 %v10796_v47 }
 0x212   :  { %9477 = vmatmul.mubr.msk.f32.gmra.mrb[8].mxu0 %vm132_vm0, %v3065_v56  ;;  %4421 = vst.msk [vmem:[#allocation4 + $0x60] sm:$0xff] %vm4091_vm2, %v10796_v47  ;;  %4422 = vst.msk [vmem:[#allocation4 + $0x68] sm:$0xff] %vm4091_vm2, %v10796_v47 }
 0x213   :  { %9479 = vmatprep.mubr.msk.f32.mxu0 %vm132_vm0, %v3066_v57  ;;  %10413 = vmatpush3.bf16.msra.mxu0 %v10410_v53  ;;  %4423 = vst.msk [vmem:[#allocation4 + $0x70] sm:$0xff] %vm4091_vm2, %v10796_v47  ;;  %4424 = vst.msk [vmem:[#allocation4 + $0x78] sm:$0xff] %vm4091_vm2, %v10796_v47  ;;  %v4485_v49 = vld [vmem:[#allocation4 + $0x1] sm:$0xff] }
 0x214   :  { %10415 = vmatprep.subr.bf16.mxu0 %v10414_v58  ;;  %4425 = vst.msk [vmem:[#allocation4 + $0x80] sm:$0xff] %vm4091_vm2, %v10796_v47  ;;  %4426 = vst.msk [vmem:[#allocation4 + $0x88] sm:$0xff] %vm4091_vm2, %v10796_v47  ;;  %9601 = vmatmul.mubr.msk.f32.vlgmr.msra.gmra.mrb[10].mxu1 %vm4091_vm2, %v4485_v49  ;;  %v4486_v50 = vld [vmem:[#allocation4 + $0x9] sm:$0xff] }
 0x215   :  { %4427 = vst.msk [vmem:[#allocation4 + $0x90] sm:$0xff] %vm4091_vm2, %v10796_v47  ;;  %4428 = vst.msk [vmem:[#allocation4 + $0x98] sm:$0xff] %vm4091_vm2, %v10796_v47  ;;  %9603 = vmatprep.mubr.msk.f32.mxu1 %vm10797_vm3, %v10796_v47  ;;  %v4484_v53 = vld [vmem:[%s14257_s3] sm:$0xff] }
 0x216   :  { %9480 = vmatmul.mubr.msk.f32.gmra.mrb[10].mxu0 %vm132_vm0, %v3067_v59  ;;  %4429 = vst.msk [vmem:[#allocation4 + $0xa0] sm:$0xff] %vm4091_vm2, %v10796_v47  ;;  %4430 = vst.msk [vmem:[#allocation4 + $0xa8] sm:$0xff] %vm4091_vm2, %v10796_v47  ;;  %9664 = vmatpush3.msra.mxu1 %v4484_v53 }
 0x217   :  { %9482 = vmatprep.mubr.msk.f32.mxu0 %vm132_vm0, %v3068_v60  ;;  %10417 = vmatpush3.bf16.msra.mxu0 %v10414_v58 }
 0x218   :  { %9542 = vmatprep.subr.msk.mxu0 %vm241_vm1, %v7974_v61  ;;  %9604 = vmatmul.mubr.msk.f32.gmra.mrb[12].mxu1 %vm4091_vm2, %v4486_v50 }
 0x219   :  { %9606 = vmatprep.mubr.msk.f32.mxu1 %vm10797_vm3, %v10796_v47  ;;  %9728 = vmatprep.subr.mxu1 %v10796_v47 }
 0x21a   :  { %9483 = vmatmul.mubr.msk.f32.gmra.mrb[12].mxu0 %vm132_vm0, %v3069_v62 }
 0x21b   :  { %9485 = vmatprep.mubr.msk.f32.mxu0 %vm132_vm0, %v3070_v63  ;;  %9543 = vmatpush3.msk.msra.mxu0 %vm241_vm1, %v7974_v61  ;;  %v12628_v63 = vld [vmem:[%s14256_s2] ss:$0 sm:$0xff]  ;;  %s10799_s2 = smov 32  }
 0x21c   :  { %10118 = vmatprep.subr.mxu0 %v10796_v47 }
 0x21e   :  { %9486 = vmatmul.mubr.msk.f32.gmra.mrb[14].mxu0 %vm132_vm0, %v3071_v0 }
 0x21f   :  { %9488 = vmatprep.mubr.msk.f32.mxu0 %vm132_vm0, %v3072_v1 }
 0x222   :  { %9489 = vmatmul.mubr.msk.f32.gmra.mrb[16].mxu0 %vm132_vm0, %v3073_v2 }
 0x223   :  { %9491 = vmatprep.mubr.msk.f32.mxu0 %vm132_vm0, %v3074_v3 }
 0x226   :  { %9492 = vmatmul.mubr.msk.f32.gmra.mrb[18].mxu0 %vm132_vm0, %v3075_v4 }
 0x227   :  { %9494 = vmatprep.mubr.msk.f32.mxu0 %vm132_vm0, %v3076_v5 }
 0x22a   :  { %9495 = vmatmul.mubr.msk.f32.gmra.mrb[20].mxu0 %vm132_vm0, %v3077_v6 }
 0x22b   :  { %9497 = vmatprep.mubr.msk.f32.mxu0 %vm132_vm0, %v3078_v7 }
 0x22e   :  { %9498 = vmatmul.mubr.msk.f32.gmra.mrb[22].mxu0 %vm132_vm0, %v11965_v18  ;;  %v3089_v18 = vld [vmem:[%s14254_s0 + $0x121] sm:$0xff]  ;;  %v12601_v52 = vpop.f32.mrb[0].mxu1 }
 0x22f   :  { %9500 = vmatprep.mubr.msk.f32.mxu0 %vm132_vm0, %v11976_v20  ;;  %v3090_v20 = vld [vmem:[%s14254_s0 + $0x129] sm:$0xff]  ;;  %v12606_v54 = vpop.f32.mrb[1].mxu1 }
 0x232   :  { %9501 = vmatmul.mubr.msk.f32.gmra.mrb[24].mxu0 %vm132_vm0, %v11985_v22  ;;  %v3091_v22 = vld [vmem:[%s14254_s0 + $0x131] sm:$0xff] }
 0x233   :  { %9503 = vmatprep.mubr.msk.f32.mxu0 %vm132_vm0, %v11998_v24  ;;  %v3498_v24 = vld [vmem:[%s14254_s0 + $0x1a] sm:$0xff] }
 0x236   :  { %9504 = vmatmul.mubr.msk.f32.gmra.mrb[26].mxu0 %vm132_vm0, %v12007_v26  ;;  %v3499_v26 = vld [vmem:[%s14254_s0 + $0x22] sm:$0xff]  ;;  %v12609_v55 = vpop.f32.mrb[2].mxu1 }
 0x237   :  { %9506 = vmatprep.mubr.msk.f32.mxu0 %vm132_vm0, %v12026_v30  ;;  %v3500_v30 = vld [vmem:[%s14254_s0 + $0x2a] sm:$0xff]  ;;  %v12611_v56 = vpop.f32.mrb[3].mxu1 }
 0x23a   :  { %9507 = vmatmul.mubr.msk.f32.gmra.mrb[28].mxu0 %vm132_vm0, %v12035_v32  ;;  %v3501_v32 = vld [vmem:[%s14254_s0 + $0x32] sm:$0xff] }
 0x23b   :  { %9509 = vmatprep.mubr.msk.f32.mxu0 %vm132_vm0, %v12059_v38  ;;  %v3502_v38 = vld [vmem:[%s14254_s0 + $0x3a] sm:$0xff] }
 0x23e   :  { %9510 = vmatmul.mubr.msk.f32.gmra.mrb[30].mxu0 %vm132_vm0, %v12067_v41  ;;  %v3503_v41 = vld [vmem:[%s14254_s0 + $0x42] sm:$0xff] }
 0x23f   :  { %9512 = vmatprep.mubr.msk.f32.mxu0 %vm132_vm0, %v12087_v45  ;;  %v3504_v45 = vld [vmem:[%s14254_s0 + $0x4a] sm:$0xff] }
 0x242   :  { %9513 = vmatmul.mubr.msk.f32.gmra.mrb[32].mxu0 %vm132_vm0, %v3089_v18  ;;  %v12613_v57 = vpop.f32.mrb[4].mxu1 }
 0x243   :  { %9515 = vmatprep.mubr.msk.f32.mxu0 %vm132_vm0, %v3090_v20  ;;  %v12615_v58 = vpop.f32.mrb[5].mxu1 }
 0x246   :  { %9516 = vmatmul.mubr.msk.f32.gmra.mrb[34].mxu0 %vm132_vm0, %v3091_v22 }
 0x247   :  { %9544 = vmatprep.mubr.msk.f32.mxu0 %vm132_vm0, %v3498_v24  ;;  %v12617_v59 = vpop.f32.mrb[6].mxu1 }
 0x248   :  { %v12619_v60 = vpop.f32.mrb[7].mxu1 }
 0x24a   :  { %9545 = vmatmul.mubr.msk.f32.vlgmr.msra.gmra.mrb[0].mxu0 %vm132_vm0, %v3499_v26 }
 0x24b   :  { %9547 = vmatprep.mubr.msk.f32.mxu0 %vm132_vm0, %v3500_v30  ;;  %10119 = vmatpush3.msra.mxu0 %v8188_v51 }
 0x24e   :  { %9548 = vmatmul.mubr.msk.f32.gmra.mrb[2].mxu0 %vm132_vm0, %v3501_v32 }
 0x24f   :  { %9550 = vmatprep.mubr.msk.f32.mxu0 %vm132_vm0, %v3502_v38 }
 0x250   :  { %v12621_v61 = vpop.f32.mrb[8].mxu1 }
 0x251   :  { %v12623_v62 = vpop.f32.mrb[9].mxu1 }
 0x252   :  { %9551 = vmatmul.mubr.msk.f32.gmra.mrb[4].mxu0 %vm132_vm0, %v3503_v41 }
 0x253   :  { %9553 = vmatprep.mubr.msk.f32.mxu0 %vm132_vm0, %v3504_v45 }
 0x256   :  { %9554 = vmatmul.mubr.msk.f32.gmra.mrb[6].mxu0 %vm132_vm0, %v3505_v8 }
 0x257   :  { %9556 = vmatprep.mubr.msk.f32.mxu0 %vm132_vm0, %v3506_v9 }
 0x25a   :  { %9557 = vmatmul.mubr.msk.f32.gmra.mrb[8].mxu0 %vm132_vm0, %v3507_v10 }
 0x25b   :  { %9559 = vmatprep.mubr.msk.f32.mxu0 %vm132_vm0, %v3508_v11 }
 0x25e   :  { %9560 = vmatmul.mubr.msk.f32.gmra.mrb[10].mxu0 %vm132_vm0, %v3509_v12 }
 0x25f   :  { %9562 = vmatprep.mubr.msk.f32.mxu0 %vm132_vm0, %v3510_v13 }
 0x262   :  { %9563 = vmatmul.mubr.msk.f32.gmra.mrb[12].mxu0 %vm132_vm0, %v3511_v14 }
 0x263   :  { %9565 = vmatprep.mubr.msk.f32.mxu0 %vm132_vm0, %v3512_v15 }
 0x266   :  { %9566 = vmatmul.mubr.msk.f32.gmra.mrb[14].mxu0 %vm132_vm0, %v3513_v16 }
 0x267   :  { %9568 = vmatprep.mubr.msk.f32.mxu0 %vm132_vm0, %v3514_v17 }
 0x26a   :  { %9569 = vmatmul.mubr.msk.f32.gmra.mrb[16].mxu0 %vm132_vm0, %v3515_v19 }
 0x26b   :  { %9571 = vmatprep.mubr.msk.f32.mxu0 %vm132_vm0, %v3516_v21 }
 0x26e   :  { %9572 = vmatmul.mubr.msk.f32.gmra.mrb[18].mxu0 %vm132_vm0, %v3517_v23 }
 0x26f   :  { %9574 = vmatprep.mubr.msk.f32.mxu0 %vm132_vm0, %v3518_v25 }
 0x272   :  { %9575 = vmatmul.mubr.msk.f32.gmra.mrb[20].mxu0 %vm132_vm0, %v3519_v27 }
 0x273   :  { %9577 = vmatprep.mubr.msk.f32.mxu0 %vm132_vm0, %v3520_v28 }
 0x276   :  { %9578 = vmatmul.mubr.msk.f32.gmra.mrb[22].mxu0 %vm132_vm0, %v3521_v29 }
 0x277   :  { %9580 = vmatprep.mubr.msk.f32.mxu0 %vm132_vm0, %v3522_v31 }
 0x27a   :  { %9581 = vmatmul.mubr.msk.f32.gmra.mrb[24].mxu0 %vm132_vm0, %v3523_v33 }
 0x27b   :  { %9583 = vmatprep.mubr.msk.f32.mxu0 %vm132_vm0, %v3524_v34 }
 0x27e   :  { %9584 = vmatmul.mubr.msk.f32.gmra.mrb[26].mxu0 %vm132_vm0, %v3525_v35 }
 0x27f   :  { %9586 = vmatprep.mubr.msk.f32.mxu0 %vm132_vm0, %v3526_v36 }
 0x282   :  { %9587 = vmatmul.mubr.msk.f32.gmra.mrb[28].mxu0 %vm132_vm0, %v3527_v37 }
 0x283   :  { %9589 = vmatprep.mubr.msk.f32.mxu0 %vm132_vm0, %v3528_v39 }
 0x286   :  { %9590 = vmatmul.mubr.msk.f32.gmra.mrb[30].mxu0 %vm132_vm0, %v3529_v40 }
 0x287   :  { %9592 = vmatprep.mubr.msk.f32.mxu0 %vm132_vm0, %v3530_v42 }
 0x28a   :  { %9593 = vmatmul.mubr.msk.f32.gmra.mrb[32].mxu0 %vm132_vm0, %v3531_v43 }
 0x28b   :  { %9595 = vmatprep.mubr.msk.f32.mxu0 %vm132_vm0, %v3532_v44 }
 0x28e   :  { %9596 = vmatmul.mubr.msk.f32.gmra.mrb[34].mxu0 %vm132_vm0, %v3533_v46 }
 0x28f   :  { %10120 = vmatprep.mubr.msk.f32.mxu0 %vm10797_vm3, %v10796_v47 }
 0x31d   :  { %v9546_v0 = vpop.f32.mrb[0].mxu0 }
 0x31e   :  { %v3948_v1 = vadd.f32 %v9546_v0, %v12628_v63  ;;  %v3725_v2 = vpop.f32.mrb[1].mxu0 }
 0x31f   :  { %v3947_v3 = vadd.f32 %v12628_v63, %v3725_v2 }
 0x320   :  { %vm3984_vm4 = vcmp.gt.f32.partialorder %v3948_v1, 0.0  ;;  %v4020_v4 = vmul.f32 0.01, %v3948_v1 }
 0x321   :  { %vm3983_vm5 = vcmp.gt.f32.partialorder %v3947_v3, 0.0  ;;  %v4019_v5 = vmul.f32 0.01, %v3947_v3  ;;  %v9549_v6 = vpop.f32.mrb[2].mxu0 }
 0x322   :  { %v4056_v7 = vsel %vm3984_vm4, %v3948_v1, %v4020_v4  ;;  %v3950_v18 = vadd.f32 %v9549_v6, %v12628_v63  ;;  %v3735_v20 = vpop.f32.mrb[3].mxu0  ;;  %vm4434_vm4 = vcmask 61440  }
 0x323   :  { %4093 = vst.msk [vmem:[#allocation2 + $0x8] sm:$0xff] %vm4091_vm2, %v4056_v7  ;;  %v4055_v22 = vsel %vm3983_vm5, %v3947_v3, %v4019_v5  ;;  %v3949_v24 = vadd.f32 %v12628_v63, %v3735_v20 }
 0x324   :  { %4092 = vst.msk [vmem:[#allocation2] sm:$0xff] %vm4091_vm2, %v4055_v22  ;;  %vm3986_vm6 = vcmp.gt.f32.partialorder %v3950_v18, 0.0  ;;  %v4022_v26 = vmul.f32 0.01, %v3950_v18 }
 0x325   :  { %vm3985_vm7 = vcmp.gt.f32.partialorder %v3949_v24, 0.0  ;;  %v4021_v30 = vmul.f32 0.01, %v3949_v24  ;;  %v9552_v32 = vpop.f32.mrb[4].mxu0 }
 0x326   :  { %v4058_v38 = vsel %vm3986_vm6, %v3950_v18, %v4022_v26  ;;  %v3952_v41 = vadd.f32 %v9552_v32, %v12628_v63  ;;  %v3745_v45 = vpop.f32.mrb[5].mxu0 }
 0x327   :  { %4095 = vst.msk [vmem:[#allocation2 + $0x18] sm:$0xff] %vm4091_vm2, %v4058_v38  ;;  %v4057_v8 = vsel %vm3985_vm7, %v3949_v24, %v4021_v30  ;;  %v3951_v9 = vadd.f32 %v12628_v63, %v3745_v45 }
 0x328   :  { %4094 = vst.msk [vmem:[#allocation2 + $0x10] sm:$0xff] %vm4091_vm2, %v4057_v8  ;;  %vm3988_vm8 = vcmp.gt.f32.partialorder %v3952_v41, 0.0  ;;  %v4024_v10 = vmul.f32 0.01, %v3952_v41 }
 0x329   :  { %vm3987_vm9 = vcmp.gt.f32.partialorder %v3951_v9, 0.0  ;;  %v4023_v11 = vmul.f32 0.01, %v3951_v9  ;;  %v9555_v12 = vpop.f32.mrb[6].mxu0 }
 0x32a   :  { %v4060_v13 = vsel %vm3988_vm8, %v3952_v41, %v4024_v10  ;;  %v3954_v14 = vadd.f32 %v9555_v12, %v12628_v63  ;;  %v3755_v15 = vpop.f32.mrb[7].mxu0  ;;  %v4129_v33 = vld [vmem:[#allocation2 + $0x8] sm:$0xff] }
 0x32b   :  { %4097 = vst.msk [vmem:[#allocation2 + $0x28] sm:$0xff] %vm4091_vm2, %v4060_v13  ;;  %v4059_v16 = vsel %vm3987_vm9, %v3951_v9, %v4023_v11  ;;  %v3953_v17 = vadd.f32 %v12628_v63, %v3755_v15  ;;  %v4128_v25 = vld [vmem:[#allocation2] sm:$0xff] }
 0x32c   :  { %4096 = vst.msk [vmem:[#allocation2 + $0x20] sm:$0xff] %vm4091_vm2, %v4059_v16  ;;  %vm3990_vm10 = vcmp.gt.f32.partialorder %v3954_v14, 0.0  ;;  %v4026_v19 = vmul.f32 0.01, %v3954_v14  ;;  %v4163_v27 = vld [vmem:[#allocation2 + $0x1] sm:$0xff] }
 0x32d   :  { %vm3989_vm11 = vcmp.gt.f32.partialorder %v3953_v17, 0.0  ;;  %v4025_v21 = vmul.f32 0.01, %v3953_v17  ;;  %v9558_v23 = vpop.f32.mrb[8].mxu0  ;;  %v4198_v44 = vmax.f32 %v4128_v25, %v4163_v27 }
 0x32e   :  { %v4062_v28 = vsel %vm3990_vm10, %v3954_v14, %v4026_v19  ;;  %v3956_v29 = vadd.f32 %v9558_v23, %v12628_v63  ;;  %v3765_v31 = vpop.f32.mrb[9].mxu0  ;;  %v4131_v2 = vld [vmem:[#allocation2 + $0x18] sm:$0xff] }
 0x32f   :  { %v4164_v34 = vld [vmem:[#allocation2 + $0x9] sm:$0xff]  ;;  %4099 = vst.msk [vmem:[#allocation2 + $0x38] sm:$0xff] %vm4091_vm2, %v4062_v28  ;;  %v4061_v35 = vsel %vm3989_vm11, %v3953_v17, %v4025_v21  ;;  %v3955_v36 = vadd.f32 %v12628_v63, %v3765_v31  ;;  %v4234_v40 = vld [vmem:[#allocation2 + $0x14] sm:$0xff] }
 0x330   :  { %v4199_v37 = vmax.f32 %v4129_v33, %v4164_v34  ;;  %v4233_v39 = vld [vmem:[#allocation2 + $0xc] sm:$0xff]  ;;  %4098 = vst.msk [vmem:[#allocation2 + $0x30] sm:$0xff] %vm4091_vm2, %v4061_v35  ;;  %vm3992_vm12 = vcmp.gt.f32.partialorder %v3956_v29, 0.0  ;;  %v4028_v43 = vmul.f32 0.01, %v3956_v29  ;;  %v4269_v46 = vld [vmem:[#allocation2 + $0x15] sm:$0xff] }
 0x331   :  { %v4268_v42 = vld [vmem:[#allocation2 + $0xd] sm:$0xff]  ;;  %vm3991_vm13 = vcmp.gt.f32.partialorder %v3955_v36, 0.0  ;;  %v4027_v49 = vmul.f32 0.01, %v3955_v36  ;;  %v9561_v50 = vpop.f32.mrb[10].mxu0  ;;  %v4304_v51 = vmax.f32 %v4234_v40, %v4269_v46 }
 0x332   :  { %v4303_v48 = vmax.f32 %v4233_v39, %v4268_v42  ;;  %v4064_v53 = vsel %vm3992_vm12, %v3956_v29, %v4028_v43  ;;  %v3958_v0 = vadd.f32 %v9561_v50, %v12628_v63  ;;  %v3775_v1 = vpop.f32.mrb[11].mxu0 }
 0x333   :  { %v4166_v4 = vld [vmem:[#allocation2 + $0x19] sm:$0xff]  ;;  %4101 = vst.msk [vmem:[#allocation2 + $0x48] sm:$0xff] %vm4091_vm2, %v4064_v53  ;;  %v4063_v5 = vsel %vm3991_vm13, %v3955_v36, %v4027_v49  ;;  %v3957_v6 = vadd.f32 %v12628_v63, %v3775_v1  ;;  %v4339_v7 = vmax.f32 %v4199_v37, %v4304_v51  ;;  %v4236_v20 = vld [vmem:[#allocation2 + $0x24] sm:$0xff] }
 0x334   :  { %v4338_v3 = vmax.f32 %v4198_v44, %v4303_v48  ;;  %v4201_v18 = vmax.f32 %v4131_v2, %v4166_v4  ;;  %4100 = vst.msk [vmem:[#allocation2 + $0x40] sm:$0xff] %vm4091_vm2, %v4063_v5  ;;  %vm3994_vm14 = vcmp.gt.f32.partialorder %v3958_v0, 0.0  ;;  %v4271_v22 = vld [vmem:[#allocation2 + $0x25] sm:$0xff]  ;;  %v4030_v24 = vmul.f32 0.01, %v3958_v0 }
 0x335   :  { %vm3993_vm15 = vcmp.gt.f32.partialorder %v3957_v6, 0.0  ;;  %v4029_v26 = vmul.f32 0.01, %v3957_v6  ;;  %4374 = vst.msk [vmem:[#allocation3 + $0x8] sm:$0xff] %vm4091_vm2, %v4339_v7  ;;  %v4132_v30 = vld [vmem:[#allocation2 + $0x20] sm:$0xff]  ;;  %v4306_v38 = vmax.f32 %v4236_v20, %v4271_v22  ;;  %v9564_v41 = vpop.f32.mrb[12].mxu0 }
 0x336   :  { %4373 = vst.msk [vmem:[#allocation3] sm:$0xff] %vm4091_vm2, %v4338_v3  ;;  %v4167_v32 = vld [vmem:[#allocation2 + $0x21] sm:$0xff]  ;;  %v4066_v8 = vsel %vm3994_vm14, %v3958_v0, %v4030_v24  ;;  %v3960_v10 = vadd.f32 %v9564_v41, %v12628_v63  ;;  %v3785_v11 = vpop.f32.mrb[13].mxu0  ;;  %v4135_v29 = vld [vmem:[#allocation2 + $0x38] sm:$0xff] }
 0x337   :  { %v4134_v45 = vld [vmem:[#allocation2 + $0x30] sm:$0xff]  ;;  %v4065_v9 = vsel %vm3993_vm15, %v3957_v6, %v4029_v26  ;;  %v4341_v12 = vmax.f32 %v4201_v18, %v4306_v38  ;;  %4103 = vst.msk [vmem:[#allocation2 + $0x58] sm:$0xff] %vm4091_vm2, %v4066_v8  ;;  %v3959_v15 = vadd.f32 %v12628_v63, %v3785_v11  ;;  %v4202_v16 = vmax.f32 %v4132_v30, %v4167_v32 }
 0x338   :  { %v4237_v13 = vld [vmem:[#allocation2 + $0x2c] sm:$0xff]  ;;  %4102 = vst.msk [vmem:[#allocation2 + $0x50] sm:$0xff] %vm4091_vm2, %v4065_v9  ;;  %vm3996_vm0 = vcmp.gt.f32.partialorder %v3960_v10, 0.0  ;;  %v4032_v21 = vmul.f32 0.01, %v3960_v10 }
 0x339   :  { %v4272_v14 = vld [vmem:[#allocation2 + $0x2d] sm:$0xff]  ;;  %v9567_v23 = vpop.f32.mrb[14].mxu0  ;;  %4376 = vst.msk [vmem:[#allocation3 + $0x18] sm:$0xff] %vm4091_vm2, %v4341_v12  ;;  %vm3995_vm1 = vcmp.gt.f32.partialorder %v3959_v15, 0.0  ;;  %v4031_v25 = vmul.f32 0.01, %v3959_v15 }
 0x33a   :  { %v4169_v17 = vld [vmem:[#allocation2 + $0x31] sm:$0xff]  ;;  %v4307_v19 = vmax.f32 %v4237_v13, %v4272_v14  ;;  %v3962_v27 = vadd.f32 %v9567_v23, %v12628_v63  ;;  %v3795_v28 = vpop.f32.mrb[15].mxu0  ;;  %v4068_v34 = vsel %vm3996_vm0, %v3960_v10, %v4032_v21  ;;  %v4137_v2 = vld [vmem:[#allocation2 + $0x48] sm:$0xff] }
 0x33b   :  { %v4170_v33 = vld [vmem:[#allocation2 + $0x39] sm:$0xff]  ;;  %v3961_v35 = vadd.f32 %v12628_v63, %v3795_v28  ;;  %v4204_v36 = vmax.f32 %v4134_v45, %v4169_v17  ;;  %v4240_v40 = vld [vmem:[#allocation2 + $0x44] sm:$0xff]  ;;  %4105 = vst.msk [vmem:[#allocation2 + $0x68] sm:$0xff] %vm4091_vm2, %v4068_v34  ;;  %v4067_v43 = vsel %vm3995_vm1, %v3959_v15, %v4031_v25 }
 0x33c   :  { %v4342_v31 = vmax.f32 %v4202_v16, %v4307_v19  ;;  %v4205_v37 = vmax.f32 %v4135_v29, %v4170_v33  ;;  %v4239_v39 = vld [vmem:[#allocation2 + $0x3c] sm:$0xff]  ;;  %v4275_v44 = vld [vmem:[#allocation2 + $0x45] sm:$0xff]  ;;  %4104 = vst.msk [vmem:[#allocation2 + $0x60] sm:$0xff] %vm4091_vm2, %v4067_v43  ;;  %vm3998_vm5 = vcmp.gt.f32.partialorder %v3962_v27, 0.0  ;;  %v4034_v48 = vmul.f32 0.01, %v3962_v27 }
 0x33d   :  { %v4274_v42 = vld [vmem:[#allocation2 + $0x3d] sm:$0xff]  ;;  %vm3997_vm6 = vcmp.gt.f32.partialorder %v3961_v35, 0.0  ;;  %v9570_v49 = vpop.f32.mrb[16].mxu0  ;;  %v4310_v50 = vmax.f32 %v4240_v40, %v4275_v44  ;;  %v4033_v51 = vmul.f32 0.01, %v3961_v35 }
 0x33e   :  { %4377 = vst.msk [vmem:[#allocation3 + $0x20] sm:$0xff] %vm4091_vm2, %v4342_v31  ;;  %v4309_v46 = vmax.f32 %v4239_v39, %v4274_v42  ;;  %v3964_v53 = vadd.f32 %v9570_v49, %v12628_v63  ;;  %v3805_v0 = vpop.f32.mrb[17].mxu0  ;;  %v4433_v1 = vld [vmem:[#allocation3] ss:$2 sm:$0x1f]  ;;  %v4070_v5 = vsel %vm3998_vm5, %v3962_v27, %v4034_v48 }
 0x33f   :  { %v4172_v4 = vld [vmem:[#allocation2 + $0x49] sm:$0xff]  ;;  %v3963_v6 = vadd.f32 %v12628_v63, %v3805_v0  ;;  %4435 = vst.msk [vmem:[#allocation4 + $0x14] sm:$0x1f] %vm4434_vm4, %v4433_v1  ;;  %v4345_v7 = vmax.f32 %v4205_v37, %v4310_v50  ;;  %v4242_v20 = vld [vmem:[#allocation2 + $0x54] sm:$0xff]  ;;  %v4069_v22 = vsel %vm3997_vm6, %v3961_v35, %v4033_v51 }
 0x340   :  { %v4344_v3 = vmax.f32 %v4204_v36, %v4309_v46  ;;  %v4207_v18 = vmax.f32 %v4137_v2, %v4172_v4  ;;  %4107 = vst.msk [vmem:[#allocation2 + $0x78] sm:$0xff] %vm4091_vm2, %v4070_v5  ;;  %vm4000_vm7 = vcmp.gt.f32.partialorder %v3964_v53, 0.0  ;;  %v4277_v24 = vld [vmem:[#allocation2 + $0x55] sm:$0xff]  ;;  %4106 = vst.msk [vmem:[#allocation2 + $0x70] sm:$0xff] %vm4091_vm2, %v4069_v22  ;;  %v4036_v26 = vmul.f32 0.01, %v3964_v53 }
 0x341   :  { %vm3999_vm8 = vcmp.gt.f32.partialorder %v3963_v6, 0.0  ;;  %v9573_v30 = vpop.f32.mrb[18].mxu0  ;;  %4380 = vst.msk [vmem:[#allocation3 + $0x38] sm:$0xff] %vm4091_vm2, %v4345_v7  ;;  %v4312_v32 = vmax.f32 %v4242_v20, %v4277_v24  ;;  %v4035_v38 = vmul.f32 0.01, %v3963_v6  ;;  %v4138_v8 = vld [vmem:[#allocation2 + $0x50] sm:$0xff] }
 0x342   :  { %4379 = vst.msk [vmem:[#allocation3 + $0x30] sm:$0xff] %vm4091_vm2, %v4344_v3  ;;  %v3966_v41 = vadd.f32 %v9573_v30, %v12628_v63  ;;  %v3815_v45 = vpop.f32.mrb[19].mxu0  ;;  %v4173_v9 = vld [vmem:[#allocation2 + $0x51] sm:$0xff]  ;;  %v4072_v10 = vsel %vm4000_vm7, %v3964_v53, %v4036_v26  ;;  %v4141_v31 = vld [vmem:[#allocation2 + $0x68] sm:$0xff] }
 0x343   :  { %v3965_v11 = vadd.f32 %v12628_v63, %v3815_v45  ;;  %v4347_v12 = vmax.f32 %v4207_v18, %v4312_v32  ;;  %v4140_v13 = vld [vmem:[#allocation2 + $0x60] sm:$0xff]  ;;  %4109 = vst.msk [vmem:[#allocation2 + $0x88] sm:$0xff] %vm4091_vm2, %v4072_v10  ;;  %v4071_v15 = vsel %vm3999_vm8, %v3963_v6, %v4035_v38  ;;  %v4208_v21 = vmax.f32 %v4138_v8, %v4173_v9 }
 0x344   :  { %v4175_v14 = vld [vmem:[#allocation2 + $0x61] sm:$0xff]  ;;  %vm4002_vm9 = vcmp.gt.f32.partialorder %v3966_v41, 0.0  ;;  %4108 = vst.msk [vmem:[#allocation2 + $0x80] sm:$0xff] %vm4091_vm2, %v4071_v15  ;;  %v4038_v19 = vmul.f32 0.01, %v3966_v41 }
 0x345   :  { %v4243_v16 = vld [vmem:[#allocation2 + $0x5c] sm:$0xff]  ;;  %vm4001_vm10 = vcmp.gt.f32.partialorder %v3965_v11, 0.0  ;;  %4382 = vst.msk [vmem:[#allocation3 + $0x48] sm:$0xff] %vm4091_vm2, %v4347_v12  ;;  %v4037_v25 = vmul.f32 0.01, %v3965_v11  ;;  %v9576_v29 = vpop.f32.mrb[20].mxu0  ;;  %v4210_v43 = vmax.f32 %v4140_v13, %v4175_v14 }
 0x346   :  { %v4278_v17 = vld [vmem:[#allocation2 + $0x5d] sm:$0xff]  ;;  %v4487_v27 = vld [vmem:[#allocation4 + $0x11] sm:$0xff]  ;;  %v4074_v33 = vsel %vm4002_vm9, %v3966_v41, %v4038_v19  ;;  %v3968_v34 = vadd.f32 %v9576_v29, %v12628_v63  ;;  %v3825_v35 = vpop.f32.mrb[21].mxu0 }
 0x347   :  { %v4313_v23 = vmax.f32 %v4243_v16, %v4278_v17  ;;  %v6636_v28 = vld [vmem:[#allocation4 + $0x14] sm:$0xff]  ;;  %9607 = vmatmul.mubr.msk.f32.gmra.mrb[14].mxu1 %vm4091_vm2, %v4487_v27  ;;  %v4437_v36 = vld [vmem:[#allocation3 + $0x18] ss:$2 sm:$0x1f]  ;;  %4111 = vst.msk [vmem:[#allocation2 + $0x98] sm:$0xff] %vm4091_vm2, %v4074_v33  ;;  %v4073_v40 = vsel %vm4001_vm10, %v3965_v11, %v4037_v25  ;;  %v3967_v42 = vadd.f32 %v12628_v63, %v3825_v35 }
 0x348   :  { %10121 = vmatmul.mubr.msk.f32.vlgmr.msra.gmra.mrb[36].mxu0 %vm4091_vm2, %v6636_v28  ;;  %v4176_v39 = vld [vmem:[#allocation2 + $0x69] sm:$0xff]  ;;  %9609 = vmatprep.mubr.msk.f32.mxu1 %vm10797_vm3, %v10796_v47  ;;  %4438 = vst.msk [vmem:[#allocation4 + $0x1d] sm:$0x1f] %vm4434_vm4, %v4437_v36  ;;  %v4246_v48 = vld [vmem:[#allocation2 + $0x74] sm:$0xff]  ;;  %vm4004_vm11 = vcmp.gt.f32.partialorder %v3968_v34, 0.0 }
 0x349   :  { %v4348_v37 = vmax.f32 %v4208_v21, %v4313_v23  ;;  %10123 = vmatprep.mubr.msk.f32.mxu0 %vm10797_vm3, %v10796_v47  ;;  %v4211_v44 = vmax.f32 %v4141_v31, %v4176_v39  ;;  %v4245_v46 = vld [vmem:[#allocation2 + $0x6c] sm:$0xff]  ;;  %4110 = vst.msk [vmem:[#allocation2 + $0x90] sm:$0xff] %vm4091_vm2, %v4073_v40  ;;  %v9579_v50 = vpop.f32.mrb[22].mxu0  ;;  %v4281_v51 = vld [vmem:[#allocation2 + $0x75] sm:$0xff]  ;;  %v4040_v0 = vmul.f32 0.01, %v3968_v34 }
 0x34a   :  { %v4280_v49 = vld [vmem:[#allocation2 + $0x6d] sm:$0xff]  ;;  %vm4003_vm12 = vcmp.gt.f32.partialorder %v3967_v42, 0.0  ;;  %v4039_v1 = vmul.f32 0.01, %v3967_v42  ;;  %v4316_v2 = vmax.f32 %v4246_v48, %v4281_v51  ;;  %v3970_v3 = vadd.f32 %v9579_v50, %v12628_v63  ;;  %v3835_v4 = vpop.f32.mrb[23].mxu0 }
 0x34b   :  { %4383 = vst.msk [vmem:[#allocation3 + $0x50] sm:$0xff] %vm4091_vm2, %v4348_v37  ;;  %v4315_v53 = vmax.f32 %v4245_v46, %v4280_v49  ;;  %v4440_v5 = vld [vmem:[#allocation3 + $0x30] ss:$2 sm:$0x1f]  ;;  %v4076_v7 = vsel %vm4004_vm11, %v3968_v34, %v4040_v0  ;;  %v3969_v20 = vadd.f32 %v12628_v63, %v3835_v4 }
 0x34c   :  { %v4075_v18 = vsel %vm4003_vm12, %v3967_v42, %v4039_v1  ;;  %4441 = vst.msk [vmem:[#allocation4 + $0x26] sm:$0x1f] %vm4434_vm4, %v4440_v5  ;;  %v4351_v22 = vmax.f32 %v4211_v44, %v4316_v2  ;;  %vm4006_vm13 = vcmp.gt.f32.partialorder %v3970_v3, 0.0  ;;  %v4042_v26 = vmul.f32 0.01, %v3970_v3 }
 0x34d   :  { %v4350_v6 = vmax.f32 %v4210_v43, %v4315_v53  ;;  %4113 = vst.msk [vmem:[#allocation2 + $0xa8] sm:$0xff] %vm4091_vm2, %v4076_v7  ;;  %4112 = vst.msk [vmem:[#allocation2 + $0xa0] sm:$0xff] %vm4091_vm2, %v4075_v18  ;;  %v9582_v24 = vpop.f32.mrb[24].mxu0  ;;  %vm4005_vm14 = vcmp.gt.f32.partialorder %v3969_v20, 0.0  ;;  %v4041_v30 = vmul.f32 0.01, %v3969_v20 }
 0x34e   :  { %4386 = vst.msk [vmem:[#allocation3 + $0x68] sm:$0xff] %vm4091_vm2, %v4351_v22  ;;  %v3972_v41 = vadd.f32 %v9582_v24, %v12628_v63  ;;  %v3845_v45 = vpop.f32.mrb[25].mxu0  ;;  %v4078_v8 = vsel %vm4006_vm13, %v3970_v3, %v4042_v26  ;;  %v4147_v25 = vld [vmem:[#allocation2 + $0x98] sm:$0xff] }
 0x34f   :  { %4385 = vst.msk [vmem:[#allocation3 + $0x60] sm:$0xff] %vm4091_vm2, %v4350_v6  ;;  %v4488_v32 = vld [vmem:[#allocation4 + $0x19] sm:$0xff]  ;;  %v4077_v9 = vsel %vm4005_vm14, %v3969_v20, %v4041_v30  ;;  %4115 = vst.msk [vmem:[#allocation2 + $0xb8] sm:$0xff] %vm4091_vm2, %v4078_v8  ;;  %v3971_v14 = vadd.f32 %v12628_v63, %v3845_v45  ;;  %vm7004_vm14 = vcmask 130048  }
 0x350   :  { %v6637_v38 = vld [vmem:[#allocation4 + $0x1c] sm:$0xff]  ;;  %9610 = vmatmul.mubr.msk.f32.gmra.mrb[16].mxu1 %vm4091_vm2, %v4488_v32  ;;  %4114 = vst.msk [vmem:[#allocation2 + $0xb0] sm:$0xff] %vm4091_vm2, %v4077_v9  ;;  %vm4008_vm15 = vcmp.gt.f32.partialorder %v3972_v41, 0.0  ;;  %v4044_v13 = vmul.f32 0.01, %v3972_v41 }
 0x351   :  { %10124 = vmatmul.mubr.msk.f32.gmra.mrb[38].mxu0 %vm4091_vm2, %v6637_v38  ;;  %9612 = vmatprep.mubr.msk.f32.mxu1 %vm10797_vm3, %v10796_v47  ;;  %v9585_v10 = vpop.f32.mrb[26].mxu0  ;;  %v4146_v11 = vld [vmem:[#allocation2 + $0x90] sm:$0xff]  ;;  %vm4007_vm0 = vcmp.gt.f32.partialorder %v3971_v14, 0.0  ;;  %v4043_v29 = vmul.f32 0.01, %v3971_v14 }
 0x352   :  { %10126 = vmatprep.mubr.msk.f32.mxu0 %vm10797_vm3, %v10796_v47  ;;  %v4181_v12 = vld [vmem:[#allocation2 + $0x91] sm:$0xff]  ;;  %v10471_v15 = vadd.f32 %v9585_v10, %v12601_v52  ;;  %v3855_v16 = vpop.f32.mrb[27].mxu0  ;;  %v4443_v23 = vld [vmem:[#allocation3 + $0x48] ss:$2 sm:$0x1f]  ;;  %v4080_v28 = vsel %vm4008_vm15, %v3972_v41, %v4044_v13 }
 0x353   :  { %v4489_v17 = vld [vmem:[#allocation4 + $0x21] sm:$0xff]  ;;  %v10472_v21 = vadd.f32 %v3855_v16, %v12606_v54  ;;  %4444 = vst.msk [vmem:[#allocation4 + $0x2f] sm:$0x1f] %vm4434_vm4, %v4443_v23  ;;  %v4216_v36 = vmax.f32 %v4146_v11, %v4181_v12  ;;  %v4079_v40 = vsel %vm4007_vm0, %v3971_v14, %v4043_v29 }
 0x354   :  { %v6638_v19 = vld [vmem:[#allocation4 + $0x24] sm:$0xff]  ;;  %9613 = vmatmul.mubr.msk.f32.gmra.mrb[18].mxu1 %vm4091_vm2, %v4489_v17  ;;  %v4252_v33 = vld [vmem:[#allocation2 + $0xa4] sm:$0xff]  ;;  %4117 = vst.msk [vmem:[#allocation2 + $0xc8] sm:$0xff] %vm4091_vm2, %v4080_v28  ;;  %v3974_v54 = vadd.f32 %v10471_v15, %v12628_v63  ;;  %4116 = vst.msk [vmem:[#allocation2 + $0xc0] sm:$0xff] %vm4091_vm2, %v4079_v40 }
 0x355   :  { %v4182_v27 = vld [vmem:[#allocation2 + $0x99] sm:$0xff]  ;;  %10127 = vmatmul.mubr.msk.f32.gmra.mrb[40].mxu0 %vm4091_vm2, %v6638_v19  ;;  %v3973_v34 = vadd.f32 %v10472_v21, %v12628_v63  ;;  %v9588_v35 = vpop.f32.mrb[28].mxu0  ;;  %9615 = vmatprep.mubr.msk.f32.mxu1 %vm10797_vm3, %v10796_v47  ;;  %v4287_v39 = vld [vmem:[#allocation2 + $0xa5] sm:$0xff] }
 0x356   :  { %v4217_v31 = vmax.f32 %v4147_v25, %v4182_v27  ;;  %v4251_v52 = vld [vmem:[#allocation2 + $0x9c] sm:$0xff]  ;;  %v10473_v42 = vadd.f32 %v9588_v35, %v12609_v55  ;;  %v3865_v43 = vpop.f32.mrb[29].mxu0  ;;  %10129 = vmatprep.mubr.msk.f32.mxu0 %vm10797_vm3, %v10796_v47  ;;  %v4322_v48 = vmax.f32 %v4252_v33, %v4287_v39  ;;  %vm4010_vm1 = vcmp.gt.f32.partialorder %v3974_v54, 0.0  ;;  %v4149_v50 = vld [vmem:[#allocation2 + $0xa8] sm:$0xff] }
 0x357   :  { %v4286_v37 = vld [vmem:[#allocation2 + $0x9d] sm:$0xff]  ;;  %v4046_v49 = vmul.f32 0.01, %v3974_v54  ;;  %v4184_v51 = vld [vmem:[#allocation2 + $0xa9] sm:$0xff]  ;;  %vm4009_vm5 = vcmp.gt.f32.partialorder %v3973_v34, 0.0  ;;  %v10474_v55 = vadd.f32 %v3865_v43, %v12611_v56  ;;  %v4254_v4 = vld [vmem:[#allocation2 + $0xb4] sm:$0xff] }
 0x358   :  { %v4446_v44 = vld [vmem:[#allocation3 + $0x60] ss:$2 sm:$0x1f]  ;;  %v4321_v46 = vmax.f32 %v4251_v52, %v4286_v37  ;;  %v4045_v53 = vmul.f32 0.01, %v3973_v34  ;;  %v3976_v0 = vadd.f32 %v10473_v42, %v12628_v63  ;;  %v4357_v2 = vmax.f32 %v4217_v31, %v4322_v48  ;;  %v4289_v7 = vld [vmem:[#allocation2 + $0xb5] sm:$0xff] }
 0x359   :  { %4447 = vst.msk [vmem:[#allocation4 + $0x38] sm:$0x1f] %vm4434_vm4, %v4446_v44  ;;  %v4219_v3 = vmax.f32 %v4149_v50, %v4184_v51  ;;  %v4082_v5 = vsel %vm4010_vm1, %v3974_v54, %v4046_v49  ;;  %v9591_v6 = vpop.f32.mrb[30].mxu0  ;;  %v4324_v24 = vmax.f32 %v4254_v4, %v4289_v7  ;;  %v3975_v56 = vadd.f32 %v10474_v55, %v12628_v63  ;;  %v4150_v38 = vld [vmem:[#allocation2 + $0xb0] sm:$0xff] }
 0x35a   :  { %v4356_v1 = vmax.f32 %v4216_v36, %v4321_v46  ;;  %4119 = vst.msk [vmem:[#allocation2 + $0xd8] sm:$0xff] %vm4091_vm2, %v4082_v5  ;;  %v4081_v18 = vsel %vm4009_vm5, %v3973_v34, %v4045_v53  ;;  %vm4012_vm6 = vcmp.gt.f32.partialorder %v3976_v0, 0.0  ;;  %v4048_v20 = vmul.f32 0.01, %v3976_v0  ;;  %v3875_v22 = vpop.f32.mrb[31].mxu0  ;;  %4392 = vst.msk [vmem:[#allocation3 + $0x98] sm:$0xff] %vm4091_vm2, %v4357_v2 }
 0x35b   :  { %4118 = vst.msk [vmem:[#allocation2 + $0xd0] sm:$0xff] %vm4091_vm2, %v4081_v18  ;;  %v12732_v26 = vld [vmem:[#allocation4 + $0x29] sm:$0xff]  ;;  %v10475_v32 = vadd.f32 %v9591_v6, %v12613_v57  ;;  %v4185_v41 = vld [vmem:[#allocation2 + $0xb1] sm:$0xff]  ;;  %v10476_v8 = vadd.f32 %v3875_v22, %v12615_v58  ;;  %v4359_v9 = vmax.f32 %v4219_v3, %v4324_v24  ;;  %vm4011_vm7 = vcmp.gt.f32.partialorder %v3975_v56, 0.0  ;;  %v12775_v5 = vld [vmem:[#allocation4 + $0x41] sm:$0xff] }
 0x35c   :  { %4391 = vst.msk [vmem:[#allocation3 + $0x90] sm:$0xff] %vm4091_vm2, %v4356_v1  ;;  %v6639_v30 = vld [vmem:[#allocation4 + $0x2c] sm:$0xff]  ;;  %v4084_v45 = vsel %vm4012_vm6, %v3976_v0, %v4048_v20  ;;  %9616 = vmatmul.mubr.msk.f32.gmra.mrb[20].mxu1 %vm4091_vm2, %v12732_v26  ;;  %v4047_v10 = vmul.f32 0.01, %v3975_v56  ;;  %v4220_v16 = vmax.f32 %v4150_v38, %v4185_v41  ;;  %v4255_v17 = vld [vmem:[#allocation2 + $0xbc] sm:$0xff] }
 0x35d   :  { %10130 = vmatmul.mubr.msk.f32.gmra.mrb[42].mxu0 %vm4091_vm2, %v6639_v30  ;;  %4121 = vst.msk [vmem:[#allocation2 + $0xe8] sm:$0xff] %vm4091_vm2, %v4084_v45  ;;  %9618 = vmatprep.mubr.msk.f32.mxu1 %vm10797_vm3, %v10796_v47  ;;  %v9594_v57 = vpop.f32.mrb[32].mxu0  ;;  %v4152_v11 = vld [vmem:[#allocation2 + $0xc0] sm:$0xff]  ;;  %v3978_v13 = vadd.f32 %v10475_v32, %v12628_v63  ;;  %v3977_v14 = vadd.f32 %v10476_v8, %v12628_v63  ;;  %4394 = vst.msk [vmem:[#allocation3 + $0xa8] sm:$0xff] %vm4091_vm2, %v4359_v9  ;;  %v4153_v54 = vld [vmem:[#allocation2 + $0xc8] sm:$0xff] }
 0x35e   :  { %10132 = vmatprep.mubr.msk.f32.mxu0 %vm10797_vm3, %v10796_v47  ;;  %v4187_v12 = vld [vmem:[#allocation2 + $0xc1] sm:$0xff]  ;;  %v10477_v58 = vadd.f32 %v9594_v57, %v12617_v59  ;;  %v3885_v15 = vpop.f32.mrb[33].mxu0  ;;  %v4083_v21 = vsel %vm4011_vm7, %v3975_v56, %v4047_v10 }
 0x35f   :  { %v4290_v19 = vld [vmem:[#allocation2 + $0xbd] sm:$0xff]  ;;  %v10478_v23 = vadd.f32 %v3885_v15, %v12619_v60  ;;  %4120 = vst.msk [vmem:[#allocation2 + $0xe0] sm:$0xff] %vm4091_vm2, %v4083_v21  ;;  %vm4014_vm8 = vcmp.gt.f32.partialorder %v3978_v13, 0.0  ;;  %v4050_v27 = vmul.f32 0.01, %v3978_v13  ;;  %vm4013_vm9 = vcmp.gt.f32.partialorder %v3977_v14, 0.0 }
 0x360   :  { %v4325_v25 = vmax.f32 %v4255_v17, %v4290_v19  ;;  %v12750_v28 = vld [vmem:[#allocation4 + $0x31] sm:$0xff]  ;;  %v4049_v29 = vmul.f32 0.01, %v3977_v14  ;;  %v3980_v31 = vadd.f32 %v10477_v58, %v12628_v63  ;;  %v4222_v39 = vmax.f32 %v4152_v11, %v4187_v12  ;;  %v12766_v50 = vld [vmem:[#allocation4 + $0x39] sm:$0xff]  ;;  %v6642_v22 = vld [vmem:[#allocation4 + $0x44] sm:$0xff] }
 0x361   :  { %9619 = vmatmul.mubr.msk.f32.gmra.mrb[22].mxu1 %vm4091_vm2, %v12750_v28  ;;  %v6640_v59 = vld [vmem:[#allocation4 + $0x34] sm:$0xff]  ;;  %v3979_v52 = vadd.f32 %v10478_v23, %v12628_v63  ;;  %v9597_v33 = vpop.f32.mrb[34].mxu0  ;;  %v4086_v35 = vsel %vm4014_vm8, %v3978_v13, %v4050_v27  ;;  %v6641_v0 = vld [vmem:[#allocation4 + $0x3c] sm:$0xff]  ;;  %v6643_v10 = vld [vmem:[#allocation4 + $0x4c] sm:$0xff] }
 0x362   :  { %v4360_v60 = vmax.f32 %v4220_v16, %v4325_v25  ;;  %v4188_v34 = vld [vmem:[#allocation2 + $0xc9] sm:$0xff]  ;;  %10133 = vmatmul.mubr.msk.f32.gmra.mrb[44].mxu0 %vm4091_vm2, %v6640_v59  ;;  %9621 = vmatprep.mubr.msk.f32.mxu1 %vm10797_vm3, %v10796_v47  ;;  %v10479_v36 = vadd.f32 %v9597_v33, %v12621_v61  ;;  %v3895_v37 = vpop.f32.mrb[35].mxu0  ;;  %v4258_v43 = vld [vmem:[#allocation2 + $0xd4] sm:$0xff]  ;;  %4123 = vst.msk [vmem:[#allocation2 + $0xf8] sm:$0xff] %vm4091_vm2, %v4086_v35  ;;  %vm4016_vm10 = vcmp.gt.f32.partialorder %v3980_v31, 0.0 }
 0x363   :  { %v4223_v40 = vmax.f32 %v4153_v54, %v4188_v34  ;;  %v4257_v42 = vld [vmem:[#allocation2 + $0xcc] sm:$0xff]  ;;  %v4085_v46 = vsel %vm4013_vm9, %v3977_v14, %v4049_v29  ;;  %10135 = vmatprep.mubr.msk.f32.mxu0 %vm10797_vm3, %v10796_v47  ;;  %v4293_v48 = vld [vmem:[#allocation2 + $0xd5] sm:$0xff]  ;;  %v4052_v61 = vmul.f32 0.01, %v3980_v31  ;;  %vm4015_vm11 = vcmp.gt.f32.partialorder %v3979_v52, 0.0 }
 0x364   :  { %v4292_v44 = vld [vmem:[#allocation2 + $0xcd] sm:$0xff]  ;;  %4395 = vst.msk [vmem:[#allocation3 + $0xb0] sm:$0xff] %vm4091_vm2, %v4360_v60  ;;  %4122 = vst.msk [vmem:[#allocation2 + $0xf0] sm:$0xff] %vm4091_vm2, %v4085_v46  ;;  %v4328_v51 = vmax.f32 %v4258_v43, %v4293_v48  ;;  %v4051_v53 = vmul.f32 0.01, %v3979_v52  ;;  %v3982_v55 = vadd.f32 %v10479_v36, %v12628_v63  ;;  %v10480_v1 = vadd.f32 %v3895_v37, %v12623_v62  ;;  %v4155_v6 = vld [vmem:[#allocation2 + $0xd8] sm:$0xff] }
 0x365   :  { %v4327_v49 = vmax.f32 %v4257_v42, %v4292_v44  ;;  %9622 = vmatmul.mubr.msk.f32.gmra.mrb[24].mxu1 %vm4091_vm2, %v12766_v50  ;;  %v4449_v2 = vld [vmem:[#allocation3 + $0x90] ss:$2 sm:$0x1f]  ;;  %v4088_v4 = vsel %vm4016_vm10, %v3980_v31, %v4052_v61  ;;  %vm7162_vm9 = vcmask 122880  }
 0x366   :  { %10136 = vmatmul.mubr.msk.f32.gmra.mrb[46].mxu0 %vm4091_vm2, %v6641_v0  ;;  %9624 = vmatprep.mubr.msk.f32.mxu1 %vm10797_vm3, %v10796_v47  ;;  %4450 = vst.msk [vmem:[#allocation4 + $0x65] sm:$0x1f] %vm4434_vm4, %v4449_v2  ;;  %v4363_v7 = vmax.f32 %v4223_v40, %v4328_v51  ;;  %v4190_v18 = vld [vmem:[#allocation2 + $0xd9] sm:$0xff]  ;;  %v4087_v20 = vsel %vm4015_vm11, %v3979_v52, %v4051_v53  ;;  %vm4018_vm12 = vcmp.gt.f32.partialorder %v3982_v55, 0.0  ;;  %v4054_v62 = vmul.f32 0.01, %v3982_v55 }
 0x367   :  { %v4362_v3 = vmax.f32 %v4222_v39, %v4327_v49  ;;  %4125 = vst.msk [vmem:[#allocation2 + $0x108] sm:$0xff] %vm4091_vm2, %v4088_v4  ;;  %10138 = vmatprep.mubr.msk.f32.mxu0 %vm10797_vm3, %v10796_v47  ;;  %v4225_v24 = vmax.f32 %v4155_v6, %v4190_v18  ;;  %v4260_v56 = vld [vmem:[#allocation2 + $0xe4] sm:$0xff]  ;;  %4124 = vst.msk [vmem:[#allocation2 + $0x100] sm:$0xff] %vm4091_vm2, %v4087_v20  ;;  %v3981_v30 = vadd.f32 %v10480_v1, %v12628_v63  ;;  %v6644_v27 = vld [vmem:[#allocation4 + $0x54] sm:$0xff] }
 0x368   :  { %4398 = vst.msk [vmem:[#allocation3 + $0xc8] sm:$0xff] %vm4091_vm2, %v4363_v7  ;;  %v4295_v32 = vld [vmem:[#allocation2 + $0xe5] sm:$0xff]  ;;  %v4090_v38 = vsel %vm4018_vm12, %v3982_v55, %v4054_v62  ;;  %v12814_v35 = vld [vmem:[#allocation4 + $0x59] sm:$0xff]  ;;  %v12894_v7 = vpop.f32.mrb[10].mxu1  ;;  %v4505_v18 = vld [vmem:[#allocation4 + $0xa1] sm:$0x3] }
 0x369   :  { %4397 = vst.msk [vmem:[#allocation3 + $0xc0] sm:$0xff] %vm4091_vm2, %v4362_v3  ;;  %9625 = vmatmul.mubr.msk.f32.gmra.mrb[26].mxu1 %vm4091_vm2, %v12775_v5  ;;  %v4156_v41 = vld [vmem:[#allocation2 + $0xe0] sm:$0xff]  ;;  %v4330_v8 = vmax.f32 %v4260_v56, %v4295_v32  ;;  %4127 = vst.msk [vmem:[#allocation2 + $0x118] sm:$0xff] %vm4091_vm2, %v4090_v38  ;;  %vm4017_vm13 = vcmp.gt.f32.partialorder %v3981_v30, 0.0  ;;  %v4053_v9 = vmul.f32 0.01, %v3981_v30 }
 0x36a   :  { %v4191_v45 = vld [vmem:[#allocation2 + $0xe1] sm:$0xff]  ;;  %10139 = vmatmul.mubr.msk.f32.gmra.mrb[48].mxu0 %vm4091_vm2, %v6642_v22  ;;  %9627 = vmatprep.mubr.msk.f32.mxu1 %vm10797_vm3, %v10796_v47  ;;  %v12799_v15 = vld [vmem:[#allocation4 + $0x51] sm:$0xff]  ;;  %v4159_v21 = vld [vmem:[#allocation2 + $0xf8] sm:$0xff]  ;;  %v9602_v20 = vpop.f32.mrb[11].mxu1 }
 0x36b   :  { %v12792_v63 = vld [vmem:[#allocation4 + $0x49] sm:$0xff]  ;;  %10141 = vmatprep.mubr.msk.f32.mxu0 %vm10797_vm3, %v10796_v47  ;;  %v4365_v57 = vmax.f32 %v4225_v24, %v4330_v8  ;;  %v4261_v11 = vld [vmem:[#allocation2 + $0xec] sm:$0xff]  ;;  %v4089_v13 = vsel %vm4017_vm13, %v3981_v30, %v4053_v9  ;;  %v4226_v14 = vmax.f32 %v4156_v41, %v4191_v45  ;;  %v6645_v36 = vld [vmem:[#allocation4 + $0x5c] sm:$0xff]  ;;  %v12899_v62 = vpop.f32.mrb[12].mxu1 }
 0x36c   :  { %v4296_v12 = vld [vmem:[#allocation2 + $0xed] sm:$0xff]  ;;  %4126 = vst.msk [vmem:[#allocation2 + $0x110] sm:$0xff] %vm4091_vm2, %v4089_v13  ;;  %v4463_v22 = vld [vmem:[#allocation4] sm:$0xff]  ;;  %v9605_v24 = vpop.f32.mrb[13].mxu1  ;;  %v4464_v30 = vld [vmem:[#allocation4 + $0x8] sm:$0xff] }
 0x36d   :  { %v4331_v58 = vmax.f32 %v4261_v11, %v4296_v12  ;;  %9628 = vmatmul.mubr.msk.f32.gmra.mrb[28].mxu1 %vm4091_vm2, %v12792_v63  ;;  %4400 = vst.msk [vmem:[#allocation3 + $0xd8] sm:$0xff] %vm4091_vm2, %v4365_v57  ;;  %v4158_v16 = vld [vmem:[#allocation2 + $0xf0] sm:$0xff]  ;;  %v12828_v42 = vld [vmem:[#allocation4 + $0x61] sm:$0xff]  ;;  %v4465_v32 = vld [vmem:[#allocation4 + $0x10] sm:$0xff] }
 0x36e   :  { %v4193_v17 = vld [vmem:[#allocation2 + $0xf1] sm:$0xff]  ;;  %10142 = vmatmul.mubr.msk.f32.gmra.mrb[50].mxu0 %vm4091_vm2, %v6643_v10  ;;  %9630 = vmatprep.mubr.msk.f32.mxu1 %vm10797_vm3, %v10796_v47  ;;  %v4452_v19 = vld [vmem:[#allocation3 + $0xa8] ss:$2 sm:$0x1f]  ;;  %v4194_v25 = vld [vmem:[#allocation2 + $0xf9] sm:$0xff] }
 0x36f   :  { %v4366_v23 = vmax.f32 %v4226_v14, %v4331_v58  ;;  %10144 = vmatprep.mubr.msk.f32.mxu0 %vm10797_vm3, %v10796_v47  ;;  %4453 = vst.msk [vmem:[#allocation4 + $0x6e] sm:$0x1f] %vm4434_vm4, %v4452_v19  ;;  %v4229_v29 = vmax.f32 %v4159_v21, %v4194_v25  ;;  %v4263_v59 = vld [vmem:[#allocation2 + $0xfc] sm:$0xff]  ;;  %v4264_v31 = vld [vmem:[#allocation2 + $0x104] sm:$0xff]  ;;  %v4228_v33 = vmax.f32 %v4158_v16, %v4193_v17  ;;  %v12890_v6 = vld [vmem:[#allocation4 + $0x99] sm:$0xff] }
 0x370   :  { %v4298_v52 = vld [vmem:[#allocation2 + $0xfd] sm:$0xff]  ;;  %v4299_v54 = vld [vmem:[#allocation2 + $0x105] sm:$0xff]  ;;  %v8056_v56 = vld [vmem:[%s14257_s3 + $0x10] sm:$0xff] }
 0x371   :  { %4401 = vst.msk [vmem:[#allocation3 + $0xe0] sm:$0xff] %vm4091_vm2, %v4366_v23  ;;  %v4333_v60 = vmax.f32 %v4263_v59, %v4298_v52  ;;  %9631 = vmatmul.mubr.msk.f32.gmra.mrb[30].mxu1 %vm4091_vm2, %v12799_v15  ;;  %v4334_v34 = vmax.f32 %v4264_v31, %v4299_v54  ;;  %v4455_v37 = vld [vmem:[#allocation3 + $0xc0] ss:$2 sm:$0x1f]  ;;  %v12882_v4 = vld [vmem:[#allocation4 + $0x91] sm:$0xff]  ;;  %v4467_v41 = vld [vmem:[#allocation4 + $0x20] sm:$0xff] }
 0x372   :  { %10145 = vmatmul.mubr.msk.f32.gmra.mrb[52].mxu0 %vm4091_vm2, %v6644_v27  ;;  %9633 = vmatprep.mubr.msk.f32.mxu1 %vm10797_vm3, %v10796_v47  ;;  %4456 = vst.msk [vmem:[#allocation4 + $0x77] sm:$0x1f] %vm4434_vm4, %v4455_v37  ;;  %v6646_v44 = vld [vmem:[#allocation4 + $0x64] sm:$0xff]  ;;  %v4466_v38 = vld [vmem:[#allocation4 + $0x18] sm:$0xff]  ;;  %v4469_v8 = vld [vmem:[#allocation4 + $0x30] sm:$0xff] }
 0x373   :  { %v4368_v39 = vmax.f32 %v4228_v33, %v4333_v60  ;;  %10147 = vmatprep.mubr.msk.f32.mxu0 %vm10797_vm3, %v10796_v47  ;;  %v4369_v40 = vmax.f32 %v4229_v29, %v4334_v34  ;;  %v4468_v45 = vld [vmem:[#allocation4 + $0x28] sm:$0xff]  ;;  %v4470_v9 = vld [vmem:[#allocation4 + $0x38] sm:$0xff]  ;;  %v4471_v10 = vld [vmem:[#allocation4 + $0x40] sm:$0xff] }
 0x374   :  { %v4472_v57 = vld [vmem:[#allocation4 + $0x48] sm:$0xff]  ;;  %v4473_v11 = vld [vmem:[#allocation4 + $0x50] sm:$0xff]  ;;  %v4474_v12 = vld [vmem:[#allocation4 + $0x58] sm:$0xff] }
 0x375   :  { %4403 = vst.msk [vmem:[#allocation3 + $0xf0] sm:$0xff] %vm4091_vm2, %v4368_v39  ;;  %9634 = vmatmul.mubr.msk.f32.gmra.mrb[32].mxu1 %vm4091_vm2, %v12814_v35  ;;  %4404 = vst.msk [vmem:[#allocation3 + $0xf8] sm:$0xff] %vm4091_vm2, %v4369_v40  ;;  %v4475_v13 = vld [vmem:[#allocation4 + $0x60] sm:$0xff]  ;;  %v4481_v21 = vld [vmem:[#allocation4 + $0x90] sm:$0xff] }
 0x376   :  { %10148 = vmatmul.mubr.msk.f32.gmra.mrb[54].mxu0 %vm4091_vm2, %v6645_v36  ;;  %9636 = vmatprep.mubr.msk.f32.mxu1 %vm10797_vm3, %v10796_v47  ;;  %v12838_v46 = vld [vmem:[#allocation4 + $0x69] sm:$0xff]  ;;  %v4482_v23 = vld [vmem:[#allocation4 + $0x98] sm:$0xff]  ;;  %v4483_v25 = vld [vmem:[#allocation4 + $0xa0] sm:$0x3] }
 0x377   :  { %10150 = vmatprep.mubr.msk.f32.mxu0 %vm10797_vm3, %v10796_v47  ;;  %v6647_v48 = vld [vmem:[#allocation4 + $0x6c] sm:$0xff]  ;;  %v4974_v27 = vld [vmem:[#allocation4 + $0x2] sm:$0xff]  ;;  %v12989_v52 = vld [vmem:[#allocation4 + $0x1a] sm:$0xff] }
 0x378   :  { %v4458_v43 = vld [vmem:[#allocation3 + $0xd8] ss:$2 sm:$0x1f]  ;;  %v12976_v59 = vld [vmem:[#allocation4 + $0xa] sm:$0xff]  ;;  %v12983_v31 = vld [vmem:[#allocation4 + $0x12] sm:$0xff] }
 0x379   :  { %9637 = vmatmul.mubr.msk.f32.gmra.mrb[34].mxu1 %vm4091_vm2, %v12828_v42  ;;  %4459 = vst.msk [vmem:[#allocation4 + $0x80] sm:$0x1f] %vm4434_vm4, %v4458_v43  ;;  %v12848_v61 = vld [vmem:[#allocation4 + $0x71] sm:$0xff]  ;;  %v4476_v14 = vld [vmem:[#allocation4 + $0x68] sm:$0xff]  ;;  %v8078_v29 = vld [vmem:[%s14257_s3 + $0x18] sm:$0xff] }
 0x37a   :  { %10151 = vmatmul.mubr.msk.f32.gmra.mrb[56].mxu0 %vm4091_vm2, %v6646_v44  ;;  %9639 = vmatprep.mubr.msk.f32.mxu1 %vm10797_vm3, %v10796_v47  ;;  %v6648_v51 = vld [vmem:[#allocation4 + $0x74] sm:$0xff]  ;;  %v12995_v33 = vld [vmem:[#allocation4 + $0x22] sm:$0xff]  ;;  %v13001_v54 = vld [vmem:[#allocation4 + $0x2a] sm:$0xff] }
 0x37b   :  { %10153 = vmatprep.mubr.msk.f32.mxu0 %vm10797_vm3, %v10796_v47  ;;  %v4477_v58 = vld [vmem:[#allocation4 + $0x70] sm:$0xff]  ;;  %v4478_v16 = vld [vmem:[#allocation4 + $0x78] sm:$0xff]  ;;  %v13019_v36 = vld [vmem:[#allocation4 + $0x42] sm:$0xff] }
 0x37c   :  { %v4461_v49 = vld [vmem:[#allocation3 + $0xf0] ss:$2 sm:$0x1f]  ;;  %v13025_v37 = vld [vmem:[#allocation4 + $0x4a] sm:$0xff] }
 0x37d   :  { %9640 = vmatmul.mubr.msk.f32.gmra.mrb[36].mxu1 %vm4091_vm2, %v12838_v46  ;;  %4462 = vst.msk [vmem:[#allocation4 + $0x89] sm:$0x1f] %vm4434_vm4, %v4461_v49  ;;  %v13007_v60 = vld [vmem:[#allocation4 + $0x32] sm:$0xff]  ;;  %v13013_v34 = vld [vmem:[#allocation4 + $0x3a] sm:$0xff]  ;;  %vm4431_vm4 = vcmask 62464  }
 0x37e   :  { %10154 = vmatmul.mubr.msk.f32.gmra.mrb[58].mxu0 %vm4091_vm2, %v6647_v48  ;;  %9642 = vmatprep.mubr.msk.f32.mxu1 %vm10797_vm3, %v10796_v47  ;;  %v13031_v39 = vld [vmem:[#allocation4 + $0x52] sm:$0xff]  ;;  %v13041_v44 = vld [vmem:[#allocation4 + $0x5a] sm:$0xff]  ;;  %4432 = vst.msk [vmem:[#allocation4 + $0xb0] sm:$0x3f] %vm4431_vm4, %v10796_v47 }
 0x37f   :  { %10156 = vmatprep.mubr.msk.f32.mxu0 %vm10797_vm3, %v10796_v47 }
 0x380   :  { %v12857_v53 = vld [vmem:[#allocation4 + $0x79] sm:$0xff]  ;;  %v12866_v55 = vld [vmem:[#allocation4 + $0x81] sm:$0xff] }
 0x381   :  { %9643 = vmatmul.mubr.msk.f32.gmra.mrb[38].mxu1 %vm4091_vm2, %v12848_v61  ;;  %v6649_v0 = vld [vmem:[#allocation4 + $0x7c] sm:$0xff] }
 0x382   :  { %10157 = vmatmul.mubr.msk.f32.gmra.mrb[60].mxu0 %vm4091_vm2, %v6648_v51  ;;  %9645 = vmatprep.mubr.msk.f32.mxu1 %vm10797_vm3, %v10796_v47  ;;  %v4479_v17 = vld [vmem:[#allocation4 + $0x80] sm:$0xff] }
 0x383   :  { %10159 = vmatprep.mubr.msk.f32.mxu0 %vm10797_vm3, %v10796_v47  ;;  %v13047_v51 = vld [vmem:[#allocation4 + $0x62] sm:$0xff] }
 0x384   :  { %v6650_v1 = vld [vmem:[#allocation4 + $0x84] sm:$0xff]  ;;  %v6651_v3 = vld [vmem:[#allocation4 + $0x8c] sm:$0xff] }
 0x385   :  { %9646 = vmatmul.mubr.msk.f32.gmra.mrb[40].mxu1 %vm4091_vm2, %v12857_v53  ;;  %v12875_v2 = vld [vmem:[#allocation4 + $0x89] sm:$0xff] }
 0x386   :  { %10160 = vmatmul.mubr.msk.f32.gmra.mrb[62].mxu0 %vm4091_vm2, %v6649_v0  ;;  %9648 = vmatprep.mubr.msk.f32.mxu1 %vm10797_vm3, %v10796_v47  ;;  %v4480_v19 = vld [vmem:[#allocation4 + $0x88] sm:$0xff] }
 0x387   :  { %10162 = vmatprep.mubr.msk.f32.mxu0 %vm10797_vm3, %v10796_v47 }
 0x389   :  { %9649 = vmatmul.mubr.msk.f32.gmra.mrb[42].mxu1 %vm4091_vm2, %v12866_v55 }
 0x38a   :  { %10163 = vmatmul.mubr.msk.f32.gmra.mrb[64].mxu0 %vm4091_vm2, %v6650_v1  ;;  %9651 = vmatprep.mubr.msk.f32.mxu1 %vm10797_vm3, %v10796_v47 }
 0x38b   :  { %10165 = vmatprep.mubr.msk.f32.mxu0 %vm10797_vm3, %v10796_v47 }
 0x38d   :  { %9652 = vmatmul.mubr.msk.f32.gmra.mrb[44].mxu1 %vm4091_vm2, %v12875_v2 }
 0x38e   :  { %10166 = vmatmul.mubr.msk.f32.gmra.mrb[66].mxu0 %vm4091_vm2, %v6651_v3  ;;  %9654 = vmatprep.mubr.msk.f32.mxu1 %vm10797_vm3, %v10796_v47 }
 0x38f   :  { %10168 = vmatprep.mubr.msk.f32.mxu0 %vm10797_vm3, %v10796_v47 }
 0x391   :  { %9655 = vmatmul.mubr.msk.f32.gmra.mrb[46].mxu1 %vm4091_vm2, %v12882_v4 }
 0x392   :  { %9657 = vmatprep.mubr.msk.f32.mxu1 %vm10797_vm3, %v10796_v47 }
 0x395   :  { %9658 = vmatmul.mubr.msk.f32.gmra.mrb[48].mxu1 %vm4091_vm2, %v12890_v6 }
 0x396   :  { %9660 = vmatprep.mubr.msk.f32.mxu1 %vm10797_vm3, %v10796_v47 }
 0x399   :  { %9661 = vmatmul.mubr.msk.f32.gmra.mrb[50].mxu1 %vm4091_vm2, %v4505_v18  ;;  %v13057_v18 = vld [vmem:[#allocation4 + $0x6a] sm:$0xff] }
 0x39a   :  { %9665 = vmatprep.mubr.msk.f32.mxu1 %vm10797_vm3, %v10796_v47 }
 0x39d   :  { %9666 = vmatmul.mubr.msk.f32.vlgmr.msra.gmra.mrb[52].mxu1 %vm4091_vm2, %v4463_v22 }
 0x39e   :  { %9729 = vmatpush3.msra.mxu1 %v8056_v56  ;;  %9668 = vmatprep.mubr.msk.f32.mxu1 %vm10797_vm3, %v10796_v47 }
 0x39f   :  { %9793 = vmatprep.subr.mxu1 %v10796_v47 }
 0x3a1   :  { %9669 = vmatmul.mubr.msk.f32.gmra.mrb[54].mxu1 %vm4091_vm2, %v4464_v30  ;;  %v13067_v30 = vld [vmem:[#allocation4 + $0x72] sm:$0xff] }
 0x3a2   :  { %9671 = vmatprep.mubr.msk.f32.mxu1 %vm10797_vm3, %v10796_v47 }
 0x3a5   :  { %9672 = vmatmul.mubr.msk.f32.gmra.mrb[56].mxu1 %vm4091_vm2, %v4465_v32 }
 0x3a6   :  { %9674 = vmatprep.mubr.msk.f32.mxu1 %vm10797_vm3, %v10796_v47 }
 0x3a9   :  { %9675 = vmatmul.mubr.msk.f32.gmra.mrb[58].mxu1 %vm4091_vm2, %v4466_v38  ;;  %v13073_v38 = vld [vmem:[#allocation4 + $0x7a] sm:$0xff] }
 0x3aa   :  { %9677 = vmatprep.mubr.msk.f32.mxu1 %vm10797_vm3, %v10796_v47 }
 0x3ad   :  { %9678 = vmatmul.mubr.msk.f32.gmra.mrb[60].mxu1 %vm4091_vm2, %v4467_v41 }
 0x3ae   :  { %9680 = vmatprep.mubr.msk.f32.mxu1 %vm10797_vm3, %v10796_v47 }
 0x3b1   :  { %9681 = vmatmul.mubr.msk.f32.gmra.mrb[62].mxu1 %vm4091_vm2, %v4468_v45 }
 0x3b2   :  { %9683 = vmatprep.mubr.msk.f32.mxu1 %vm10797_vm3, %v10796_v47 }
 0x3b5   :  { %9684 = vmatmul.mubr.msk.f32.gmra.mrb[64].mxu1 %vm4091_vm2, %v4469_v8 }
 0x3b6   :  { %9686 = vmatprep.mubr.msk.f32.mxu1 %vm10797_vm3, %v10796_v47 }
 0x3b9   :  { %9687 = vmatmul.mubr.msk.f32.gmra.mrb[66].mxu1 %vm4091_vm2, %v4470_v9  ;;  %v13083_v9 = vld [vmem:[#allocation4 + $0x82] sm:$0xff] }
 0x3ba   :  { %9689 = vmatprep.mubr.msk.f32.mxu1 %vm10797_vm3, %v10796_v47 }
 0x3bd   :  { %9690 = vmatmul.mubr.msk.f32.gmra.mrb[68].mxu1 %vm4091_vm2, %v4471_v10 }
 0x3be   :  { %9692 = vmatprep.mubr.msk.f32.mxu1 %vm10797_vm3, %v10796_v47 }
 0x3c1   :  { %9693 = vmatmul.mubr.msk.f32.gmra.mrb[70].mxu1 %vm4091_vm2, %v4472_v57 }
 0x3c2   :  { %9695 = vmatprep.mubr.msk.f32.mxu1 %vm10797_vm3, %v10796_v47 }
 0x3c5   :  { %9696 = vmatmul.mubr.msk.f32.gmra.mrb[72].mxu1 %vm4091_vm2, %v4473_v11  ;;  %v13091_v11 = vld [vmem:[#allocation4 + $0x8a] sm:$0xff] }
 0x3c6   :  { %9698 = vmatprep.mubr.msk.f32.mxu1 %vm10797_vm3, %v10796_v47 }
 0x3c9   :  { %9699 = vmatmul.mubr.msk.f32.gmra.mrb[74].mxu1 %vm4091_vm2, %v4474_v12 }
 0x3ca   :  { %9701 = vmatprep.mubr.msk.f32.mxu1 %vm10797_vm3, %v10796_v47 }
 0x3cd   :  { %9702 = vmatmul.mubr.msk.f32.gmra.mrb[76].mxu1 %vm4091_vm2, %v4475_v13 }
 0x3ce   :  { %9704 = vmatprep.mubr.msk.f32.mxu1 %vm10797_vm3, %v10796_v47 }
 0x3d1   :  { %9705 = vmatmul.mubr.msk.f32.gmra.mrb[78].mxu1 %vm4091_vm2, %v4476_v14 }
 0x3d2   :  { %9707 = vmatprep.mubr.msk.f32.mxu1 %vm10797_vm3, %v10796_v47 }
 0x3d5   :  { %9708 = vmatmul.mubr.msk.f32.gmra.mrb[80].mxu1 %vm4091_vm2, %v4477_v58  ;;  %v13099_v58 = vld [vmem:[#allocation4 + $0x92] sm:$0xff] }
 0x3d6   :  { %9710 = vmatprep.mubr.msk.f32.mxu1 %vm10797_vm3, %v10796_v47 }
 0x3d9   :  { %9711 = vmatmul.mubr.msk.f32.gmra.mrb[82].mxu1 %vm4091_vm2, %v4478_v16 }
 0x3da   :  { %9713 = vmatprep.mubr.msk.f32.mxu1 %vm10797_vm3, %v10796_v47 }
 0x3dd   :  { %9714 = vmatmul.mubr.msk.f32.gmra.mrb[84].mxu1 %vm4091_vm2, %v4479_v17 }
 0x3de   :  { %9716 = vmatprep.mubr.msk.f32.mxu1 %vm10797_vm3, %v10796_v47 }
 0x3e1   :  { %9717 = vmatmul.mubr.msk.f32.gmra.mrb[86].mxu1 %vm4091_vm2, %v4480_v19 }
 0x3e2   :  { %9719 = vmatprep.mubr.msk.f32.mxu1 %vm10797_vm3, %v10796_v47 }
 0x3e5   :  { %9720 = vmatmul.mubr.msk.f32.gmra.mrb[88].mxu1 %vm4091_vm2, %v4481_v21 }
 0x3e6   :  { %9722 = vmatprep.mubr.msk.f32.mxu1 %vm10797_vm3, %v10796_v47 }
 0x3e9   :  { %9723 = vmatmul.mubr.msk.f32.gmra.mrb[90].mxu1 %vm4091_vm2, %v4482_v23  ;;  %v13109_v23 = vld [vmem:[#allocation4 + $0x9a] sm:$0xff] }
 0x3ea   :  { %9725 = vmatprep.mubr.msk.f32.mxu1 %vm10797_vm3, %v10796_v47 }
 0x3ed   :  { %9726 = vmatmul.mubr.msk.f32.gmra.mrb[92].mxu1 %vm4091_vm2, %v4483_v25 }
 0x3ee   :  { %9730 = vmatprep.mubr.msk.f32.mxu1 %vm10797_vm3, %v10796_v47 }
 0x3f1   :  { %9731 = vmatmul.mubr.msk.f32.vlgmr.msra.gmra.mrb[94].mxu1 %vm4091_vm2, %v4974_v27 }
 0x3f2   :  { %9794 = vmatpush3.msra.mxu1 %v8078_v29  ;;  %9733 = vmatprep.mubr.msk.f32.mxu1 %vm10797_vm3, %v10796_v47 }
 0x3f3   :  { %9858 = vmatprep.subr.mxu1 %v10796_v47 }
 0x3f5   :  { %9734 = vmatmul.mubr.msk.f32.gmra.mrb[96].mxu1 %vm4091_vm2, %v12976_v59 }
 0x3f6   :  { %9736 = vmatprep.mubr.msk.f32.mxu1 %vm10797_vm3, %v10796_v47 }
 0x3f9   :  { %9737 = vmatmul.mubr.msk.f32.gmra.mrb[98].mxu1 %vm4091_vm2, %v12983_v31 }
 0x3fa   :  { %9739 = vmatprep.mubr.msk.f32.mxu1 %vm10797_vm3, %v10796_v47 }
 0x3fd   :  { %9740 = vmatmul.mubr.msk.f32.gmra.mrb[100].mxu1 %vm4091_vm2, %v12989_v52 }
 0x3fe   :  { %9742 = vmatprep.mubr.msk.f32.mxu1 %vm10797_vm3, %v10796_v47 }
 0x401   :  { %9743 = vmatmul.mubr.msk.f32.gmra.mrb[102].mxu1 %vm4091_vm2, %v12995_v33 }
 0x402   :  { %9745 = vmatprep.mubr.msk.f32.mxu1 %vm10797_vm3, %v10796_v47 }
 0x405   :  { %9746 = vmatmul.mubr.msk.f32.gmra.mrb[104].mxu1 %vm4091_vm2, %v13001_v54 }
 0x406   :  { %9748 = vmatprep.mubr.msk.f32.mxu1 %vm10797_vm3, %v10796_v47 }
 0x409   :  { %9749 = vmatmul.mubr.msk.f32.gmra.mrb[106].mxu1 %vm4091_vm2, %v13007_v60 }
 0x40a   :  { %9751 = vmatprep.mubr.msk.f32.mxu1 %vm10797_vm3, %v10796_v47 }
 0x40d   :  { %9752 = vmatmul.mubr.msk.f32.gmra.mrb[108].mxu1 %vm4091_vm2, %v13013_v34 }
 0x40e   :  { %9754 = vmatprep.mubr.msk.f32.mxu1 %vm10797_vm3, %v10796_v47 }
 0x411   :  { %9755 = vmatmul.mubr.msk.f32.gmra.mrb[110].mxu1 %vm4091_vm2, %v13019_v36 }
 0x412   :  { %9757 = vmatprep.mubr.msk.f32.mxu1 %vm10797_vm3, %v10796_v47 }
 0x415   :  { %9758 = vmatmul.mubr.msk.f32.gmra.mrb[112].mxu1 %vm4091_vm2, %v13025_v37 }
 0x416   :  { %9760 = vmatprep.mubr.msk.f32.mxu1 %vm10797_vm3, %v10796_v47 }
 0x419   :  { %9761 = vmatmul.mubr.msk.f32.gmra.mrb[114].mxu1 %vm4091_vm2, %v13031_v39 }
 0x41a   :  { %v13035_v40 = vpop.f32.mrb[14].mxu1  ;;  %9763 = vmatprep.mubr.msk.f32.mxu1 %vm10797_vm3, %v10796_v47 }
 0x41b   :  { %v13039_v43 = vpop.f32.mrb[36].mxu0  ;;  %v9608_v48 = vpop.f32.mrb[15].mxu1 }
 0x41c   :  { %v10122_v49 = vpop.f32.mrb[37].mxu0  ;;  %v4994_v48 = vld [vmem:[#allocation4 + $0xa2] sm:$0x3] }
 0x41d   :  { %9764 = vmatmul.mubr.msk.f32.gmra.mrb[116].mxu1 %vm4091_vm2, %v13041_v44 }
 0x41e   :  { %9766 = vmatprep.mubr.msk.f32.mxu1 %vm10797_vm3, %v10796_v47 }
 0x421   :  { %9767 = vmatmul.mubr.msk.f32.gmra.mrb[118].mxu1 %vm4091_vm2, %v13047_v51 }
 0x422   :  { %9769 = vmatprep.mubr.msk.f32.mxu1 %vm10797_vm3, %v10796_v47 }
 0x423   :  { %v13053_v0 = vpop.f32.mrb[16].mxu1 }
 0x424   :  { %v13055_v1 = vpop.f32.mrb[38].mxu0  ;;  %v9611_v3 = vpop.f32.mrb[17].mxu1 }
 0x425   :  { %v10125_v20 = vpop.f32.mrb[39].mxu0  ;;  %9770 = vmatmul.mubr.msk.f32.gmra.mrb[120].mxu1 %vm4091_vm2, %v13057_v18 }
 0x426   :  { %9772 = vmatprep.mubr.msk.f32.mxu1 %vm10797_vm3, %v10796_v47 }
 0x427   :  { %v13063_v22 = vpop.f32.mrb[18].mxu1 }
 0x428   :  { %v13065_v24 = vpop.f32.mrb[40].mxu0  ;;  %v9614_v56 = vpop.f32.mrb[19].mxu1 }
 0x429   :  { %14264 = vst [vmem:[#allocation11_spill] sm:$0xff] %v13065_v24  ;;  %v10128_v32 = vpop.f32.mrb[41].mxu0  ;;  %9773 = vmatmul.mubr.msk.f32.gmra.mrb[122].mxu1 %vm4091_vm2, %v13067_v30 }
 0x42a   :  { %9775 = vmatprep.mubr.msk.f32.mxu1 %vm10797_vm3, %v10796_v47  ;;  %v5251_v32 = vld [vmem:[#allocation4 + $0x9] sm:$0xff] }
 0x42d   :  { %9776 = vmatmul.mubr.msk.f32.gmra.mrb[124].mxu1 %vm4091_vm2, %v13073_v38 }
 0x42e   :  { %9778 = vmatprep.mubr.msk.f32.mxu1 %vm10797_vm3, %v10796_v47 }
 0x42f   :  { %v13079_v41 = vpop.f32.mrb[20].mxu1 }
 0x430   :  { %v13081_v45 = vpop.f32.mrb[42].mxu0  ;;  %v9617_v8 = vpop.f32.mrb[21].mxu1 }
 0x431   :  { %14265 = vst [vmem:[#allocation12_spill] sm:$0xff] %v13081_v45  ;;  %v10131_v10 = vpop.f32.mrb[43].mxu0  ;;  %9779 = vmatmul.mubr.msk.f32.gmra.mrb[126].mxu1 %vm4091_vm2, %v13083_v9 }
 0x432   :  { %9781 = vmatprep.mubr.msk.f32.mxu1 %vm10797_vm3, %v10796_v47  ;;  %v8100_v10 = vld [vmem:[%s14257_s3 + $0x20] sm:$0xff] }
 0x434   :  { %v13089_v57 = vpop.f32.mrb[22].mxu1 }
 0x435   :  { %v13093_v12 = vpop.f32.mrb[44].mxu0  ;;  %v9620_v13 = vpop.f32.mrb[23].mxu1  ;;  %9782 = vmatmul.mubr.msk.f32.gmra.mrb[128].mxu1 %vm4091_vm2, %v13091_v11 }
 0x436   :  { %14266 = vst [vmem:[#allocation13_spill] sm:$0xff] %v13093_v12  ;;  %v10134_v14 = vpop.f32.mrb[45].mxu0  ;;  %9784 = vmatprep.mubr.msk.f32.mxu1 %vm10797_vm3, %v10796_v47 }
 0x438   :  { %v13101_v16 = vpop.f32.mrb[24].mxu1 }
 0x439   :  { %v13103_v17 = vpop.f32.mrb[46].mxu0  ;;  %v9623_v19 = vpop.f32.mrb[25].mxu1  ;;  %9785 = vmatmul.mubr.msk.f32.gmra.mrb[130].mxu1 %vm4091_vm2, %v13099_v58 }
 0x43a   :  { %14267 = vst [vmem:[#allocation14_spill] sm:$0xff] %v13103_v17  ;;  %v10137_v21 = vpop.f32.mrb[47].mxu0  ;;  %9787 = vmatprep.mubr.msk.f32.mxu1 %vm10797_vm3, %v10796_v47 }
 0x43c   :  { %v13111_v25 = vpop.f32.mrb[26].mxu1 }
 0x43d   :  { %v9626_v27 = vpop.f32.mrb[27].mxu1  ;;  %9788 = vmatmul.mubr.msk.f32.gmra.mrb[132].mxu1 %vm4091_vm2, %v13109_v23  ;;  %v13115_v29 = vpop.f32.mrb[48].mxu0 }
 0x43e   :  { %14268 = vst [vmem:[#allocation15_spill] sm:$0xff] %v13115_v29  ;;  %9790 = vmatprep.mubr.msk.f32.mxu1 %vm10797_vm3, %v10796_v47  ;;  %v10140_v49 = vpop.f32.mrb[49].mxu0 }
 0x440   :  { %v13119_v3 = vpop.f32.mrb[28].mxu1 }
 0x441   :  { %v9629_v20 = vpop.f32.mrb[29].mxu1  ;;  %9791 = vmatmul.mubr.msk.f32.gmra.mrb[134].mxu1 %vm4091_vm2, %v4994_v48  ;;  %v13122_v56 = vpop.f32.mrb[50].mxu0  ;;  %v5252_v48 = vld [vmem:[#allocation4 + $0x11] sm:$0xff] }
 0x442   :  { %14269 = vst [vmem:[#allocation16_spill] sm:$0xff] %v13122_v56  ;;  %9795 = vmatprep.mubr.msk.f32.mxu1 %vm10797_vm3, %v10796_v47  ;;  %v10143_v8 = vpop.f32.mrb[51].mxu0 }
 0x444   :  { %v13129_v13 = vpop.f32.mrb[30].mxu1 }
 0x445   :  { %v9632_v14 = vpop.f32.mrb[31].mxu1  ;;  %9796 = vmatmul.mubr.msk.f32.vlgmr.msra.gmra.mrb[136].mxu1 %vm4091_vm2, %v5251_v32  ;;  %v13132_v19 = vpop.f32.mrb[52].mxu0 }
 0x446   :  { %14270 = vst [vmem:[#allocation17_spill] sm:$0xff] %v13132_v19  ;;  %9859 = vmatpush3.msra.mxu1 %v8100_v10  ;;  %9798 = vmatprep.mubr.msk.f32.mxu1 %vm10797_vm3, %v10796_v47  ;;  %v10146_v21 = vpop.f32.mrb[53].mxu0 }
 0x447   :  { %9923 = vmatprep.subr.mxu1 %v10796_v47  ;;  %v10770_v21 = vld [vmem:[#allocation4 + $0x19] sm:$0xff] }
 0x448   :  { %v13137_v27 = vpop.f32.mrb[32].mxu1 }
 0x449   :  { %v9635_v49 = vpop.f32.mrb[33].mxu1  ;;  %9799 = vmatmul.mubr.msk.f32.gmra.mrb[138].mxu1 %vm4091_vm2, %v5252_v48  ;;  %v13140_v20 = vpop.f32.mrb[54].mxu0 }
 0x44a   :  { %14271 = vst [vmem:[#allocation18_spill] sm:$0xff] %v13140_v20  ;;  %v10149_v8 = vpop.f32.mrb[55].mxu0  ;;  %9801 = vmatprep.mubr.msk.f32.mxu1 %vm10797_vm3, %v10796_v47  ;;  %v10771_v20 = vld [vmem:[#allocation4 + $0x21] sm:$0xff] }
 0x44c   :  { %v13144_v32 = vpop.f32.mrb[34].mxu1 }
 0x44d   :  { %v13146_v10 = vpop.f32.mrb[56].mxu0  ;;  %v9638_v14 = vpop.f32.mrb[35].mxu1  ;;  %9802 = vmatmul.mubr.msk.f32.gmra.mrb[140].mxu1 %vm4091_vm2, %v10770_v21 }
 0x44e   :  { %14272 = vst [vmem:[#allocation19_spill] sm:$0xff] %v13146_v10  ;;  %v10152_v19 = vpop.f32.mrb[57].mxu0  ;;  %9804 = vmatprep.mubr.msk.f32.mxu1 %vm10797_vm3, %v10796_v47 }
 0x450   :  { %v13151_v49 = vpop.f32.mrb[36].mxu1 }
 0x451   :  { %v13153_v48 = vpop.f32.mrb[58].mxu0  ;;  %v9641_v8 = vpop.f32.mrb[37].mxu1  ;;  %9805 = vmatmul.mubr.msk.f32.gmra.mrb[142].mxu1 %vm4091_vm2, %v10771_v20 }
 0x452   :  { %14273 = vst [vmem:[#allocation20_spill] sm:$0xff] %v13153_v48  ;;  %v10155_v56 = vpop.f32.mrb[59].mxu0  ;;  %9807 = vmatprep.mubr.msk.f32.mxu1 %vm10797_vm3, %v10796_v47 }
 0x454   :  { %v13158_v14 = vpop.f32.mrb[38].mxu1 }
 0x455   :  { %v13160_v10 = vpop.f32.mrb[60].mxu0  ;;  %v9644_v19 = vpop.f32.mrb[39].mxu1  ;;  %9808 = vmatmul.mubr.msk.f32.gmra.mrb[144].mxu1 %vm4091_vm2, %v12732_v26 }
 0x456   :  { %14274 = vst [vmem:[#allocation21_spill] sm:$0xff] %v13160_v10  ;;  %v10158_v21 = vpop.f32.mrb[61].mxu0  ;;  %9810 = vmatprep.mubr.msk.f32.mxu1 %vm10797_vm3, %v10796_v47 }
 0x458   :  { %v13166_v8 = vpop.f32.mrb[40].mxu1 }
 0x459   :  { %v13168_v48 = vpop.f32.mrb[62].mxu0  ;;  %v9647_v56 = vpop.f32.mrb[41].mxu1  ;;  %9811 = vmatmul.mubr.msk.f32.gmra.mrb[146].mxu1 %vm4091_vm2, %v12750_v28 }
 0x45a   :  { %14275 = vst [vmem:[#allocation22_spill] sm:$0xff] %v13168_v48  ;;  %v10161_v20 = vpop.f32.mrb[63].mxu0  ;;  %9813 = vmatprep.mubr.msk.f32.mxu1 %vm10797_vm3, %v10796_v47 }
 0x45c   :  { %v13174_v19 = vpop.f32.mrb[42].mxu1 }
 0x45d   :  { %v13176_v10 = vpop.f32.mrb[64].mxu0  ;;  %v9650_v26 = vpop.f32.mrb[43].mxu1  ;;  %9814 = vmatmul.mubr.msk.f32.gmra.mrb[148].mxu1 %vm4091_vm2, %v12766_v50 }
 0x45e   :  { %14276 = vst [vmem:[#allocation23_spill] sm:$0xff] %v13176_v10  ;;  %v10164_v21 = vpop.f32.mrb[65].mxu0  ;;  %9816 = vmatprep.mubr.msk.f32.mxu1 %vm10797_vm3, %v10796_v47 }
 0x460   :  { %v13182_v56 = vpop.f32.mrb[44].mxu1 }
 0x461   :  { %v13184_v48 = vpop.f32.mrb[66].mxu0  ;;  %v9653_v28 = vpop.f32.mrb[45].mxu1  ;;  %9817 = vmatmul.mubr.msk.f32.gmra.mrb[150].mxu1 %vm4091_vm2, %v12775_v5 }
 0x462   :  { %14277 = vst [vmem:[#allocation24_spill] sm:$0xff] %v13184_v48  ;;  %v10167_v20 = vpop.f32.mrb[67].mxu0  ;;  %9819 = vmatprep.mubr.msk.f32.mxu1 %vm10797_vm3, %v10796_v47 }
 0x464   :  { %v13190_v26 = vpop.f32.mrb[46].mxu1 }
 0x465   :  { %v9656_v10 = vpop.f32.mrb[47].mxu1  ;;  %9820 = vmatmul.mubr.msk.f32.gmra.mrb[152].mxu1 %vm4091_vm2, %v12792_v63 }
 0x466   :  { %9822 = vmatprep.mubr.msk.f32.mxu1 %vm10797_vm3, %v10796_v47 }
 0x468   :  { %v13196_v50 = vpop.f32.mrb[48].mxu1 }
 0x469   :  { %v9659_v21 = vpop.f32.mrb[49].mxu1  ;;  %9823 = vmatmul.mubr.msk.f32.gmra.mrb[154].mxu1 %vm4091_vm2, %v12799_v15 }
 0x46a   :  { %9825 = vmatprep.mubr.msk.f32.mxu1 %vm10797_vm3, %v10796_v47 }
 0x46c   :  { %v13202_v5 = vpop.f32.mrb[50].mxu1 }
 0x46d   :  { %v9662_v28 = vpop.f32.mrb[51].mxu1  ;;  %9826 = vmatmul.mubr.msk.f32.gmra.mrb[156].mxu1 %vm4091_vm2, %v12814_v35 }
 0x46e   :  { %9828 = vmatprep.mubr.msk.f32.mxu1 %vm10797_vm3, %v10796_v47 }
 0x470   :  { %v4870_v63 = vpop.f32.mrb[52].mxu1 }
 0x471   :  { %v9667_v10 = vpop.f32.mrb[53].mxu1  ;;  %9829 = vmatmul.mubr.msk.f32.gmra.mrb[158].mxu1 %vm4091_vm2, %v12828_v42  ;;  %v13211_v20 = vadd.f32 %v4870_v63, %v12894_v7 }
 0x472   :  { %9831 = vmatprep.mubr.msk.f32.mxu1 %vm10797_vm3, %v10796_v47 }
 0x474   :  { %v4875_v15 = vpop.f32.mrb[54].mxu1 }
 0x475   :  { %v9670_v21 = vpop.f32.mrb[55].mxu1  ;;  %9832 = vmatmul.mubr.msk.f32.gmra.mrb[160].mxu1 %vm4091_vm2, %v12838_v46  ;;  %v13218_v35 = vadd.f32 %v4875_v15, %v12899_v62 }
 0x476   :  { %9834 = vmatprep.mubr.msk.f32.mxu1 %vm10797_vm3, %v10796_v47 }
 0x478   :  { %v4880_v28 = vpop.f32.mrb[56].mxu1 }
 0x479   :  { %v9673_v10 = vpop.f32.mrb[57].mxu1  ;;  %9835 = vmatmul.mubr.msk.f32.gmra.mrb[162].mxu1 %vm4091_vm2, %v12848_v61  ;;  %v13225_v42 = vadd.f32 %v4880_v28, %v13035_v40 }
 0x47a   :  { %9837 = vmatprep.mubr.msk.f32.mxu1 %vm10797_vm3, %v10796_v47 }
 0x47c   :  { %v4885_v7 = vpop.f32.mrb[58].mxu1 }
 0x47d   :  { %v9676_v63 = vpop.f32.mrb[59].mxu1  ;;  %9838 = vmatmul.mubr.msk.f32.gmra.mrb[164].mxu1 %vm4091_vm2, %v12857_v53  ;;  %v13232_v46 = vadd.f32 %v4885_v7, %v13053_v0 }
 0x47e   :  { %9840 = vmatprep.mubr.msk.f32.mxu1 %vm10797_vm3, %v10796_v47  ;;  %v5271_v63 = vld [vmem:[#allocation4 + $0xa9] sm:$0x3] }
 0x480   :  { %v4890_v62 = vpop.f32.mrb[60].mxu1 }
 0x481   :  { %v9679_v15 = vpop.f32.mrb[61].mxu1  ;;  %9841 = vmatmul.mubr.msk.f32.gmra.mrb[166].mxu1 %vm4091_vm2, %v12866_v55  ;;  %v13239_v61 = vadd.f32 %v4890_v62, %v13063_v22 }
 0x482   :  { %9843 = vmatprep.mubr.msk.f32.mxu1 %vm10797_vm3, %v10796_v47  ;;  %v8122_v15 = vld [vmem:[%s14257_s3 + $0x28] sm:$0xff] }
 0x484   :  { %v4895_v40 = vpop.f32.mrb[62].mxu1 }
 0x485   :  { %v9682_v21 = vpop.f32.mrb[63].mxu1  ;;  %9844 = vmatmul.mubr.msk.f32.gmra.mrb[168].mxu1 %vm4091_vm2, %v12875_v2  ;;  %v13246_v53 = vadd.f32 %v4895_v40, %v13079_v41  ;;  %v5270_v41 = vld [vmem:[#allocation4 + $0xa1] sm:$0xff] }
 0x486   :  { %9846 = vmatprep.mubr.msk.f32.mxu1 %vm10797_vm3, %v10796_v47 }
 0x488   :  { %v4900_v0 = vpop.f32.mrb[64].mxu1 }
 0x489   :  { %v9685_v28 = vpop.f32.mrb[65].mxu1  ;;  %9847 = vmatmul.mubr.msk.f32.gmra.mrb[170].mxu1 %vm4091_vm2, %v12882_v4  ;;  %v13253_v55 = vadd.f32 %v4900_v0, %v13089_v57 }
 0x48a   :  { %9849 = vmatprep.mubr.msk.f32.mxu1 %vm10797_vm3, %v10796_v47 }
 0x48c   :  { %v4905_v22 = vpop.f32.mrb[66].mxu1 }
 0x48d   :  { %v9688_v10 = vpop.f32.mrb[67].mxu1  ;;  %9850 = vmatmul.mubr.msk.f32.gmra.mrb[172].mxu1 %vm4091_vm2, %v12890_v6  ;;  %v13260_v2 = vadd.f32 %v4905_v22, %v13101_v16 }
 0x48e   :  { %9852 = vmatprep.mubr.msk.f32.mxu1 %vm10797_vm3, %v10796_v47 }
 0x490   :  { %v4910_v7 = vpop.f32.mrb[68].mxu1 }
 0x491   :  { %v9691_v4 = vpop.f32.mrb[69].mxu1  ;;  %9853 = vmatmul.mubr.msk.f32.gmra.mrb[174].mxu1 %vm4091_vm2, %v5270_v41  ;;  %v13266_v57 = vadd.f32 %v4910_v7, %v13111_v25 }
 0x492   :  { %9855 = vmatprep.mubr.msk.f32.mxu1 %vm10797_vm3, %v10796_v47 }
 0x494   :  { %v4915_v62 = vpop.f32.mrb[70].mxu1 }
 0x495   :  { %v9694_v6 = vpop.f32.mrb[71].mxu1  ;;  %9856 = vmatmul.mubr.msk.f32.gmra.mrb[176].mxu1 %vm4091_vm2, %v5271_v63  ;;  %v13272_v16 = vadd.f32 %v4915_v62, %v13119_v3 }
 0x496   :  { %9860 = vmatprep.mubr.msk.f32.mxu1 %vm10797_vm3, %v10796_v47 }
 0x498   :  { %v4920_v25 = vpop.f32.mrb[72].mxu1 }
 0x499   :  { %v9697_v40 = vpop.f32.mrb[73].mxu1  ;;  %9861 = vmatmul.mubr.msk.f32.vlgmr.msra.gmra.mrb[178].mxu1 %vm4091_vm2, %v12976_v59  ;;  %v13282_v21 = vadd.f32 %v4920_v25, %v13129_v13 }
 0x49a   :  { %9924 = vmatpush3.msra.mxu1 %v8122_v15  ;;  %9863 = vmatprep.mubr.msk.f32.mxu1 %vm10797_vm3, %v10796_v47 }
 0x49b   :  { %9988 = vmatprep.subr.mxu1 %v10796_v47 }
 0x49c   :  { %v4925_v3 = vpop.f32.mrb[74].mxu1 }
 0x49d   :  { %v9700_v0 = vpop.f32.mrb[75].mxu1  ;;  %9864 = vmatmul.mubr.msk.f32.gmra.mrb[180].mxu1 %vm4091_vm2, %v12983_v31  ;;  %v13290_v28 = vadd.f32 %v4925_v3, %v13137_v27 }
 0x49e   :  { %9866 = vmatprep.mubr.msk.f32.mxu1 %vm10797_vm3, %v10796_v47 }
 0x4a0   :  { %v4930_v59 = vpop.f32.mrb[76].mxu1 }
 0x4a1   :  { %v9703_v13 = vpop.f32.mrb[77].mxu1  ;;  %9867 = vmatmul.mubr.msk.f32.gmra.mrb[182].mxu1 %vm4091_vm2, %v12989_v52  ;;  %v13297_v22 = vadd.f32 %v4930_v59, %v13144_v32 }
 0x4a2   :  { %9869 = vmatprep.mubr.msk.f32.mxu1 %vm10797_vm3, %v10796_v47 }
 0x4a4   :  { %v4935_v10 = vpop.f32.mrb[78].mxu1 }
 0x4a5   :  { %v9706_v41 = vpop.f32.mrb[79].mxu1  ;;  %9870 = vmatmul.mubr.msk.f32.gmra.mrb[184].mxu1 %vm4091_vm2, %v12995_v33  ;;  %v13304_v27 = vadd.f32 %v4935_v10, %v13151_v49 }
 0x4a6   :  { %9872 = vmatprep.mubr.msk.f32.mxu1 %vm10797_vm3, %v10796_v47 }
 0x4a8   :  { %v4940_v7 = vpop.f32.mrb[80].mxu1 }
 0x4a9   :  { %v9709_v4 = vpop.f32.mrb[81].mxu1  ;;  %9873 = vmatmul.mubr.msk.f32.gmra.mrb[186].mxu1 %vm4091_vm2, %v13001_v54  ;;  %v13311_v32 = vadd.f32 %v4940_v7, %v13158_v14 }
 0x4aa   :  { %9875 = vmatprep.mubr.msk.f32.mxu1 %vm10797_vm3, %v10796_v47 }
 0x4ac   :  { %v4945_v63 = vpop.f32.mrb[82].mxu1 }
 0x4ad   :  { %v9712_v62 = vpop.f32.mrb[83].mxu1  ;;  %9876 = vmatmul.mubr.msk.f32.gmra.mrb[188].mxu1 %vm4091_vm2, %v13007_v60  ;;  %v13318_v49 = vadd.f32 %v4945_v63, %v13166_v8 }
 0x4ae   :  { %9878 = vmatprep.mubr.msk.f32.mxu1 %vm10797_vm3, %v10796_v47 }
 0x4b0   :  { %v4950_v6 = vpop.f32.mrb[84].mxu1 }
 0x4b1   :  { %v9715_v15 = vpop.f32.mrb[85].mxu1  ;;  %9879 = vmatmul.mubr.msk.f32.gmra.mrb[190].mxu1 %vm4091_vm2, %v13013_v34  ;;  %v13325_v14 = vadd.f32 %v4950_v6, %v13174_v19 }
 0x4b2   :  { %9881 = vmatprep.mubr.msk.f32.mxu1 %vm10797_vm3, %v10796_v47 }
 0x4b4   :  { %v4955_v25 = vpop.f32.mrb[86].mxu1 }
 0x4b5   :  { %v9718_v40 = vpop.f32.mrb[87].mxu1  ;;  %9882 = vmatmul.mubr.msk.f32.gmra.mrb[192].mxu1 %vm4091_vm2, %v13019_v36  ;;  %v13332_v8 = vadd.f32 %v4955_v25, %v13182_v56 }
 0x4b6   :  { %9884 = vmatprep.mubr.msk.f32.mxu1 %vm10797_vm3, %v10796_v47 }
 0x4b8   :  { %v4960_v3 = vpop.f32.mrb[88].mxu1 }
 0x4b9   :  { %v9721_v0 = vpop.f32.mrb[89].mxu1  ;;  %9885 = vmatmul.mubr.msk.f32.gmra.mrb[194].mxu1 %vm4091_vm2, %v13025_v37  ;;  %v13339_v19 = vadd.f32 %v4960_v3, %v13190_v26 }
 0x4ba   :  { %9887 = vmatprep.mubr.msk.f32.mxu1 %vm10797_vm3, %v10796_v47 }
 0x4bc   :  { %v4965_v59 = vpop.f32.mrb[90].mxu1 }
 0x4bd   :  { %v9724_v13 = vpop.f32.mrb[91].mxu1  ;;  %9888 = vmatmul.mubr.msk.f32.gmra.mrb[196].mxu1 %vm4091_vm2, %v13031_v39  ;;  %v13346_v56 = vadd.f32 %v4965_v59, %v13196_v50 }
 0x4be   :  { %9890 = vmatprep.mubr.msk.f32.mxu1 %vm10797_vm3, %v10796_v47 }
 0x4c0   :  { %v4970_v10 = vpop.f32.mrb[92].mxu1 }
 0x4c1   :  { %v9727_v41 = vpop.f32.mrb[93].mxu1  ;;  %9891 = vmatmul.mubr.msk.f32.gmra.mrb[198].mxu1 %vm4091_vm2, %v13041_v44  ;;  %v13353_v26 = vadd.f32 %v4970_v10, %v13202_v5 }
 0x4c2   :  { %9893 = vmatprep.mubr.msk.f32.mxu1 %vm10797_vm3, %v10796_v47 }
 0x4c4   :  { %v5126_v7 = vpop.f32.mrb[94].mxu1 }
 0x4c5   :  { %v13358_v39 = vadd.f32 %v5126_v7, %v13211_v20  ;;  %v9732_v50 = vpop.f32.mrb[95].mxu1  ;;  %9894 = vmatmul.mubr.msk.f32.gmra.mrb[200].mxu1 %vm4091_vm2, %v13047_v51 }
 0x4c6   :  { %9896 = vmatprep.mubr.msk.f32.mxu1 %vm10797_vm3, %v10796_v47 }
 0x4c8   :  { %v5131_v4 = vpop.f32.mrb[96].mxu1 }
 0x4c9   :  { %v13365_v63 = vadd.f32 %v5131_v4, %v13218_v35  ;;  %v9735_v5 = vpop.f32.mrb[97].mxu1  ;;  %9897 = vmatmul.mubr.msk.f32.gmra.mrb[202].mxu1 %vm4091_vm2, %v13057_v18  ;;  %v8144_v4 = vld [vmem:[%s14257_s3 + $0x30] sm:$0xff] }
 0x4ca   :  { %9899 = vmatprep.mubr.msk.f32.mxu1 %vm10797_vm3, %v10796_v47 }
 0x4cc   :  { %v5136_v20 = vpop.f32.mrb[98].mxu1 }
 0x4cd   :  { %v13372_v62 = vadd.f32 %v5136_v20, %v13225_v42  ;;  %v9738_v6 = vpop.f32.mrb[99].mxu1  ;;  %9900 = vmatmul.mubr.msk.f32.gmra.mrb[204].mxu1 %vm4091_vm2, %v13067_v30 }
 0x4ce   :  { %9902 = vmatprep.mubr.msk.f32.mxu1 %vm10797_vm3, %v10796_v47 }
 0x4d0   :  { %v5141_v51 = vpop.f32.mrb[100].mxu1 }
 0x4d1   :  { %v13379_v35 = vadd.f32 %v5141_v51, %v13232_v46  ;;  %v9741_v15 = vpop.f32.mrb[101].mxu1  ;;  %9903 = vmatmul.mubr.msk.f32.gmra.mrb[206].mxu1 %vm4091_vm2, %v13073_v38  ;;  %v13438_v51 = vld [vmem:[#allocation4 + $0x13] sm:$0xff] }
 0x4d2   :  { %9905 = vmatprep.mubr.msk.f32.mxu1 %vm10797_vm3, %v10796_v47 }
 0x4d4   :  { %v5146_v18 = vpop.f32.mrb[102].mxu1 }
 0x4d5   :  { %v13386_v42 = vadd.f32 %v5146_v18, %v13239_v61  ;;  %v9744_v25 = vpop.f32.mrb[103].mxu1  ;;  %9906 = vmatmul.mubr.msk.f32.gmra.mrb[208].mxu1 %vm4091_vm2, %v13083_v9 }
 0x4d6   :  { %9908 = vmatprep.mubr.msk.f32.mxu1 %vm10797_vm3, %v10796_v47  ;;  %v13447_v25 = vld [vmem:[#allocation4 + $0x1b] sm:$0xff] }
 0x4d8   :  { %v5151_v46 = vpop.f32.mrb[104].mxu1 }
 0x4d9   :  { %v13393_v40 = vadd.f32 %v5151_v46, %v13246_v53  ;;  %v9747_v3 = vpop.f32.mrb[105].mxu1  ;;  %9909 = vmatmul.mubr.msk.f32.gmra.mrb[210].mxu1 %vm4091_vm2, %v13091_v11  ;;  %v13413_v11 = vld [vmem:[#allocation4 + $0xa2] sm:$0xff] }
 0x4da   :  { %9911 = vmatprep.mubr.msk.f32.mxu1 %vm10797_vm3, %v10796_v47 }
 0x4dc   :  { %v5156_v38 = vpop.f32.mrb[106].mxu1 }
 0x4dd   :  { %v13400_v61 = vadd.f32 %v5156_v38, %v13253_v55  ;;  %v9750_v0 = vpop.f32.mrb[107].mxu1  ;;  %9912 = vmatmul.mubr.msk.f32.gmra.mrb[212].mxu1 %vm4091_vm2, %v13099_v58  ;;  %v13456_v38 = vld [vmem:[#allocation4 + $0x23] sm:$0xff] }
 0x4de   :  { %9914 = vmatprep.mubr.msk.f32.mxu1 %vm10797_vm3, %v10796_v47 }
 0x4e0   :  { %v5161_v9 = vpop.f32.mrb[108].mxu1 }
 0x4e1   :  { %v13407_v53 = vadd.f32 %v5161_v9, %v13260_v2  ;;  %v9753_v59 = vpop.f32.mrb[109].mxu1  ;;  %9915 = vmatmul.mubr.msk.f32.gmra.mrb[214].mxu1 %vm4091_vm2, %v13109_v23  ;;  %v5548_v2 = vld [vmem:[#allocation4 + $0xaa] sm:$0x3] }
 0x4e2   :  { %9917 = vmatprep.mubr.msk.f32.mxu1 %vm10797_vm3, %v10796_v47  ;;  %v13465_v59 = vld [vmem:[#allocation4 + $0x2b] sm:$0xff] }
 0x4e4   :  { %v5166_v55 = vpop.f32.mrb[110].mxu1 }
 0x4e5   :  { %v13416_v13 = vadd.f32 %v5166_v55, %v13266_v57  ;;  %v9756_v10 = vpop.f32.mrb[111].mxu1  ;;  %9918 = vmatmul.mubr.msk.f32.gmra.mrb[216].mxu1 %vm4091_vm2, %v13413_v11  ;;  %v5805_v57 = vld [vmem:[#allocation4 + $0xb] sm:$0xff] }
 0x4e6   :  { %9920 = vmatprep.mubr.msk.f32.mxu1 %vm10797_vm3, %v10796_v47 }
 0x4e8   :  { %v5171_v41 = vpop.f32.mrb[112].mxu1 }
 0x4e9   :  { %v13423_v7 = vadd.f32 %v5171_v41, %v13272_v16  ;;  %v9759_v50 = vpop.f32.mrb[113].mxu1  ;;  %9921 = vmatmul.mubr.msk.f32.gmra.mrb[218].mxu1 %vm4091_vm2, %v5548_v2  ;;  %v13474_v2 = vld [vmem:[#allocation4 + $0x33] sm:$0xff] }
 0x4ea   :  { %9925 = vmatprep.mubr.msk.f32.mxu1 %vm10797_vm3, %v10796_v47 }
 0x4ec   :  { %v5176_v5 = vpop.f32.mrb[114].mxu1 }
 0x4ed   :  { %v13432_v20 = vadd.f32 %v5176_v5, %v13282_v21  ;;  %v9762_v6 = vpop.f32.mrb[115].mxu1  ;;  %9926 = vmatmul.mubr.msk.f32.vlgmr.msra.gmra.mrb[220].mxu1 %vm4091_vm2, %v5805_v57  ;;  %v13483_v57 = vld [vmem:[#allocation4 + $0x3b] sm:$0xff] }
 0x4ee   :  { %9989 = vmatpush3.msra.mxu1 %v8144_v4  ;;  %9928 = vmatprep.mubr.msk.f32.mxu1 %vm10797_vm3, %v10796_v47 }
 0x4ef   :  { %10053 = vmatprep.subr.mxu1 %v10796_v47 }
 0x4f0   :  { %v5181_v16 = vpop.f32.mrb[116].mxu1 }
 0x4f1   :  { %v13441_v15 = vadd.f32 %v5181_v16, %v13290_v28  ;;  %v9765_v18 = vpop.f32.mrb[117].mxu1  ;;  %9929 = vmatmul.mubr.msk.f32.gmra.mrb[222].mxu1 %vm4091_vm2, %v13438_v51 }
 0x4f2   :  { %9931 = vmatprep.mubr.msk.f32.mxu1 %vm10797_vm3, %v10796_v47 }
 0x4f4   :  { %v5186_v21 = vpop.f32.mrb[118].mxu1 }
 0x4f5   :  { %v13450_v46 = vadd.f32 %v5186_v21, %v13297_v22  ;;  %v9768_v3 = vpop.f32.mrb[119].mxu1  ;;  %9932 = vmatmul.mubr.msk.f32.gmra.mrb[224].mxu1 %vm4091_vm2, %v13447_v25 }
 0x4f6   :  { %9934 = vmatprep.mubr.msk.f32.mxu1 %vm10797_vm3, %v10796_v47 }
 0x4f8   :  { %v5191_v28 = vpop.f32.mrb[120].mxu1 }
 0x4f9   :  { %v13459_v0 = vadd.f32 %v5191_v28, %v13304_v27  ;;  %v9771_v9 = vpop.f32.mrb[121].mxu1  ;;  %9935 = vmatmul.mubr.msk.f32.gmra.mrb[226].mxu1 %vm4091_vm2, %v13456_v38 }
 0x4fa   :  { %9937 = vmatprep.mubr.msk.f32.mxu1 %vm10797_vm3, %v10796_v47 }
 0x4fc   :  { %v5196_v22 = vpop.f32.mrb[122].mxu1 }
 0x4fd   :  { %v13468_v55 = vadd.f32 %v5196_v22, %v13311_v32  ;;  %v9774_v10 = vpop.f32.mrb[123].mxu1  ;;  %9938 = vmatmul.mubr.msk.f32.gmra.mrb[228].mxu1 %vm4091_vm2, %v13465_v59 }
 0x4fe   :  { %9940 = vmatprep.mubr.msk.f32.mxu1 %vm10797_vm3, %v10796_v47 }
 0x500   :  { %v5201_v27 = vpop.f32.mrb[124].mxu1 }
 0x501   :  { %v13477_v41 = vadd.f32 %v5201_v27, %v13318_v49  ;;  %v9777_v50 = vpop.f32.mrb[125].mxu1  ;;  %9941 = vmatmul.mubr.msk.f32.gmra.mrb[230].mxu1 %vm4091_vm2, %v13474_v2  ;;  %v13492_v49 = vld [vmem:[#allocation4 + $0x43] sm:$0xff] }
 0x502   :  { %9943 = vmatprep.mubr.msk.f32.mxu1 %vm10797_vm3, %v10796_v47 }
 0x504   :  { %v5206_v32 = vpop.f32.mrb[126].mxu1 }
 0x505   :  { %v13486_v4 = vadd.f32 %v5206_v32, %v13325_v14  ;;  %v9780_v5 = vpop.f32.mrb[127].mxu1  ;;  %9944 = vmatmul.mubr.msk.f32.gmra.mrb[232].mxu1 %vm4091_vm2, %v13483_v57  ;;  %v13501_v14 = vld [vmem:[#allocation4 + $0x4b] sm:$0xff] }
 0x506   :  { %9946 = vmatprep.mubr.msk.f32.mxu1 %vm10797_vm3, %v10796_v47  ;;  %v13529_v5 = vld [vmem:[#allocation4 + $0x63] sm:$0xff] }
 0x508   :  { %v5211_v6 = vpop.f32.mrb[128].mxu1 }
 0x509   :  { %v13495_v16 = vadd.f32 %v5211_v6, %v13332_v8  ;;  %v9783_v18 = vpop.f32.mrb[129].mxu1  ;;  %9947 = vmatmul.mubr.msk.f32.gmra.mrb[234].mxu1 %vm4091_vm2, %v13492_v49  ;;  %v13510_v8 = vld [vmem:[#allocation4 + $0x53] sm:$0xff] }
 0x50a   :  { %9949 = vmatprep.mubr.msk.f32.mxu1 %vm10797_vm3, %v10796_v47 }
 0x50c   :  { %v5216_v21 = vpop.f32.mrb[130].mxu1 }
 0x50d   :  { %v13504_v3 = vadd.f32 %v5216_v21, %v13339_v19  ;;  %v9786_v28 = vpop.f32.mrb[131].mxu1  ;;  %9950 = vmatmul.mubr.msk.f32.gmra.mrb[236].mxu1 %vm4091_vm2, %v13501_v14  ;;  %v13520_v19 = vld [vmem:[#allocation4 + $0x5b] sm:$0xff]  ;;  %v13538_v21 = vld [vmem:[#allocation4 + $0x6b] sm:$0xff] }
 0x50e   :  { %9952 = vmatprep.mubr.msk.f32.mxu1 %vm10797_vm3, %v10796_v47 }
 0x510   :  { %v5221_v9 = vpop.f32.mrb[132].mxu1 }
 0x511   :  { %v13514_v22 = vadd.f32 %v5221_v9, %v13346_v56  ;;  %v9789_v10 = vpop.f32.mrb[133].mxu1  ;;  %9953 = vmatmul.mubr.msk.f32.gmra.mrb[238].mxu1 %vm4091_vm2, %v13510_v8 }
 0x512   :  { %9955 = vmatprep.mubr.msk.f32.mxu1 %vm10797_vm3, %v10796_v47  ;;  %v13547_v10 = vld [vmem:[#allocation4 + $0x73] sm:$0xff] }
 0x514   :  { %v5226_v27 = vpop.f32.mrb[134].mxu1 }
 0x515   :  { %v13523_v50 = vadd.f32 %v5226_v27, %v13353_v26  ;;  %v9792_v32 = vpop.f32.mrb[135].mxu1  ;;  %9956 = vmatmul.mubr.msk.f32.gmra.mrb[240].mxu1 %vm4091_vm2, %v13520_v19 }
 0x516   :  { %9958 = vmatprep.mubr.msk.f32.mxu1 %vm10797_vm3, %v10796_v47 }
 0x518   :  { %v5403_v56 = vpop.f32.mrb[136].mxu1 }
 0x519   :  { %v13532_v6 = vadd.f32 %v5403_v56, %v13358_v39  ;;  %v9797_v18 = vpop.f32.mrb[137].mxu1  ;;  %9959 = vmatmul.mubr.msk.f32.gmra.mrb[242].mxu1 %vm4091_vm2, %v13529_v5  ;;  %v13556_v56 = vld [vmem:[#allocation4 + $0x7b] sm:$0xff] }
 0x51a   :  { %9961 = vmatprep.mubr.msk.f32.mxu1 %vm10797_vm3, %v10796_v47 }
 0x51c   :  { %v5408_v26 = vpop.f32.mrb[138].mxu1 }
 0x51d   :  { %v13541_v28 = vadd.f32 %v5408_v26, %v13365_v63  ;;  %v9800_v9 = vpop.f32.mrb[139].mxu1  ;;  %9962 = vmatmul.mubr.msk.f32.gmra.mrb[244].mxu1 %vm4091_vm2, %v13538_v21 }
 0x51e   :  { %9964 = vmatprep.mubr.msk.f32.mxu1 %vm10797_vm3, %v10796_v47  ;;  %v13565_v9 = vld [vmem:[#allocation4 + $0x83] sm:$0xff] }
 0x520   :  { %v5413_v39 = vpop.f32.mrb[140].mxu1 }
 0x521   :  { %v13550_v27 = vadd.f32 %v5413_v39, %v13372_v62  ;;  %v9803_v32 = vpop.f32.mrb[141].mxu1  ;;  %9965 = vmatmul.mubr.msk.f32.gmra.mrb[246].mxu1 %vm4091_vm2, %v13547_v10 }
 0x522   :  { %9967 = vmatprep.mubr.msk.f32.mxu1 %vm10797_vm3, %v10796_v47 }
 0x524   :  { %v5418_v63 = vpop.f32.mrb[142].mxu1 }
 0x525   :  { %v13559_v18 = vadd.f32 %v5418_v63, %v13379_v35  ;;  %v9806_v26 = vpop.f32.mrb[143].mxu1  ;;  %9968 = vmatmul.mubr.msk.f32.gmra.mrb[248].mxu1 %vm4091_vm2, %v13556_v56  ;;  %v13574_v63 = vld [vmem:[#allocation4 + $0x8b] sm:$0xff] }
 0x526   :  { %9970 = vmatprep.mubr.msk.f32.mxu1 %vm10797_vm3, %v10796_v47 }
 0x528   :  { %v5423_v62 = vpop.f32.mrb[144].mxu1 }
 0x529   :  { %v13568_v39 = vadd.f32 %v5423_v62, %v13386_v42  ;;  %v9809_v32 = vpop.f32.mrb[145].mxu1  ;;  %9971 = vmatmul.mubr.msk.f32.gmra.mrb[250].mxu1 %vm4091_vm2, %v13565_v9  ;;  %v13583_v42 = vld [vmem:[#allocation4 + $0x93] sm:$0xff] }
 0x52a   :  { %9973 = vmatprep.mubr.msk.f32.mxu1 %vm10797_vm3, %v10796_v47 }
 0x52c   :  { %v5428_v35 = vpop.f32.mrb[146].mxu1 }
 0x52d   :  { %v13577_v26 = vadd.f32 %v5428_v35, %v13393_v40  ;;  %v9812_v48 = vpop.f32.mrb[147].mxu1  ;;  %9974 = vmatmul.mubr.msk.f32.gmra.mrb[252].mxu1 %vm4091_vm2, %v13574_v63 }
 0x52e   :  { %9976 = vmatprep.mubr.msk.f32.mxu1 %vm10797_vm3, %v10796_v47  ;;  %v13592_v48 = vld [vmem:[#allocation4 + $0x9b] sm:$0xff] }
 0x530   :  { %v5433_v62 = vpop.f32.mrb[148].mxu1 }
 0x531   :  { %v13586_v32 = vadd.f32 %v5433_v62, %v13400_v61  ;;  %v9815_v29 = vpop.f32.mrb[149].mxu1  ;;  %9977 = vmatmul.mubr.msk.f32.gmra.mrb[254].mxu1 %vm4091_vm2, %v13583_v42 }
 0x532   :  { %9979 = vmatprep.mubr.msk.f32.mxu1 %vm10797_vm3, %v10796_v47  ;;  %v13601_v29 = vld [vmem:[#allocation4 + $0xa3] sm:$0xff] }
 0x534   :  { %v5438_v40 = vpop.f32.mrb[150].mxu1 }
 0x535   :  { %v13595_v35 = vadd.f32 %v5438_v40, %v13407_v53  ;;  %v9818_v17 = vpop.f32.mrb[151].mxu1  ;;  %9980 = vmatmul.mubr.msk.f32.gmra.mrb[0].mxu1 %vm4091_vm2, %v13592_v48 }
 0x536   :  { %9982 = vmatprep.mubr.msk.f32.mxu1 %vm10797_vm3, %v10796_v47  ;;  %v5825_v17 = vld [vmem:[#allocation4 + $0xab] sm:$0x3] }
 0x538   :  { %v5443_v61 = vpop.f32.mrb[152].mxu1 }
 0x539   :  { %v13604_v62 = vadd.f32 %v5443_v61, %v13416_v13  ;;  %v9821_v12 = vpop.f32.mrb[153].mxu1  ;;  %9983 = vmatmul.mubr.msk.f32.gmra.mrb[2].mxu1 %vm4091_vm2, %v13601_v29 }
 0x53a   :  { %9985 = vmatprep.mubr.msk.f32.mxu1 %vm10797_vm3, %v10796_v47  ;;  %v8166_v12 = vld [vmem:[%s14257_s3 + $0x38] sm:$0xff] }
 0x53c   :  { %v5448_v53 = vpop.f32.mrb[154].mxu1 }
 0x53d   :  { %v13611_v40 = vadd.f32 %v5448_v53, %v13423_v7  ;;  %v9824_v45 = vpop.f32.mrb[155].mxu1  ;;  %9986 = vmatmul.mubr.msk.f32.gmra.mrb[4].mxu1 %vm4091_vm2, %v5825_v17 }
 0x53e   :  { %9990 = vmatprep.mubr.msk.f32.mxu1 %vm10797_vm3, %v10796_v47 }
 0x540   :  { %v5453_v13 = vpop.f32.mrb[156].mxu1 }
 0x541   :  { %v13620_v61 = vadd.f32 %v5453_v13, %v13432_v20  ;;  %v9827_v24 = vpop.f32.mrb[157].mxu1  ;;  %9991 = vmatmul.mubr.msk.f32.vlgmr.msra.gmra.mrb[6].mxu1 %vm4091_vm2, %v12983_v31 }
 0x542   :  { %10054 = vmatpush3.msra.mxu1 %v8166_v12  ;;  %9993 = vmatprep.mubr.msk.f32.mxu1 %vm10797_vm3, %v10796_v47 }
 0x544   :  { %v5458_v45 = vpop.f32.mrb[158].mxu1 }
 0x545   :  { %v13627_v7 = vadd.f32 %v5458_v45, %v13441_v15  ;;  %v9830_v17 = vpop.f32.mrb[159].mxu1  ;;  %9994 = vmatmul.mubr.msk.f32.gmra.mrb[8].mxu1 %vm4091_vm2, %v12989_v52 }
 0x546   :  { %9996 = vmatprep.mubr.msk.f32.mxu1 %vm10797_vm3, %v10796_v47 }
 0x548   :  { %v5463_v20 = vpop.f32.mrb[160].mxu1 }
 0x549   :  { %v13634_v24 = vadd.f32 %v5463_v20, %v13450_v46  ;;  %v9833_v31 = vpop.f32.mrb[161].mxu1  ;;  %9997 = vmatmul.mubr.msk.f32.gmra.mrb[10].mxu1 %vm4091_vm2, %v12995_v33 }
 0x54a   :  { %9999 = vmatprep.mubr.msk.f32.mxu1 %vm10797_vm3, %v10796_v47 }
 0x54c   :  { %v5468_v15 = vpop.f32.mrb[162].mxu1 }
 0x54d   :  { %v13641_v53 = vadd.f32 %v5468_v15, %v13459_v0  ;;  %v9836_v12 = vpop.f32.mrb[163].mxu1  ;;  %10000 = vmatmul.mubr.msk.f32.gmra.mrb[12].mxu1 %vm4091_vm2, %v13001_v54  ;;  %v6652_v54 = vld [vmem:[#allocation4 + $0x94] sm:$0xff] }
 0x54e   :  { %10002 = vmatprep.mubr.msk.f32.mxu1 %vm10797_vm3, %v10796_v47  ;;  %10169 = vmatmul.mubr.msk.f32.gmra.mrb[68].mxu0 %vm4091_vm2, %v6652_v54  ;;  %v6092_v54 = vld [vmem:[#allocation4 + $0x62] sm:$0xff] }
 0x54f   :  { %10171 = vmatprep.mubr.msk.f32.mxu0 %vm10797_vm3, %v10796_v47 }
 0x550   :  { %v5473_v52 = vpop.f32.mrb[164].mxu1 }
 0x551   :  { %v13648_v46 = vadd.f32 %v5473_v52, %v13468_v55  ;;  %v9839_v13 = vpop.f32.mrb[165].mxu1  ;;  %10003 = vmatmul.mubr.msk.f32.gmra.mrb[14].mxu1 %vm4091_vm2, %v13007_v60  ;;  %v6655_v52 = vld [vmem:[#allocation4 + $0xac] sm:$0xff] }
 0x552   :  { %10005 = vmatprep.mubr.msk.f32.mxu1 %vm10797_vm3, %v10796_v47 }
 0x554   :  { %v5478_v33 = vpop.f32.mrb[166].mxu1 }
 0x555   :  { %v13655_v0 = vadd.f32 %v5478_v33, %v13477_v41  ;;  %v9842_v45 = vpop.f32.mrb[167].mxu1  ;;  %10006 = vmatmul.mubr.msk.f32.gmra.mrb[16].mxu1 %vm4091_vm2, %v13013_v34  ;;  %v6653_v41 = vld [vmem:[#allocation4 + $0x9c] sm:$0xff] }
 0x556   :  { %10008 = vmatprep.mubr.msk.f32.mxu1 %vm10797_vm3, %v10796_v47  ;;  %10172 = vmatmul.mubr.msk.f32.gmra.mrb[70].mxu0 %vm4091_vm2, %v6653_v41  ;;  %v6093_v41 = vld [vmem:[#allocation4 + $0x6a] sm:$0xff] }
 0x557   :  { %10174 = vmatprep.mubr.msk.f32.mxu0 %vm10797_vm3, %v10796_v47 }
 0x558   :  { %v5483_v60 = vpop.f32.mrb[168].mxu1 }
 0x559   :  { %v13665_v55 = vadd.f32 %v5483_v60, %v13486_v4  ;;  %v9845_v17 = vpop.f32.mrb[169].mxu1  ;;  %10009 = vmatmul.mubr.msk.f32.gmra.mrb[18].mxu1 %vm4091_vm2, %v13019_v36  ;;  %v6654_v4 = vld [vmem:[#allocation4 + $0xa4] sm:$0xff]  ;;  %v6090_v36 = vld [vmem:[#allocation4 + $0x52] sm:$0xff] }
 0x55a   :  { %10011 = vmatprep.mubr.msk.f32.mxu1 %vm10797_vm3, %v10796_v47  ;;  %10175 = vmatmul.mubr.msk.f32.gmra.mrb[72].mxu0 %vm4091_vm2, %v6654_v4 }
 0x55b   :  { %10177 = vmatprep.mubr.msk.f32.mxu0 %vm10797_vm3, %v10796_v47 }
 0x55c   :  { %v5488_v34 = vpop.f32.mrb[170].mxu1 }
 0x55d   :  { %v13675_v20 = vadd.f32 %v5488_v34, %v13495_v16  ;;  %v9848_v31 = vpop.f32.mrb[171].mxu1  ;;  %10012 = vmatmul.mubr.msk.f32.gmra.mrb[20].mxu1 %vm4091_vm2, %v13025_v37 }
 0x55e   :  { %10014 = vmatprep.mubr.msk.f32.mxu1 %vm10797_vm3, %v10796_v47  ;;  %10178 = vmatmul.mubr.msk.f32.gmra.mrb[74].mxu0 %vm4091_vm2, %v6655_v52  ;;  %v6096_v52 = vld [vmem:[#allocation4 + $0x82] sm:$0xff] }
 0x55f   :  { %10180 = vmatprep.mubr.msk.f32.mxu0 %vm10797_vm3, %v10796_v47 }
 0x560   :  { %v5493_v15 = vpop.f32.mrb[172].mxu1 }
 0x561   :  { %v13685_v12 = vadd.f32 %v5493_v15, %v13504_v3  ;;  %v9851_v16 = vpop.f32.mrb[173].mxu1  ;;  %10015 = vmatmul.mubr.msk.f32.gmra.mrb[22].mxu1 %vm4091_vm2, %v6090_v36  ;;  %v6656_v3 = vld [vmem:[#allocation4 + $0xb4] sm:$0x3] }
 0x562   :  { %10017 = vmatprep.mubr.msk.f32.mxu1 %vm10797_vm3, %v10796_v47  ;;  %10181 = vmatmul.mubr.msk.f32.gmra.mrb[76].mxu0 %vm4091_vm2, %v6656_v3 }
 0x564   :  { %v5498_v37 = vpop.f32.mrb[174].mxu1 }
 0x565   :  { %v13694_v13 = vadd.f32 %v5498_v37, %v13514_v22  ;;  %v9854_v33 = vpop.f32.mrb[175].mxu1  ;;  %10018 = vmatmul.mubr.msk.f32.gmra.mrb[24].mxu1 %vm4091_vm2, %v13041_v44 }
 0x566   :  { %10020 = vmatprep.mubr.msk.f32.mxu1 %vm10797_vm3, %v10796_v47 }
 0x568   :  { %v5503_v45 = vpop.f32.mrb[176].mxu1 }
 0x569   :  { %v13702_v60 = vadd.f32 %v5503_v45, %v13523_v50  ;;  %v9857_v17 = vpop.f32.mrb[177].mxu1  ;;  %10021 = vmatmul.mubr.msk.f32.gmra.mrb[26].mxu1 %vm4091_vm2, %v6092_v54 }
 0x56a   :  { %10023 = vmatprep.mubr.msk.f32.mxu1 %vm10797_vm3, %v10796_v47 }
 0x56c   :  { %v5680_v22 = vpop.f32.mrb[178].mxu1 }
 0x56d   :  { %v13708_v44 = vadd.f32 %v5680_v22, %v13532_v6  ;;  %v9862_v34 = vpop.f32.mrb[179].mxu1  ;;  %10024 = vmatmul.mubr.msk.f32.gmra.mrb[28].mxu1 %vm4091_vm2, %v6093_v41  ;;  %v6095_v6 = vld [vmem:[#allocation4 + $0x7a] sm:$0xff] }
 0x56e   :  { %10026 = vmatprep.mubr.msk.f32.mxu1 %vm10797_vm3, %v10796_v47 }
 0x570   :  { %v5685_v31 = vpop.f32.mrb[180].mxu1 }
 0x571   :  { %v13714_v50 = vadd.f32 %v5685_v31, %v13541_v28  ;;  %v9865_v4 = vpop.f32.mrb[181].mxu1  ;;  %10027 = vmatmul.mubr.msk.f32.gmra.mrb[30].mxu1 %vm4091_vm2, %v13067_v30 }
 0x572   :  { %10029 = vmatprep.mubr.msk.f32.mxu1 %vm10797_vm3, %v10796_v47 }
 0x574   :  { %v5690_v36 = vpop.f32.mrb[182].mxu1 }
 0x575   :  { %v13721_v15 = vadd.f32 %v5690_v36, %v13550_v27  ;;  %v9868_v16 = vpop.f32.mrb[183].mxu1  ;;  %10030 = vmatmul.mubr.msk.f32.gmra.mrb[32].mxu1 %vm4091_vm2, %v6095_v6  ;;  %v6097_v27 = vld [vmem:[#allocation4 + $0x8a] sm:$0xff] }
 0x576   :  { %10032 = vmatprep.mubr.msk.f32.mxu1 %vm10797_vm3, %v10796_v47 }
 0x578   :  { %v5695_v28 = vpop.f32.mrb[184].mxu1 }
 0x579   :  { %v13727_v37 = vadd.f32 %v5695_v28, %v13559_v18  ;;  %v9871_v30 = vpop.f32.mrb[185].mxu1  ;;  %10033 = vmatmul.mubr.msk.f32.gmra.mrb[34].mxu1 %vm4091_vm2, %v6096_v52 }
 0x57a   :  { %10035 = vmatprep.mubr.msk.f32.mxu1 %vm10797_vm3, %v10796_v47 }
 0x57c   :  { %v5700_v33 = vpop.f32.mrb[186].mxu1 }
 0x57d   :  { %v13733_v3 = vadd.f32 %v5700_v33, %v13568_v39  ;;  %v9874_v45 = vpop.f32.mrb[187].mxu1  ;;  %10036 = vmatmul.mubr.msk.f32.gmra.mrb[36].mxu1 %vm4091_vm2, %v6097_v27 }
 0x57e   :  { %10038 = vmatprep.mubr.msk.f32.mxu1 %vm10797_vm3, %v10796_v47 }
 0x580   :  { %v5705_v54 = vpop.f32.mrb[188].mxu1 }
 0x581   :  { %v13739_v18 = vadd.f32 %v5705_v54, %v13577_v26  ;;  %v9877_v17 = vpop.f32.mrb[189].mxu1  ;;  %10039 = vmatmul.mubr.msk.f32.gmra.mrb[38].mxu1 %vm4091_vm2, %v13099_v58  ;;  %v6101_v58 = vld [vmem:[#allocation4 + $0xaa] sm:$0xff] }
 0x582   :  { %10041 = vmatprep.mubr.msk.f32.mxu1 %vm10797_vm3, %v10796_v47 }
 0x584   :  { %v5710_v22 = vpop.f32.mrb[190].mxu1 }
 0x585   :  { %v13746_v39 = vadd.f32 %v5710_v22, %v13586_v32  ;;  %v9880_v41 = vpop.f32.mrb[191].mxu1  ;;  %10042 = vmatmul.mubr.msk.f32.gmra.mrb[40].mxu1 %vm4091_vm2, %v13109_v23 }
 0x586   :  { %10044 = vmatprep.mubr.msk.f32.mxu1 %vm10797_vm3, %v10796_v47 }
 0x588   :  { %v5715_v26 = vpop.f32.mrb[192].mxu1 }
 0x589   :  { %v13753_v34 = vadd.f32 %v5715_v26, %v13595_v35  ;;  %v9883_v31 = vpop.f32.mrb[193].mxu1  ;;  %10045 = vmatmul.mubr.msk.f32.gmra.mrb[42].mxu1 %vm4091_vm2, %v13413_v11  ;;  %v6102_v35 = vld [vmem:[#allocation4 + $0xb2] sm:$0x3] }
 0x58a   :  { %10047 = vmatprep.mubr.msk.f32.mxu1 %vm10797_vm3, %v10796_v47 }
 0x58c   :  { %v5720_v32 = vpop.f32.mrb[194].mxu1 }
 0x58d   :  { %v13760_v4 = vadd.f32 %v5720_v32, %v13604_v62  ;;  %v9886_v23 = vpop.f32.mrb[195].mxu1  ;;  %10048 = vmatmul.mubr.msk.f32.gmra.mrb[44].mxu1 %vm4091_vm2, %v6101_v58 }
 0x58e   :  { %10050 = vmatprep.mubr.msk.f32.mxu1 %vm10797_vm3, %v10796_v47 }
 0x590   :  { %v5725_v36 = vpop.f32.mrb[196].mxu1 }
 0x591   :  { %v13766_v6 = vadd.f32 %v5725_v36, %v13611_v40  ;;  %v9889_v11 = vpop.f32.mrb[197].mxu1  ;;  %10051 = vmatmul.mubr.msk.f32.gmra.mrb[46].mxu1 %vm4091_vm2, %v6102_v35 }
 0x592   :  { %10055 = vmatprep.mubr.msk.f32.mxu1 %vm10797_vm3, %v10796_v47 }
 0x594   :  { %v5730_v16 = vpop.f32.mrb[198].mxu1 }
 0x595   :  { %v13772_v62 = vadd.f32 %v5730_v16, %v13620_v61  ;;  %v9892_v28 = vpop.f32.mrb[199].mxu1  ;;  %10056 = vmatmul.mubr.msk.f32.vlgmr.msra.gmra.mrb[48].mxu1 %vm4091_vm2, %v13438_v51 }
 0x596   :  { %10058 = vmatprep.mubr.msk.f32.mxu1 %vm10797_vm3, %v10796_v47 }
 0x598   :  { %v5735_v52 = vpop.f32.mrb[200].mxu1 }
 0x599   :  { %v13779_v40 = vadd.f32 %v5735_v52, %v13627_v7  ;;  %v9895_v30 = vpop.f32.mrb[201].mxu1  ;;  %10059 = vmatmul.mubr.msk.f32.gmra.mrb[50].mxu1 %vm4091_vm2, %v13447_v25 }
 0x59a   :  { %10061 = vmatprep.mubr.msk.f32.mxu1 %vm10797_vm3, %v10796_v47 }
 0x59c   :  { %v5740_v61 = vpop.f32.mrb[202].mxu1 }
 0x59d   :  { %v13786_v33 = vadd.f32 %v5740_v61, %v13634_v24  ;;  %v9898_v27 = vpop.f32.mrb[203].mxu1  ;;  %10062 = vmatmul.mubr.msk.f32.gmra.mrb[52].mxu1 %vm4091_vm2, %v13456_v38 }
 0x59e   :  { %10064 = vmatprep.mubr.msk.f32.mxu1 %vm10797_vm3, %v10796_v47 }
 0x5a0   :  { %v5745_v51 = vpop.f32.mrb[204].mxu1 }
 0x5a1   :  { %v13793_v7 = vadd.f32 %v5745_v51, %v13641_v53  ;;  %v9901_v45 = vpop.f32.mrb[205].mxu1  ;;  %10065 = vmatmul.mubr.msk.f32.gmra.mrb[54].mxu1 %vm4091_vm2, %v13465_v59 }
 0x5a2   :  { %10067 = vmatprep.mubr.msk.f32.mxu1 %vm10797_vm3, %v10796_v47 }
 0x5a4   :  { %v5750_v25 = vpop.f32.mrb[206].mxu1 }
 0x5a5   :  { %v13800_v24 = vadd.f32 %v5750_v25, %v13648_v46  ;;  %v9904_v54 = vpop.f32.mrb[207].mxu1  ;;  %10068 = vmatmul.mubr.msk.f32.gmra.mrb[56].mxu1 %vm4091_vm2, %v13474_v2 }
 0x5a6   :  { %10070 = vmatprep.mubr.msk.f32.mxu1 %vm10797_vm3, %v10796_v47 }
 0x5a8   :  { %v5755_v38 = vpop.f32.mrb[208].mxu1 }
 0x5a9   :  { %v13807_v53 = vadd.f32 %v5755_v38, %v13655_v0  ;;  %v9907_v17 = vpop.f32.mrb[209].mxu1  ;;  %10071 = vmatmul.mubr.msk.f32.gmra.mrb[58].mxu1 %vm4091_vm2, %v13483_v57 }
 0x5aa   :  { %10073 = vmatprep.mubr.msk.f32.mxu1 %vm10797_vm3, %v10796_v47 }
 0x5ac   :  { %v5760_v59 = vpop.f32.mrb[210].mxu1 }
 0x5ad   :  { %v13814_v46 = vadd.f32 %v5760_v59, %v13665_v55  ;;  %v9910_v22 = vpop.f32.mrb[211].mxu1  ;;  %10074 = vmatmul.mubr.msk.f32.gmra.mrb[60].mxu1 %vm4091_vm2, %v13492_v49 }
 0x5ae   :  { %10076 = vmatprep.mubr.msk.f32.mxu1 %vm10797_vm3, %v10796_v47 }
 0x5b0   :  { %v5765_v2 = vpop.f32.mrb[212].mxu1 }
 0x5b1   :  { %v13821_v0 = vadd.f32 %v5765_v2, %v13675_v20  ;;  %v9913_v41 = vpop.f32.mrb[213].mxu1  ;;  %10077 = vmatmul.mubr.msk.f32.gmra.mrb[62].mxu1 %vm4091_vm2, %v13501_v14 }
 0x5b2   :  { %10079 = vmatprep.mubr.msk.f32.mxu1 %vm10797_vm3, %v10796_v47 }
 0x5b4   :  { %v5770_v57 = vpop.f32.mrb[214].mxu1 }
 0x5b5   :  { %v13828_v55 = vadd.f32 %v5770_v57, %v13685_v12  ;;  %v9916_v26 = vpop.f32.mrb[215].mxu1  ;;  %10080 = vmatmul.mubr.msk.f32.gmra.mrb[64].mxu1 %vm4091_vm2, %v13510_v8 }
 0x5b6   :  { %10082 = vmatprep.mubr.msk.f32.mxu1 %vm10797_vm3, %v10796_v47 }
 0x5b8   :  { %v5775_v49 = vpop.f32.mrb[216].mxu1 }
 0x5b9   :  { %v13835_v20 = vadd.f32 %v5775_v49, %v13694_v13  ;;  %v9919_v31 = vpop.f32.mrb[217].mxu1  ;;  %10083 = vmatmul.mubr.msk.f32.gmra.mrb[66].mxu1 %vm4091_vm2, %v13520_v19 }
 0x5ba   :  { %10085 = vmatprep.mubr.msk.f32.mxu1 %vm10797_vm3, %v10796_v47 }
 0x5bc   :  { %v5780_v14 = vpop.f32.mrb[218].mxu1 }
 0x5bd   :  { %v13842_v12 = vadd.f32 %v5780_v14, %v13702_v60  ;;  %v9922_v58 = vpop.f32.mrb[219].mxu1  ;;  %10086 = vmatmul.mubr.msk.f32.gmra.mrb[68].mxu1 %vm4091_vm2, %v13529_v5 }
 0x5be   :  { %10088 = vmatprep.mubr.msk.f32.mxu1 %vm10797_vm3, %v10796_v47 }
 0x5c0   :  { %v5957_v8 = vpop.f32.mrb[220].mxu1 }
 0x5c1   :  { %v13849_v13 = vadd.f32 %v5957_v8, %v13708_v44  ;;  %v9927_v32 = vpop.f32.mrb[221].mxu1  ;;  %10089 = vmatmul.mubr.msk.f32.gmra.mrb[70].mxu1 %vm4091_vm2, %v13538_v21 }
 0x5c2   :  { %10091 = vmatprep.mubr.msk.f32.mxu1 %vm10797_vm3, %v10796_v47 }
 0x5c4   :  { %v5962_v19 = vpop.f32.mrb[222].mxu1 }
 0x5c5   :  { %v13856_v60 = vadd.f32 %v5962_v19, %v13714_v50  ;;  %v9930_v23 = vpop.f32.mrb[223].mxu1  ;;  %10092 = vmatmul.mubr.msk.f32.gmra.mrb[72].mxu1 %vm4091_vm2, %v13547_v10 }
 0x5c6   :  { %10094 = vmatprep.mubr.msk.f32.mxu1 %vm10797_vm3, %v10796_v47 }
 0x5c8   :  { %v5967_v5 = vpop.f32.mrb[224].mxu1 }
 0x5c9   :  { %v13863_v44 = vadd.f32 %v5967_v5, %v13721_v15  ;;  %v9933_v35 = vpop.f32.mrb[225].mxu1  ;;  %10095 = vmatmul.mubr.msk.f32.gmra.mrb[74].mxu1 %vm4091_vm2, %v13556_v56 }
 0x5ca   :  { %10097 = vmatprep.mubr.msk.f32.mxu1 %vm10797_vm3, %v10796_v47 }
 0x5cc   :  { %v5972_v21 = vpop.f32.mrb[226].mxu1 }
 0x5cd   :  { %v13870_v50 = vadd.f32 %v5972_v21, %v13727_v37  ;;  %v9936_v36 = vpop.f32.mrb[227].mxu1  ;;  %10098 = vmatmul.mubr.msk.f32.gmra.mrb[76].mxu1 %vm4091_vm2, %v13565_v9 }
 0x5ce   :  { %10100 = vmatprep.mubr.msk.f32.mxu1 %vm10797_vm3, %v10796_v47 }
 0x5d0   :  { %v5977_v10 = vpop.f32.mrb[228].mxu1 }
 0x5d1   :  { %v13877_v15 = vadd.f32 %v5977_v10, %v13733_v3  ;;  %v9939_v11 = vpop.f32.mrb[229].mxu1  ;;  %10101 = vmatmul.mubr.msk.f32.gmra.mrb[78].mxu1 %vm4091_vm2, %v13574_v63 }
 0x5d2   :  { %10103 = vmatprep.mubr.msk.f32.mxu1 %vm10797_vm3, %v10796_v47 }
 0x5d4   :  { %v5982_v56 = vpop.f32.mrb[230].mxu1 }
 0x5d5   :  { %v13884_v37 = vadd.f32 %v5982_v56, %v13739_v18  ;;  %v9942_v16 = vpop.f32.mrb[231].mxu1  ;;  %10104 = vmatmul.mubr.msk.f32.gmra.mrb[80].mxu1 %vm4091_vm2, %v13583_v42  ;;  %v6378_v42 = vld [vmem:[#allocation4 + $0xab] sm:$0xff] }
 0x5d6   :  { %10106 = vmatprep.mubr.msk.f32.mxu1 %vm10797_vm3, %v10796_v47 }
 0x5d8   :  { %v5987_v9 = vpop.f32.mrb[232].mxu1 }
 0x5d9   :  { %v13891_v3 = vadd.f32 %v5987_v9, %v13746_v39  ;;  %v9945_v28 = vpop.f32.mrb[233].mxu1  ;;  %10107 = vmatmul.mubr.msk.f32.gmra.mrb[82].mxu1 %vm4091_vm2, %v13592_v48 }
 0x5da   :  { %10109 = vmatprep.mubr.msk.f32.mxu1 %vm10797_vm3, %v10796_v47 }
 0x5dc   :  { %v5992_v63 = vpop.f32.mrb[234].mxu1 }
 0x5dd   :  { %v13898_v18 = vadd.f32 %v5992_v63, %v13753_v34  ;;  %v9948_v52 = vpop.f32.mrb[235].mxu1  ;;  %10110 = vmatmul.mubr.msk.f32.gmra.mrb[84].mxu1 %vm4091_vm2, %v13601_v29  ;;  %v6379_v34 = vld [vmem:[#allocation4 + $0xb3] sm:$0x3] }
 0x5de   :  { %10112 = vmatprep.mubr.msk.f32.mxu1 %vm10797_vm3, %v10796_v47 }
 0x5e0   :  { %v5997_v39 = vpop.f32.mrb[236].mxu1 }
 0x5e1   :  { %v13905_v30 = vadd.f32 %v5997_v39, %v13760_v4  ;;  %v9951_v48 = vpop.f32.mrb[237].mxu1  ;;  %10113 = vmatmul.mubr.msk.f32.gmra.mrb[86].mxu1 %vm4091_vm2, %v6378_v42 }
 0x5e2   :  { %10115 = vmatprep.mubr.msk.f32.mxu1 %vm10797_vm3, %v10796_v47 }
 0x5e4   :  { %v6002_v61 = vpop.f32.mrb[238].mxu1 }
 0x5e5   :  { %v13911_v27 = vadd.f32 %v6002_v61, %v13766_v6  ;;  %v9954_v29 = vpop.f32.mrb[239].mxu1  ;;  %10116 = vmatmul.mubr.msk.f32.gmra.mrb[88].mxu1 %vm4091_vm2, %v6379_v34 }
 0x5e8   :  { %v6007_v51 = vpop.f32.mrb[240].mxu1 }
 0x5e9   :  { %v13915_v45 = vadd.f32 %v6007_v51, %v13772_v62  ;;  %v9957_v4 = vpop.f32.mrb[241].mxu1 }
 0x5ec   :  { %v6012_v25 = vpop.f32.mrb[242].mxu1 }
 0x5ed   :  { %v13918_v54 = vadd.f32 %v6012_v25, %v13779_v40  ;;  %v9960_v38 = vpop.f32.mrb[243].mxu1 }
 0x5f0   :  { %v6017_v17 = vpop.f32.mrb[244].mxu1 }
 0x5f1   :  { %v13921_v59 = vadd.f32 %v6017_v17, %v13786_v33  ;;  %v9963_v22 = vpop.f32.mrb[245].mxu1 }
 0x5f4   :  { %v6022_v6 = vpop.f32.mrb[246].mxu1 }
 0x5f5   :  { %v13924_v2 = vadd.f32 %v6022_v6, %v13793_v7  ;;  %v9966_v41 = vpop.f32.mrb[247].mxu1 }
 0x5f8   :  { %v6027_v57 = vpop.f32.mrb[248].mxu1 }
 0x5f9   :  { %v13927_v62 = vadd.f32 %v6027_v57, %v13800_v24  ;;  %v9969_v26 = vpop.f32.mrb[249].mxu1 }
 0x5fc   :  { %v6032_v49 = vpop.f32.mrb[250].mxu1 }
 0x5fd   :  { %v13930_v40 = vadd.f32 %v6032_v49, %v13807_v53  ;;  %v9972_v31 = vpop.f32.mrb[251].mxu1 }
 0x600   :  { %v6037_v14 = vpop.f32.mrb[252].mxu1 }
 0x601   :  { %v13933_v33 = vadd.f32 %v6037_v14, %v13814_v46  ;;  %v9975_v58 = vpop.f32.mrb[253].mxu1 }
 0x604   :  { %v6042_v8 = vpop.f32.mrb[254].mxu1 }
 0x605   :  { %v13936_v7 = vadd.f32 %v6042_v8, %v13821_v0  ;;  %v9978_v32 = vpop.f32.mrb[255].mxu1 }
 0x608   :  { %v6047_v19 = vpop.f32.mrb[0].mxu1 }
 0x609   :  { %v13939_v24 = vadd.f32 %v6047_v19, %v13828_v55  ;;  %v9981_v23 = vpop.f32.mrb[1].mxu1 }
 0x60c   :  { %v6052_v5 = vpop.f32.mrb[2].mxu1 }
 0x60d   :  { %v13942_v53 = vadd.f32 %v6052_v5, %v13835_v20  ;;  %v9984_v35 = vpop.f32.mrb[3].mxu1 }
 0x610   :  { %v6057_v21 = vpop.f32.mrb[4].mxu1 }
 0x611   :  { %v13945_v46 = vadd.f32 %v6057_v21, %v13842_v12  ;;  %v9987_v36 = vpop.f32.mrb[5].mxu1 }
 0x614   :  { %v6234_v10 = vpop.f32.mrb[6].mxu1 }
 0x615   :  { %v13948_v0 = vadd.f32 %v6234_v10, %v13849_v13  ;;  %v9992_v11 = vpop.f32.mrb[7].mxu1 }
 0x618   :  { %v6239_v56 = vpop.f32.mrb[8].mxu1 }
 0x619   :  { %v13951_v55 = vadd.f32 %v6239_v56, %v13856_v60  ;;  %v9995_v16 = vpop.f32.mrb[9].mxu1 }
 0x61a   :  { %v7361_v16 = vld [vmem:[%s14259_s5 + $0x8] sm:$0xff] }
 0x61c   :  { %v6244_v9 = vpop.f32.mrb[10].mxu1 }
 0x61d   :  { %v13954_v20 = vadd.f32 %v6244_v9, %v13863_v44  ;;  %v9998_v28 = vpop.f32.mrb[11].mxu1 }
 0x620   :  { %v6249_v63 = vpop.f32.mrb[12].mxu1 }
 0x621   :  { %v13957_v12 = vadd.f32 %v6249_v63, %v13870_v50  ;;  %v10001_v52 = vpop.f32.mrb[13].mxu1  ;;  %v13968_v51 = vpop.f32.mrb[68].mxu0 }
 0x622   :  { %v10170_v50 = vpop.f32.mrb[69].mxu0 }
 0x624   :  { %v6254_v42 = vpop.f32.mrb[14].mxu1 }
 0x625   :  { %v13960_v13 = vadd.f32 %v6254_v42, %v13877_v15  ;;  %v10004_v39 = vpop.f32.mrb[15].mxu1 }
 0x628   :  { %v6259_v48 = vpop.f32.mrb[16].mxu1 }
 0x629   :  { %v13963_v60 = vadd.f32 %v6259_v48, %v13884_v37  ;;  %v10007_v34 = vpop.f32.mrb[17].mxu1  ;;  %v13979_v41 = vpop.f32.mrb[70].mxu0 }
 0x62a   :  { %v10173_v57 = vpop.f32.mrb[71].mxu0 }
 0x62c   :  { %v6264_v61 = vpop.f32.mrb[18].mxu1 }
 0x62d   :  { %v13966_v44 = vadd.f32 %v6264_v61, %v13891_v3  ;;  %v10010_v29 = vpop.f32.mrb[19].mxu1  ;;  %v13984_v31 = vpop.f32.mrb[72].mxu0 }
 0x62e   :  { %v10176_v14 = vpop.f32.mrb[73].mxu0 }
 0x630   :  { %v6269_v4 = vpop.f32.mrb[20].mxu1 }
 0x631   :  { %v13971_v25 = vadd.f32 %v6269_v4, %v13898_v18  ;;  %v10013_v15 = vpop.f32.mrb[21].mxu1  ;;  %v13992_v23 = vpop.f32.mrb[74].mxu0 }
 0x632   :  { %v10179_v5 = vpop.f32.mrb[75].mxu0 }
 0x634   :  { %v6274_v38 = vpop.f32.mrb[22].mxu1 }
 0x635   :  { %v13974_v17 = vadd.f32 %v6274_v38, %v13905_v30  ;;  %v10016_v37 = vpop.f32.mrb[23].mxu1  ;;  %v13997_v36 = vpop.f32.mrb[76].mxu0 }
 0x636   :  { %v10182_v10 = vpop.f32.mrb[77].mxu0 }
 0x638   :  { %v6279_v22 = vpop.f32.mrb[24].mxu1 }
 0x639   :  { %v13977_v6 = vadd.f32 %v6279_v22, %v13911_v27  ;;  %v10019_v3 = vpop.f32.mrb[25].mxu1 }
 0x63c   :  { %v6284_v26 = vpop.f32.mrb[26].mxu1 }
 0x63d   :  { %v13982_v49 = vadd.f32 %v6284_v26, %v13915_v45  ;;  %v10022_v18 = vpop.f32.mrb[27].mxu1 }
 0x640   :  { %v6289_v58 = vpop.f32.mrb[28].mxu1 }
 0x641   :  { %v13987_v30 = vadd.f32 %v6289_v58, %v13918_v54  ;;  %v10025_v8 = vpop.f32.mrb[29].mxu1 }
 0x644   :  { %v6294_v32 = vpop.f32.mrb[30].mxu1 }
 0x645   :  { %v13990_v27 = vadd.f32 %v6294_v32, %v13921_v59  ;;  %v10028_v19 = vpop.f32.mrb[31].mxu1  ;;  %v7360_v59 = vld [vmem:[%s14259_s5] sm:$0xff] }
 0x646   :  { %v10419_v28 = vpack.c.bf16 %v7361_v16, %v7360_v59 }
 0x648   :  { %v6299_v35 = vpop.f32.mrb[32].mxu1 }
 0x649   :  { %v13995_v45 = vadd.f32 %v6299_v35, %v13924_v2  ;;  %v10031_v21 = vpop.f32.mrb[33].mxu1  ;;  %v10798_v2 = vmov 0.0|0.0  }
 0x64a   :  { %10418 = vmatprep.subr.bf16.mxu1 %v10798_v2  ;;  %v14278_v21 = vld [vmem:[#allocation11_spill] sm:$0xff] }
 0x64b   :  { %10420 = vmatpush1.bf16.msra.mxu1 %v10419_v28 }
 0x64c   :  { %v6304_v11 = vpop.f32.mrb[34].mxu1  ;;  %10421 = vmatprep.subr.bf16.mxu1 %v10798_v2 }
 0x64d   :  { %v14000_v54 = vadd.f32 %v6304_v11, %v13927_v62  ;;  %v10034_v56 = vpop.f32.mrb[35].mxu1 }
 0x650   :  { %v6309_v9 = vpop.f32.mrb[36].mxu1 }
 0x651   :  { %v14010_v63 = vadd.f32 %v6309_v9, %v13930_v40  ;;  %v10037_v52 = vpop.f32.mrb[37].mxu1  ;;  %v14279_v9 = vld [vmem:[#allocation12_spill] sm:$0xff] }
 0x654   :  { %v6314_v62 = vpop.f32.mrb[38].mxu1 }
 0x655   :  { %v14014_v42 = vadd.f32 %v6314_v62, %v13933_v33  ;;  %v10040_v39 = vpop.f32.mrb[39].mxu1 }
 0x658   :  { %v6319_v48 = vpop.f32.mrb[40].mxu1 }
 0x659   :  { %v14017_v34 = vadd.f32 %v6319_v48, %v13936_v7  ;;  %v10043_v61 = vpop.f32.mrb[41].mxu1 }
 0x65c   :  { %v6324_v29 = vpop.f32.mrb[42].mxu1 }
 0x65d   :  { %v14020_v50 = vadd.f32 %v6324_v29, %v13939_v24  ;;  %v10046_v40 = vpop.f32.mrb[43].mxu1  ;;  %v14032_v24 = vld [vmem:[%s14258_s4] ss:$0 sm:$0xff]  ;;  %v14280_v29 = vld [vmem:[#allocation13_spill] sm:$0xff] }
 0x660   :  { %v6329_v4 = vpop.f32.mrb[44].mxu1 }
 0x661   :  { %v14023_v15 = vadd.f32 %v6329_v4, %v13942_v53  ;;  %v10049_v38 = vpop.f32.mrb[45].mxu1 }
 0x664   :  { %v6334_v37 = vpop.f32.mrb[46].mxu1 }
 0x665   :  { %v14026_v33 = vadd.f32 %v6334_v37, %v13945_v46  ;;  %v10052_v22 = vpop.f32.mrb[47].mxu1 }
 0x668   :  { %v6511_v3 = vpop.f32.mrb[48].mxu1 }
 0x669   :  { %v6615_v7 = vadd.f32 %v6511_v3, %v13948_v0  ;;  %v10057_v57 = vpop.f32.mrb[49].mxu1 }
 0x66b   :  { %v6892_v26 = vadd.f32 %v13039_v43, %v6615_v7  ;;  %v14281_v7 = vld [vmem:[#allocation14_spill] sm:$0xff] }
 0x66c   :  { %v6516_v18 = vpop.f32.mrb[50].mxu1 }
 0x66d   :  { %v6920_v53 = vadd.f32 %v14032_v24, %v6892_v26  ;;  %v6616_v14 = vadd.f32 %v6516_v18, %v13951_v55  ;;  %v10060_v58 = vpop.f32.mrb[51].mxu1 }
 0x66f   :  { %vm6941_vm2 = vcmp.gt.f32.partialorder %v6920_v53, 0.0  ;;  %v6962_v46 = vmul.f32 0.01, %v6920_v53  ;;  %v6893_v8 = vadd.f32 %v13055_v1, %v6616_v14 }
 0x670   :  { %v6521_v0 = vpop.f32.mrb[52].mxu1 }
 0x671   :  { %v6983_v32 = vsel %vm6941_vm2, %v6920_v53, %v6962_v46  ;;  %v6921_v19 = vadd.f32 %v14032_v24, %v6893_v8  ;;  %v6617_v5 = vadd.f32 %v6521_v0, %v13954_v20  ;;  %v10063_v35 = vpop.f32.mrb[53].mxu1 }
 0x672   :  { %7005 = vst.msk [vmem:[#allocation5] sm:$0xff] %vm7004_vm14, %v6983_v32 }
 0x673   :  { %vm6942_vm15 = vcmp.gt.f32.partialorder %v6921_v19, 0.0  ;;  %v6963_v43 = vmul.f32 0.01, %v6921_v19  ;;  %v6894_v10 = vadd.f32 %v14278_v21, %v6617_v5  ;;  %v7363_v5 = vld [vmem:[%s14259_s5 + $0x18] sm:$0xff] }
 0x674   :  { %v6526_v55 = vpop.f32.mrb[54].mxu1 }
 0x675   :  { %v6984_v11 = vsel %vm6942_vm15, %v6921_v19, %v6963_v43  ;;  %v6922_v56 = vadd.f32 %v14032_v24, %v6894_v10  ;;  %v6618_v59 = vadd.f32 %v6526_v55, %v13957_v12  ;;  %v10066_v1 = vpop.f32.mrb[55].mxu1  ;;  %v7362_v19 = vld [vmem:[%s14259_s5 + $0x10] sm:$0xff] }
 0x676   :  { %7006 = vst.msk [vmem:[#allocation5 + $0x8] sm:$0xff] %vm7004_vm14, %v6984_v11  ;;  %v14282_v43 = vld [vmem:[#allocation15_spill] sm:$0xff]  ;;  %v10422_v21 = vpack.c.bf16 %v7363_v5, %v7362_v19 }
 0x677   :  { %vm6943_vm0 = vcmp.gt.f32.partialorder %v6922_v56, 0.0  ;;  %v6964_v16 = vmul.f32 0.01, %v6922_v56  ;;  %v6895_v20 = vadd.f32 %v14279_v9, %v6618_v59 }
 0x678   :  { %v6531_v28 = vpop.f32.mrb[56].mxu1  ;;  %10423 = vmatpush1.bf16.msra.mxu1 %v10422_v21 }
 0x679   :  { %v6985_v52 = vsel %vm6943_vm0, %v6922_v56, %v6964_v16  ;;  %v6923_v62 = vadd.f32 %v14032_v24, %v6895_v20  ;;  %v6619_v39 = vadd.f32 %v6531_v28, %v13960_v13  ;;  %v10069_v48 = vpop.f32.mrb[57].mxu1  ;;  %v7027_v46 = vld [vmem:[#allocation5] sm:$0xff]  ;;  %10424 = vmatprep.subr.bf16.mxu1 %v10798_v2  ;;  %v14283_v20 = vld [vmem:[#allocation16_spill] sm:$0xff] }
 0x67a   :  { %7007 = vst.msk [vmem:[#allocation5 + $0x10] sm:$0xff] %vm7004_vm14, %v6985_v52 }
 0x67b   :  { %vm6944_vm1 = vcmp.gt.f32.partialorder %v6923_v62, 0.0  ;;  %v6965_v61 = vmul.f32 0.01, %v6923_v62  ;;  %v6896_v12 = vadd.f32 %v14280_v29, %v6619_v39 }
 0x67c   :  { %v6536_v40 = vpop.f32.mrb[58].mxu1 }
 0x67d   :  { %v6986_v4 = vsel %vm6944_vm1, %v6923_v62, %v6965_v61  ;;  %v6924_v38 = vadd.f32 %v14032_v24, %v6896_v12  ;;  %v6620_v37 = vadd.f32 %v6536_v40, %v13963_v60  ;;  %v10072_v22 = vpop.f32.mrb[59].mxu1  ;;  %v7046_v57 = vld [vmem:[#allocation5 + $0x1] sm:$0xff] }
 0x67e   :  { %7008 = vst.msk [vmem:[#allocation5 + $0x18] sm:$0xff] %vm7004_vm14, %v6986_v4  ;;  %v7065_v60 = vmax.f32 %v7027_v46, %v7046_v57 }
 0x67f   :  { %vm6945_vm5 = vcmp.gt.f32.partialorder %v6924_v38, 0.0  ;;  %v6966_v3 = vmul.f32 0.01, %v6924_v38  ;;  %v6897_v13 = vadd.f32 %v14281_v7, %v6620_v37  ;;  %v7365_v37 = vld [vmem:[%s14259_s5 + $0x28] sm:$0xff] }
 0x680   :  { %v6541_v26 = vpop.f32.mrb[60].mxu1 }
 0x681   :  { %v6987_v18 = vsel %vm6945_vm5, %v6924_v38, %v6966_v3  ;;  %v6925_v53 = vadd.f32 %v14032_v24, %v6897_v13  ;;  %v6621_v14 = vadd.f32 %v6541_v26, %v13966_v44  ;;  %v10075_v58 = vpop.f32.mrb[61].mxu1  ;;  %v7047_v8 = vld [vmem:[#allocation5 + $0x9] sm:$0xff]  ;;  %v14284_v3 = vld [vmem:[#allocation17_spill] sm:$0xff] }
 0x682   :  { %v7085_v0 = vld [vmem:[#allocation5 + $0xa] sm:$0xff]  ;;  %7009 = vst.msk [vmem:[#allocation5 + $0x20] sm:$0xff] %vm7004_vm14, %v6987_v18 }
 0x683   :  { %v7104_v32 = vmax.f32 %v7047_v8, %v7085_v0  ;;  %vm6946_vm6 = vcmp.gt.f32.partialorder %v6925_v53, 0.0  ;;  %v6967_v35 = vmul.f32 0.01, %v6925_v53  ;;  %v6898_v44 = vadd.f32 %v14282_v43, %v6621_v14  ;;  %v7029_v61 = vld [vmem:[#allocation5 + $0x10] sm:$0xff] }
 0x684   :  { %v6546_v10 = vpop.f32.mrb[62].mxu1  ;;  %v7364_v38 = vld [vmem:[%s14259_s5 + $0x20] sm:$0xff] }
 0x685   :  { %v7123_v55 = vmax.f32 %v7065_v60, %v7104_v32  ;;  %v6988_v11 = vsel %vm6946_vm6, %v6925_v53, %v6967_v35  ;;  %v6926_v56 = vadd.f32 %v14032_v24, %v6898_v44  ;;  %v6622_v59 = vadd.f32 %v6546_v10, %v13971_v25  ;;  %v10078_v1 = vpop.f32.mrb[63].mxu1  ;;  %v7048_v16 = vld [vmem:[#allocation5 + $0x11] sm:$0xff]  ;;  %v14285_v60 = vld [vmem:[#allocation18_spill] sm:$0xff] }
 0x686   :  { %7010 = vst.msk [vmem:[#allocation5 + $0x28] sm:$0xff] %vm7004_vm14, %v6988_v11  ;;  %v7067_v40 = vmax.f32 %v7029_v61, %v7048_v16  ;;  %v10425_v7 = vpack.c.bf16 %v7365_v37, %v7364_v38  ;;  %v7367_v1 = vld [vmem:[%s14259_s5 + $0x38] sm:$0xff] }
 0x687   :  { %7142 = vst.msk [vmem:[#allocation6] sm:$0xff] %vm7004_vm14, %v7123_v55  ;;  %vm6947_vm7 = vcmp.gt.f32.partialorder %v6926_v56, 0.0  ;;  %v6968_v9 = vmul.f32 0.01, %v6926_v56  ;;  %v6899_v28 = vadd.f32 %v14283_v20, %v6622_v59  ;;  %v7366_v59 = vld [vmem:[%s14259_s5 + $0x30] sm:$0xff] }
 0x688   :  { %v6551_v52 = vpop.f32.mrb[64].mxu1  ;;  %10426 = vmatpush1.bf16.msra.mxu1 %v10425_v7 }
 0x689   :  { %v6989_v62 = vsel %vm6947_vm7, %v6926_v56, %v6968_v9  ;;  %v6927_v39 = vadd.f32 %v14032_v24, %v6899_v28  ;;  %v6623_v48 = vadd.f32 %v6551_v52, %v13974_v17  ;;  %v10081_v25 = vpop.f32.mrb[65].mxu1  ;;  %v7049_v29 = vld [vmem:[#allocation5 + $0x19] sm:$0xff]  ;;  %10427 = vmatprep.subr.bf16.mxu1 %v10798_v2  ;;  %v14286_v9 = vld [vmem:[#allocation19_spill] sm:$0xff]  ;;  %v10428_v28 = vpack.c.bf16 %v7367_v1, %v7366_v59 }
 0x68a   :  { %v7087_v12 = vld [vmem:[#allocation5 + $0x1a] sm:$0xff]  ;;  %7011 = vst.msk [vmem:[#allocation5 + $0x30] sm:$0xff] %vm7004_vm14, %v6989_v62 }
 0x68b   :  { %v7106_v4 = vmax.f32 %v7049_v29, %v7087_v12  ;;  %vm6948_vm8 = vcmp.gt.f32.partialorder %v6927_v39, 0.0  ;;  %v6969_v22 = vmul.f32 0.01, %v6927_v39  ;;  %v6900_v17 = vadd.f32 %v14284_v3, %v6623_v48  ;;  %v7031_v21 = vld [vmem:[#allocation5 + $0x20] sm:$0xff]  ;;  %v7369_v52 = vld [vmem:[%s14259_s5 + $0x48] sm:$0xff] }
 0x68c   :  { %v6556_v13 = vpop.f32.mrb[66].mxu1  ;;  %10429 = vmatpush1.bf16.msra.mxu1 %v10428_v28 }
 0x68d   :  { %v7125_v57 = vmax.f32 %v7067_v40, %v7106_v4  ;;  %v6990_v26 = vsel %vm6948_vm8, %v6927_v39, %v6969_v22  ;;  %v6928_v18 = vadd.f32 %v14032_v24, %v6900_v17  ;;  %v6624_v53 = vadd.f32 %v6556_v13, %v13977_v6  ;;  %v10084_v14 = vpop.f32.mrb[67].mxu1  ;;  %v7050_v8 = vld [vmem:[#allocation5 + $0x21] sm:$0xff]  ;;  %10430 = vmatprep.subr.bf16.mxu1 %v10798_v2  ;;  %v14287_v13 = vld [vmem:[#allocation20_spill] sm:$0xff] }
 0x68e   :  { %v8212_v58 = vld.sshfl [vmem:[#allocation6 + $0x4] sm:$0x1 pattern:$0x76325410]  ;;  %7012 = vst.msk [vmem:[#allocation5 + $0x38] sm:$0xff] %vm7004_vm14, %v6990_v26  ;;  %v7069_v11 = vmax.f32 %v7031_v21, %v7050_v8  ;;  %v7370_v17 = vld [vmem:[%s14259_s5 + $0x50] sm:$0xff] }
 0x68f   :  { %7187 = vrot.lane.b32.xlu1 %v8212_v58, %s10799_s2  ;;  %v8211_v46 = vld.sshfl [vmem:[#allocation6 + $0x2] sm:$0x1 pattern:$0x76325410]  ;;  %7144 = vst.msk [vmem:[#allocation6 + $0x10] sm:$0xff] %vm7004_vm14, %v7125_v57  ;;  %vm6949_vm10 = vcmp.gt.f32.partialorder %v6928_v18, 0.0  ;;  %v6901_v32 = vadd.f32 %v14285_v60, %v6624_v53 }
 0x690   :  { %v6970_v0 = vmul.f32 0.01, %v6928_v18  ;;  %7173 = vrot.lane.b32.xlu0 %v8211_v46, %s10800_s12  ;;  %v7161_v6 = vld [vmem:[#allocation6] sm:$0x1]  ;;  %v6561_v19 = vpop.f32.mrb[68].mxu1 }
 0x691   :  { %7163 = vst.msk [vmem:[#allocation7] sm:$0x1] %vm7162_vm9, %v7161_v6  ;;  %v6929_v35 = vadd.f32 %v14032_v24, %v6901_v32  ;;  %v6625_v43 = vadd.f32 %v6561_v19, %v13982_v49  ;;  %v10087_v44 = vpop.f32.mrb[69].mxu1  ;;  %v7051_v10 = vld [vmem:[#allocation5 + $0x29] sm:$0xff]  ;;  %v14288_v32 = vld [vmem:[#allocation21_spill] sm:$0xff] }
 0x692   :  { %v6991_v5 = vsel %vm6949_vm10, %v6928_v18, %v6970_v0  ;;  %v7089_v55 = vld [vmem:[#allocation5 + $0x2a] sm:$0xff]  ;;  %vm7025_vm10 = vcmask 123904  }
 0x693   :  { %7013 = vst.msk [vmem:[#allocation5 + $0x40] sm:$0xff] %vm7004_vm14, %v6991_v5  ;;  %v7108_v56 = vmax.f32 %v7051_v10, %v7089_v55  ;;  %v7368_v49 = vld [vmem:[%s14259_s5 + $0x40] sm:$0xff]  ;;  %vm6950_vm11 = vcmp.gt.f32.partialorder %v6929_v35, 0.0  ;;  %v6971_v16 = vmul.f32 0.01, %v6929_v35  ;;  %v6902_v20 = vadd.f32 %v14286_v9, %v6625_v43  ;;  %v7032_v4 = vld [vmem:[#allocation5 + $0x28] sm:$0xff] }
 0x694   :  { %v6566_v62 = vpop.f32.mrb[70].mxu1  ;;  %v10431_v38 = vpack.c.bf16 %v7369_v52, %v7368_v49  ;;  %v7070_v3 = vmax.f32 %v7032_v4, %v7051_v10  ;;  %v14289_v10 = vld [vmem:[#allocation22_spill] sm:$0xff]  ;;  %v14290_v9 = vld [vmem:[#allocation23_spill] sm:$0xff] }
 0x695   :  { %v7127_v39 = vmax.f32 %v7069_v11, %v7108_v56  ;;  %v7052_v48 = vld [vmem:[#allocation5 + $0x31] sm:$0xff]  ;;  %v6992_v61 = vsel %vm6950_vm11, %v6929_v35, %v6971_v16  ;;  %v6930_v29 = vadd.f32 %v14032_v24, %v6902_v20  ;;  %v6626_v12 = vadd.f32 %v6566_v62, %v13987_v30  ;;  %v10090_v40 = vpop.f32.mrb[71].mxu1  ;;  %v7371_v30 = vld [vmem:[%s14259_s5 + $0x58] sm:$0xff] }
 0x696   :  { %v7090_v25 = vld [vmem:[#allocation5 + $0x32] sm:$0xff]  ;;  %7014 = vst.msk [vmem:[#allocation5 + $0x48] sm:$0xff] %vm7004_vm14, %v6992_v61  ;;  %v8213_v22 = vld.sshfl [vmem:[#allocation6 + $0x12] sm:$0x1 pattern:$0x76325410]  ;;  %10432 = vmatpush1.bf16.msra.mxu1 %v10431_v38  ;;  %v10434_v8 = vpack.c.bf16 %v7371_v30, %v7370_v17 }
 0x697   :  { %v7109_v37 = vmax.f32 %v7052_v48, %v7090_v25  ;;  %7146 = vst.msk [vmem:[#allocation6 + $0x20] sm:$0xff] %vm7004_vm14, %v7127_v39  ;;  %vm6951_vm12 = vcmp.gt.f32.partialorder %v6930_v29, 0.0  ;;  %v6972_v7 = vmul.f32 0.01, %v6930_v29  ;;  %v6903_v57 = vadd.f32 %v14287_v13, %v6626_v12  ;;  %7201 = vrot.lane.b32.xlu0 %v8213_v22, %s10801_s23  ;;  %10433 = vmatprep.subr.bf16.mxu1 %v10798_v2  ;;  %v14291_v61 = vld [vmem:[#allocation24_spill] sm:$0xff] }
 0x698   :  { %v6571_v26 = vpop.f32.mrb[72].mxu1  ;;  %v8214_v0 = vld.sshfl [vmem:[#allocation6 + $0x14] sm:$0x1 pattern:$0x76325410]  ;;  %vm7176_vm11 = vcmask 254080  }
 0x699   :  { %v7128_v18 = vmax.f32 %v7070_v3, %v7109_v37  ;;  %v6993_v53 = vsel %vm6951_vm12, %v6930_v29, %v6972_v7  ;;  %v6931_v14 = vadd.f32 %v14032_v24, %v6903_v57  ;;  %v6627_v58 = vadd.f32 %v6571_v26, %v13990_v27  ;;  %v10093_v46 = vpop.f32.mrb[73].mxu1  ;;  %v8215_v44 = vld.sshfl [vmem:[#allocation6 + $0x16] sm:$0x1 pattern:$0x76325410] }
 0x69a   :  { %7015 = vst.msk [vmem:[#allocation5 + $0x50] sm:$0xff] %vm7004_vm14, %v6993_v53  ;;  %10435 = vmatpush1.bf16.msra.mxu1 %v10434_v8  ;;  %vm7190_vm12 = vcmask 385280  }
 0x69b   :  { %7147 = vst.msk [vmem:[#allocation6 + $0x28] sm:$0xff] %vm7004_vm14, %v7128_v18  ;;  %vm6952_vm13 = vcmp.gt.f32.partialorder %v6931_v14, 0.0  ;;  %v6973_v60 = vmul.f32 0.01, %v6931_v14  ;;  %v6904_v6 = vadd.f32 %v14288_v32, %v6627_v58  ;;  %7215 = vrot.lane.b32.xlu0 %v8214_v0, %s10802_s24  ;;  %10436 = vmatprep.subr.bf16.mxu1 %v10798_v2 }
 0x69c   :  { %v6576_v19 = vpop.f32.mrb[74].mxu1 }
 0x69d   :  { %v6994_v5 = vsel %vm6952_vm13, %v6931_v14, %v6973_v60  ;;  %v6932_v27 = vadd.f32 %v14032_v24, %v6904_v6  ;;  %v6628_v35 = vadd.f32 %v6576_v19, %v13995_v45  ;;  %v10096_v43 = vpop.f32.mrb[75].mxu1  ;;  %vm7204_vm13 = vcmask 516480  }
 0x69e   :  { %7016 = vst.msk [vmem:[#allocation5 + $0x58] sm:$0xff] %vm7004_vm14, %v6994_v5  ;;  %v7372_v43 = vld [vmem:[%s14259_s5 + $0x60] sm:$0xff] }
 0x69f   :  { %vm6953_vm4 = vcmp.gt.f32.partialorder %v6932_v27, 0.0  ;;  %v6974_v21 = vmul.f32 0.01, %v6932_v27  ;;  %v6905_v55 = vadd.f32 %v14289_v10, %v6628_v35  ;;  %7229 = vrot.lane.b32.xlu0 %v8215_v44, %s10803_s25 }
 0x6a0   :  { %v6581_v11 = vpop.f32.mrb[76].mxu1 }
 0x6a1   :  { %v6995_v56 = vsel %vm6953_vm4, %v6932_v27, %v6974_v21  ;;  %v6933_v59 = vadd.f32 %v14032_v24, %v6905_v55  ;;  %v6629_v45 = vadd.f32 %v6581_v11, %v14000_v54  ;;  %v10099_v1 = vpop.f32.mrb[77].mxu1  ;;  %v7037_v22 = vld [vmem:[#allocation5 + $0x50] sm:$0xff]  ;;  %vm7218_vm4 = vcmask 647680  }
 0x6a2   :  { %7017 = vst.msk [vmem:[#allocation5 + $0x60] sm:$0xff] %vm7004_vm14, %v6995_v56  ;;  %v7262_v49 = vld [vmem:[#allocation6 + $0x28] sm:$0x1] }
 0x6a3   :  { %vm6954_vm2 = vcmp.gt.f32.partialorder %v6933_v59, 0.0  ;;  %v6975_v16 = vmul.f32 0.01, %v6933_v59  ;;  %v6906_v20 = vadd.f32 %v14290_v9, %v6629_v45  ;;  %7263 = vst.msk [vmem:[#allocation7 + $0x2] sm:$0x1] %vm7162_vm9, %v7262_v49 }
 0x6a4   :  { %v6586_v28 = vpop.f32.mrb[78].mxu1 }
 0x6a5   :  { %v6996_v52 = vsel %vm6954_vm2, %v6933_v59, %v6975_v16  ;;  %v6934_v62 = vadd.f32 %v14032_v24, %v6906_v20  ;;  %v6630_v39 = vadd.f32 %v6586_v28, %v14010_v63  ;;  %v10102_v48 = vpop.f32.mrb[79].mxu1  ;;  %v7056_v25 = vld [vmem:[#allocation5 + $0x51] sm:$0xff]  ;;  %vm7246_vm2 = vcmask 910080  }
 0x6a6   :  { %7018 = vst.msk [vmem:[#allocation5 + $0x68] sm:$0xff] %vm7004_vm14, %v6996_v52  ;;  %v7075_v63 = vmax.f32 %v7037_v22, %v7056_v25 }
 0x6a7   :  { %vm6955_vm15 = vcmp.gt.f32.partialorder %v6934_v62, 0.0  ;;  %v6976_v54 = vmul.f32 0.01, %v6934_v62  ;;  %v6907_v29 = vadd.f32 %v14291_v61, %v6630_v39 }
 0x6a8   :  { %v6591_v12 = vpop.f32.mrb[80].mxu1  ;;  %v8216_v61 = vld.sshfl [vmem:[#allocation6 + $0x24] sm:$0x1 pattern:$0x76325410] }
 0x6a9   :  { %v6997_v40 = vsel %vm6955_vm15, %v6934_v62, %v6976_v54  ;;  %v6935_v4 = vadd.f32 %v14032_v24, %v6907_v29  ;;  %v6631_v38 = vadd.f32 %v6591_v12, %v14014_v42  ;;  %v10105_v37 = vpop.f32.mrb[81].mxu1  ;;  %v7057_v3 = vld [vmem:[#allocation5 + $0x59] sm:$0xff]  ;;  %vm7260_vm15 = vcmask 1041280  }
 0x6aa   :  { %v7095_v17 = vld [vmem:[#allocation5 + $0x5a] sm:$0xff]  ;;  %7019 = vst.msk [vmem:[#allocation5 + $0x70] sm:$0xff] %vm7004_vm14, %v6997_v40  ;;  %v7375_v40 = vld [vmem:[%s14259_s5 + $0x78] sm:$0xff] }
 0x6ab   :  { %v7114_v30 = vmax.f32 %v7057_v3, %v7095_v17  ;;  %vm6956_vm0 = vcmp.gt.f32.partialorder %v6935_v4, 0.0  ;;  %v6977_v7 = vmul.f32 0.01, %v6935_v4  ;;  %v6908_v13 = vadd.f32 %v13968_v51, %v6631_v38  ;;  %v7039_v19 = vld [vmem:[#allocation5 + $0x60] sm:$0xff] }
 0x6ac   :  { %v6596_v57 = vpop.f32.mrb[82].mxu1  ;;  %v8217_v37 = vld.sshfl [vmem:[#allocation6 + $0x26] sm:$0x1 pattern:$0x76325410] }
 0x6ad   :  { %v7133_v26 = vmax.f32 %v7075_v63, %v7114_v30  ;;  %v6998_v18 = vsel %vm6956_vm0, %v6935_v4, %v6977_v7  ;;  %v6936_v53 = vadd.f32 %v14032_v24, %v6908_v13  ;;  %v6632_v14 = vadd.f32 %v6596_v57, %v14017_v34  ;;  %v10108_v42 = vpop.f32.mrb[83].mxu1  ;;  %v7058_v58 = vld [vmem:[#allocation5 + $0x61] sm:$0xff] }
 0x6ae   :  { %7020 = vst.msk [vmem:[#allocation5 + $0x78] sm:$0xff] %vm7004_vm14, %v6998_v18  ;;  %v7077_v27 = vmax.f32 %v7039_v19, %v7058_v58  ;;  %v7377_v42 = vld [vmem:[%s14259_s5 + $0x88] sm:$0xff]  ;;  %vm7559_vm0 = vcmask 74752  }
 0x6af   :  { %7152 = vst.msk [vmem:[#allocation6 + $0x50] sm:$0xff] %vm7004_vm14, %v7133_v26  ;;  %vm6957_vm1 = vcmp.gt.f32.partialorder %v6936_v53, 0.0  ;;  %v6978_v46 = vmul.f32 0.01, %v6936_v53  ;;  %v6909_v8 = vadd.f32 %v13979_v41, %v6632_v14  ;;  %v7373_v41 = vld [vmem:[%s14259_s5 + $0x68] sm:$0xff]  ;;  %v7376_v14 = vld [vmem:[%s14259_s5 + $0x80] sm:$0xff] }
 0x6b0   :  { %v6601_v0 = vpop.f32.mrb[84].mxu1  ;;  %v10437_v21 = vpack.c.bf16 %v7373_v41, %v7372_v43  ;;  %v10443_v58 = vpack.c.bf16 %v7377_v42, %v7376_v14 }
 0x6b1   :  { %v6999_v60 = vsel %vm6957_vm1, %v6936_v53, %v6978_v46  ;;  %v6937_v51 = vadd.f32 %v14032_v24, %v6909_v8  ;;  %v6633_v32 = vadd.f32 %v6601_v0, %v14020_v50  ;;  %v10111_v6 = vpop.f32.mrb[85].mxu1  ;;  %v7059_v5 = vld [vmem:[#allocation5 + $0x69] sm:$0xff] }
 0x6b2   :  { %v7097_v34 = vld [vmem:[#allocation5 + $0x6a] sm:$0xff]  ;;  %7021 = vst.msk [vmem:[#allocation5 + $0x80] sm:$0xff] %vm7004_vm14, %v6999_v60  ;;  %10438 = vmatpush1.bf16.msra.mxu1 %v10437_v21 }
 0x6b3   :  { %v7116_v35 = vmax.f32 %v7059_v5, %v7097_v34  ;;  %vm6958_vm5 = vcmp.gt.f32.partialorder %v6937_v51, 0.0  ;;  %v6979_v44 = vmul.f32 0.01, %v6937_v51  ;;  %v6910_v50 = vadd.f32 %v13984_v31, %v6633_v32  ;;  %10439 = vmatprep.subr.bf16.mxu1 %v10798_v2  ;;  %v7041_v39 = vld [vmem:[#allocation5 + $0x70] sm:$0xff] }
 0x6b4   :  { %v6606_v10 = vpop.f32.mrb[86].mxu1 }
 0x6b5   :  { %v7135_v55 = vmax.f32 %v7077_v27, %v7116_v35  ;;  %v7000_v11 = vsel %vm6958_vm5, %v6937_v51, %v6979_v44  ;;  %v6938_v56 = vadd.f32 %v14032_v24, %v6910_v50  ;;  %v6634_v59 = vadd.f32 %v6606_v10, %v14023_v15  ;;  %v10114_v1 = vpop.f32.mrb[87].mxu1  ;;  %v7060_v16 = vld [vmem:[#allocation5 + $0x71] sm:$0xff] }
 0x6b6   :  { %v8219_v45 = vld.sshfl [vmem:[#allocation6 + $0x55] sm:$0x1 pattern:$0x76325410]  ;;  %7022 = vst.msk [vmem:[#allocation5 + $0x88] sm:$0xff] %vm7004_vm14, %v7000_v11  ;;  %v7079_v29 = vmax.f32 %v7041_v39, %v7060_v16  ;;  %v7472_v1 = vld [vmem:[%s14261_s7 + $0x10] sm:$0xff] }
 0x6b7   :  { %7288 = vrot.lane.b32.xlu1 %v8219_v45, %s10799_s2  ;;  %v8218_v49 = vld.sshfl [vmem:[#allocation6 + $0x53] sm:$0x1 pattern:$0x76325410]  ;;  %7154 = vst.msk [vmem:[#allocation6 + $0x60] sm:$0xff] %vm7004_vm14, %v7135_v55  ;;  %vm6959_vm6 = vcmp.gt.f32.partialorder %v6938_v56, 0.0  ;;  %v6911_v9 = vadd.f32 %v13992_v23, %v6634_v59 }
 0x6b8   :  { %v6980_v31 = vmul.f32 0.01, %v6938_v56  ;;  %7275 = vrot.lane.b32.xlu0 %v8218_v49, %s10800_s12  ;;  %v7264_v15 = vld [vmem:[#allocation6 + $0x51] sm:$0x1]  ;;  %v6611_v20 = vpop.f32.mrb[88].mxu1  ;;  %v7374_v23 = vld [vmem:[%s14259_s5 + $0x70] sm:$0xff] }
 0x6b9   :  { %7265 = vst.msk [vmem:[#allocation7 + $0x1] sm:$0x1] %vm7162_vm9, %v7264_v15  ;;  %v6939_v52 = vadd.f32 %v14032_v24, %v6911_v9  ;;  %v6635_v62 = vadd.f32 %v6611_v20, %v14026_v33  ;;  %v7061_v48 = vld [vmem:[#allocation5 + $0x79] sm:$0xff]  ;;  %v10117_v54 = vpop.f32.mrb[89].mxu1  ;;  %v10440_v38 = vpack.c.bf16 %v7375_v40, %v7374_v23  ;;  %s10805_s2 = smov 112   ;;  %v7470_v55 = vld [vmem:[%s14261_s7] sm:$0xff] }
 0x6ba   :  { %v7001_v28 = vsel %vm6959_vm6, %v6938_v56, %v6980_v31  ;;  %v7099_v25 = vld [vmem:[#allocation5 + $0x7a] sm:$0xff]  ;;  %v7473_v49 = vld [vmem:[%s14261_s7 + $0x18] sm:$0xff]  ;;  %v7474_v31 = vld [vmem:[%s14261_s7 + $0x20] sm:$0xff] }
 0x6bb   :  { %7023 = vst.msk [vmem:[#allocation5 + $0x90] sm:$0xff] %vm7004_vm14, %v7001_v28  ;;  %v7118_v12 = vmax.f32 %v7061_v48, %v7099_v25  ;;  %vm6960_vm7 = vcmp.gt.f32.partialorder %v6939_v52, 0.0  ;;  %v6981_v4 = vmul.f32 0.01, %v6939_v52  ;;  %v6912_v33 = vadd.f32 %v13997_v36, %v6635_v62  ;;  %v7042_v7 = vld [vmem:[#allocation5 + $0x78] sm:$0xff]  ;;  %10441 = vmatpush1.bf16.msra.mxu1 %v10440_v38  ;;  %v7477_v20 = vld [vmem:[%s14261_s7 + $0x38] sm:$0xff] }
 0x6bc   :  { %7243 = vrot.lane.b32.xlu0 %v8216_v61, %s10804_s11  ;;  %v7080_v26 = vmax.f32 %v7042_v7, %v7061_v48  ;;  %10442 = vmatprep.subr.bf16.mxu1 %v10798_v2  ;;  %v7471_v11 = vld [vmem:[%s14261_s7 + $0x8] sm:$0xff]  ;;  %v10449_v16 = vpack.c.bf16 %v7473_v49, %v7472_v1  ;;  %v8228_v54 = vld [vmem:[%s14262_s8] ss:$0 sm:$0xff] }
 0x6bd   :  { %v7137_v22 = vmax.f32 %v7079_v29, %v7118_v12  ;;  %v7062_v3 = vld [vmem:[#allocation5 + $0x81] sm:$0xff]  ;;  %v7002_v63 = vsel %vm6960_vm7, %v6939_v52, %v6981_v4  ;;  %v6940_v30 = vadd.f32 %v14032_v24, %v6912_v33  ;;  %v10446_v45 = vpack.c.bf16 %v7471_v11, %v7470_v55  ;;  %v7475_v9 = vld [vmem:[%s14261_s7 + $0x28] sm:$0xff]  ;;  %v8225_v52 = vld [vmem:[%s14260_s6] ss:$0 sm:$0xff] }
 0x6be   :  { %v7100_v17 = vld [vmem:[#allocation5 + $0x82] sm:$0xff]  ;;  %7024 = vst.msk [vmem:[#allocation5 + $0x98] sm:$0xff] %vm7004_vm14, %v7002_v63  ;;  %v8220_v57 = vld.sshfl [vmem:[#allocation6 + $0x63] sm:$0x1 pattern:$0x76325410]  ;;  %v10452_v15 = vpack.c.bf16 %v7475_v9, %v7474_v31 }
 0x6bf   :  { %v7119_v13 = vmax.f32 %v7062_v3, %v7100_v17  ;;  %7156 = vst.msk [vmem:[#allocation6 + $0x70] sm:$0xff] %vm7004_vm14, %v7137_v22  ;;  %vm6961_vm8 = vcmp.gt.f32.partialorder %v6940_v30, 0.0  ;;  %v6982_v36 = vmul.f32 0.01, %v6940_v30  ;;  %7301 = vrot.lane.b32.xlu1 %v8220_v57, %s10801_s23  ;;  %10444 = vmatpush1.bf16.msra.mxu1 %v10443_v58 }
 0x6c0   :  { %7257 = vrot.lane.b32.xlu0 %v8217_v37, %s10805_s2  ;;  %v8221_v53 = vld.sshfl [vmem:[#allocation6 + $0x65] sm:$0x1 pattern:$0x76325410]  ;;  %10445 = vmatprep.subr.bf16.mxu1 %v10798_v2 }
 0x6c1   :  { %v7138_v18 = vmax.f32 %v7080_v26, %v7119_v13  ;;  %v7003_v24 = vsel %vm6961_vm8, %v6940_v30, %v6982_v36  ;;  %v8222_v46 = vld.sshfl [vmem:[#allocation6 + $0x67] sm:$0x1 pattern:$0x76325410] }
 0x6c2   :  { %7026 = vst.msk [vmem:[#allocation5 + $0xa0] sm:$0x3] %vm7025_vm10, %v7003_v24 }
 0x6c3   :  { %7157 = vst.msk [vmem:[#allocation6 + $0x78] sm:$0xff] %vm7004_vm14, %v7138_v18  ;;  %7314 = vrot.lane.b32.xlu1 %v8221_v53, %s10802_s24 }
 0x6c6   :  { %v8223_v0 = vld.sshfl [vmem:[#allocation6 + $0x75] sm:$0x1 pattern:$0x76325410] }
 0x6c7   :  { %7327 = vrot.lane.b32.xlu1 %v8222_v46, %s10803_s25  ;;  %v8224_v60 = vld.sshfl [vmem:[#allocation6 + $0x77] sm:$0x1 pattern:$0x76325410] }
 0x6ca   :  { %v7357_v8 = vld [vmem:[#allocation6 + $0x79] sm:$0x1] }
 0x6cb   :  { %7358 = vst.msk [vmem:[#allocation7 + $0x3] sm:$0x1] %vm7162_vm9, %v7357_v8  ;;  %7340 = vrot.lane.b32.xlu1 %v8223_v0, %s10804_s11  ;;  %vm7232_vm9 = vcmask 778880  }
 0x6cf   :  { %7353 = vrot.lane.b32.xlu1 %v8224_v60, %s10805_s2 }
 0x701   :  { %v7188_v51 = vpop.permute.xlu1 %7187 }
 0x702   :  { %v7174_v32 = vpop.permute.xlu0 %7173 }
 0x703   :  { %7177 = vst.msk [vmem:[#allocation7] sm:$0x1] %vm7176_vm11, %v7174_v32 }
 0x704   :  { %7191 = vst.msk [vmem:[#allocation7] sm:$0x1] %vm7190_vm12, %v7188_v51 }
 0x709   :  { %v7202_v6 = vpop.permute.xlu0 %7201 }
 0x70a   :  { %7205 = vst.msk [vmem:[#allocation7] sm:$0x1] %vm7204_vm13, %v7202_v6 }
 0x70d   :  { %v7216_v19 = vpop.permute.xlu0 %7215 }
 0x70e   :  { %7219 = vst.msk [vmem:[#allocation7] sm:$0x1] %vm7218_vm4, %v7216_v19 }
 0x711   :  { %v7230_v5 = vpop.permute.xlu0 %7229 }
 0x712   :  { %7233 = vst.msk [vmem:[#allocation7] sm:$0x1] %vm7232_vm9, %v7230_v5 }
 0x729   :  { %v7289_v34 = vpop.permute.xlu1 %7288 }
 0x72a   :  { %v7276_v27 = vpop.permute.xlu0 %7275 }
 0x72b   :  { %7278 = vst.msk [vmem:[#allocation7 + $0x1] sm:$0x1] %vm7176_vm11, %v7276_v27 }
 0x72c   :  { %7291 = vst.msk [vmem:[#allocation7 + $0x1] sm:$0x1] %vm7190_vm12, %v7289_v34 }
 0x72e   :  { %v7244_v35 = vpop.permute.xlu0 %7243 }
 0x72f   :  { %7247 = vst.msk [vmem:[#allocation7] sm:$0x1] %vm7246_vm2, %v7244_v35 }
 0x731   :  { %v7302_v41 = vpop.permute.xlu1 %7301 }
 0x732   :  { %v7258_v43 = vpop.permute.xlu0 %7257  ;;  %7304 = vst.msk [vmem:[#allocation7 + $0x1] sm:$0x1] %vm7204_vm13, %v7302_v41 }
 0x733   :  { %7261 = vst.msk [vmem:[#allocation7] sm:$0x1] %vm7260_vm15, %v7258_v43 }
 0x735   :  { %v7315_v44 = vpop.permute.xlu1 %7314 }
 0x736   :  { %7317 = vst.msk [vmem:[#allocation7 + $0x1] sm:$0x1] %vm7218_vm4, %v7315_v44 }
 0x739   :  { %v7328_v50 = vpop.permute.xlu1 %7327 }
 0x73a   :  { %7330 = vst.msk [vmem:[#allocation7 + $0x1] sm:$0x1] %vm7232_vm9, %v7328_v50 }
 0x73d   :  { %v7341_v21 = vpop.permute.xlu1 %7340 }
 0x73e   :  { %7343 = vst.msk [vmem:[#allocation7 + $0x1] sm:$0x1] %vm7246_vm2, %v7341_v21 }
 0x741   :  { %v7354_v10 = vpop.permute.xlu1 %7353 }
 0x742   :  { %7356 = vst.msk [vmem:[#allocation7 + $0x1] sm:$0x1] %vm7260_vm15, %v7354_v10 }
 0x749   :  { %v8226_v56 = vld.sshfl [vmem:[#allocation7] sm:$0x33 pattern:$0x76325410] }
 0x74a   :  { %v7393_v59 = vcombine.high %v8226_v56, %v8226_v56 }
 0x74c   :  { %8227 = vmatprep.mubr.msk.f32.mxu1 %vm7004_vm14, %v7393_v59  ;;  %vm7485_vm14 = vcmask 523264  }
 0x74d   :  { %7462 = vmatmul.mubr.f32.vlgmr.msra.gmra.mrb[90].mxu1 %v8226_v56 }
 0x74e   :  { %10447 = vmatpush3.bf16.msra.mxu1 %v10446_v45  ;;  %10199 = vmatprep.mubr.msk.f32.mxu1 %vm10797_vm3, %v10796_v47  ;;  %v7476_v47 = vld [vmem:[%s14261_s7 + $0x30] sm:$0xff]  ;;  %s7567_s7 = sshll.u32 %s10806_s10, 4  ;;  %s7568_s7 = int_to_ptr.vmem [resolvable:$true] %s7567_s7 }
 0x74f   :  { %10448 = vmatprep.subr.bf16.mxu1 %v10798_v2  ;;  %v10455_v28 = vpack.c.bf16 %v7477_v20, %v7476_v47  ;;  %s10772_s6 = scalar_lea.vmem %s7568_s7, 32  ;;  %p10777_p1 = scmp.lt.s32.totalorder %s7568_s7, %s7568_s7 }
 0x750   :  { %p10773_p0 = scmp.ne.s32.totalorder %s7568_s7, %s10772_s6  ;;  %p10778_p2 = scmp.lt.s32.totalorder %s10772_s6, %s10772_s6 }
 0x752   :  { %10450 = vmatpush3.bf16.msra.mxu1 %v10449_v16  ;;  %p10779_p3 = por %p10778_p2, %p10777_p1 }
 0x753   :  { %10451 = vmatprep.subr.bf16.mxu1 %v10798_v2 }
 0x754   :  { %p10780_p4 = pnand %p10779_p3, %p10773_p0 }
 0x756   :  { %10453 = vmatpush3.bf16.msra.mxu1 %v10452_v15 }
 0x757   :  { %10454 = vmatprep.subr.bf16.mxu1 %v10798_v2 }
 0x75a   :  { %10456 = vmatpush3.bf16.msra.mxu1 %v10455_v28 }
 0x820   :  { %v7463_v62 = vpop.f32.mrb[90].mxu1 }
 0x821   :  { %v7464_v39 = vadd.f32 %v8225_v52, %v7463_v62  ;;  %v7465_v48 = vpop.f32.mrb[91].mxu1 }
 0x823   :  { %vm7467_vm3 = vcmp.gt.f32.partialorder %v7464_v39, 0.0  ;;  %v7468_v25 = vmul.f32 0.01, %v7464_v39 }
 0x825   :  { %v7469_v2 = vsel %vm7467_vm3, %v7464_v39, %v7468_v25 }
 0x826   :  { %10200 = vmatmul.mubr.msk.f32.vlgmr.msra.gmra.mrb[92].mxu1 %vm7485_vm14, %v7469_v2 }
 0x8f9   :  { %v7555_v61 = vpop.f32.mrb[92].mxu1 }
 0x8fa   :  { %v7556_v29 = vadd.f32 %v8228_v54, %v7555_v61  ;;  %v10201_v12 = vpop.f32.mrb[93].mxu1 }
 0x8fc   :  { %7560 = vst.msk [vmem:[#allocation8] sm:$0x3] %vm7559_vm0, %v7556_v29 }
 0x8fd   :  { %10783 = shalt.err (!%p10780_p4)
}
 0x8fe   :  { %s10784_s12 = scalar_lea.hbm %s14263_s9, 32 }
 0x8ff   :  { %p10785_p5 = scmp.ne.s32.totalorder %s14263_s9, %s10784_s12  ;;  %p10788_p6 = scmp.lt.u32.totalorder %s10784_s12, %s14263_s9 }
 0x901   :  { %p10790_p7 = pnand %p10788_p6, %p10785_p5 }
 0x903   :  { %10793 = shalt.err (!%p10790_p7)
}
 0x904   :  { %7570 = dma.vmem_to_hbm [thread:$0]  %s7568_s7, 32, %s14263_s9, [#allocation9]  }
 0x905   :  { %10794 = dma.done.wait [#allocation9], 32  }
 0x906   :  { %10795 = vsyncadd [#allocation9], 4294967264 }
 0x907   :  { %7574 = vsyncpa [#allocation9], 1 }

</bundles_post_ra>
